<compile_context>
chip_gen: v7x
topology: tpu7x:2x2x1
jax: 0.10.0
libtpu: 0.0.40
codegen_flags: <defaults>
</compile_context>

<pallas_src>
import math
import functools

import jax
import jax.numpy as jnp
from jax.experimental import pallas as pl
from jax.experimental.pallas import tpu as pltpu

# ----------------------------- config ---------------------------------------
HIDDEN = 32
NUM_HEADS = 4
HEAD_DIM = HIDDEN // NUM_HEADS
FFN_DIM = 64
VOCAB = 64
MAX_POS = 16
NUM_ENC_LAYERS = 2
NUM_DEC_LAYERS = 2
LN_EPS = 1e-5
NEG_INF = -1e9
LANE = 128


# ----------------------------- static slab layouts ---------------------------
def _build_w_layout():
    """bf16 weight slab: name -> (row_offset, rows, cols). All offsets 32-aligned."""
    layout, off = {}, 0

    def add(name, rows, cols):
        nonlocal off
        layout[name] = (off, rows, cols)
        off += rows

    H, F = HIDDEN, FFN_DIM
    for l in range(NUM_ENC_LAYERS):
        add(f"e{l}_wqkv", H, 3 * H)
        add(f"e{l}_wo", H, H)
        add(f"e{l}_w1", H, F)
        add(f"e{l}_w2", F, H)
    for l in range(NUM_DEC_LAYERS):
        add(f"d{l}_wqkv", H, 3 * H)
        add(f"d{l}_wos", H, H)
        add(f"d{l}_wqc", H, H)
        add(f"d{l}_woc", H, H)
        add(f"d{l}_w1", H, F)
        add(f"d{l}_w2", F, H)
    add("wkvc", H, 2 * H * NUM_DEC_LAYERS)   # cross-attn K/V weights, all dec layers
    add("lm_w", H, LANE)                     # zero-padded to 128 lanes (lane-dense out)
    return layout, off


W_LAYOUT, W_ROWS = _build_w_layout()


def _round_up(x, m):
    return (x + m - 1) // m * m


# fp32 vector slab (embedding tables + biases + LayerNorm params), 8-row blocks.
V_TOK_OFF = 0
V_POS_OFF = VOCAB
V_MISC_OFF = _round_up(VOCAB + MAX_POS, 8)        # 8-row misc block
V_ENC_OFF = V_MISC_OFF + 8                        # 8 rows per encoder layer
V_DEC_OFF = V_ENC_OFF + 8 * NUM_ENC_LAYERS        # 16 rows per decoder layer
V_ROWS = V_DEC_OFF + 16 * NUM_DEC_LAYERS
# misc block rows: 0 emb_g, 1 emb_b, 2 lm_b (padded to 128), 3 bkv_c_all
# enc block rows:  0 bqkv, 1 bo, 2 ln1_g, 3 ln1_b, 4 b1, 5 b2, 6 ln2_g, 7 ln2_b
# dec block rows:  0 bqkv, 1 bo_s, 2 ln1_g, 3 ln1_b, 4 bq_c, 5 bo_c, 6 ln2_g,
#                  7 ln2_b, 8 b1, 9 b2, 10 ln3_g, 11 ln3_b


# ----------------------------- fused kernel ----------------------------------
def _fused_transformer_kernel(ids_ref, bias_ref, wslab_ref, vslab_ref, out_ref,
                              *, ne, nd, return_logits):
    """Whole FullTransformer forward in one kernel; everything VMEM-resident."""
    H, F = HIDDEN, FFN_DIM
    nt = ne + nd

    def Wv(name):
        off, rows, cols = W_LAYOUT[name]
        return wslab_ref[off:off + rows, :cols]          # bf16 weight tile (aligned)

    def dot_bf(x, w_bf16):
        return jnp.dot(x.astype(jnp.bfloat16), w_bf16,
                       preferred_element_type=jnp.float32)

    def layer_norm(y, g, b):
        mean = jnp.mean(y, axis=-1, keepdims=True)
        var = jnp.mean(jnp.square(y - mean), axis=-1, keepdims=True)
        return (y - mean) * jax.lax.rsqrt(var + LN_EPS) * g + b

    # Per-head lane masks (computed once, reused for every attention layer).
    lane = jax.lax.broadcasted_iota(jnp.int32, (1, H), 1)
    head_masks = [
        ((lane >= h * HEAD_DIM) & (lane < (h + 1) * HEAD_DIM)).astype(jnp.float32)
        for h in range(NUM_HEADS)
    ]

    def attend(q, k, v, bias):
        # q: (nq,H) already scaled by 1/sqrt(head_dim) (folded into the weights),
        # k/v: (nk,H), bias: (nq,nk) additive (block-diag forbids cross-batch).
        nq = q.shape[0]
        kb = k.astype(jnp.bfloat16)
        scores = [
            jax.lax.dot_general((q * hm).astype(jnp.bfloat16), kb,
                                (((1,), (1,)), ((), ())),
                                preferred_element_type=jnp.float32) + bias
            for hm in head_masks
        ]
        s = jnp.concatenate(scores, axis=0)              # (heads*nq, nk) stacked
        s = s - jnp.max(s, axis=-1, keepdims=True)       # one softmax for all heads
        e = jnp.exp(s)
        # approx reciprocal: EUP slot, ~1e-3 rel. error; use approx=False for parity.
        p = e * pl.reciprocal(jnp.sum(e, axis=-1, keepdims=True), approx=True)
        c = jnp.dot(p.astype(jnp.bfloat16), v.astype(jnp.bfloat16),
                    preferred_element_type=jnp.float32)  # (heads*nq, H)
        ctx = None
        for h, hm in enumerate(head_masks):              # p_h@(v*hm) == (p_h@v)*hm
            blk = c[h * nq:(h + 1) * nq, :] * hm
            ctx = blk if ctx is None else ctx + blk
        return ctx

    # ---------------- fused encoder+decoder embedding ----------------
    ids = ids_ref[...]                                   # (nt, 2) int32
    misc = vslab_ref[V_MISC_OFF:V_MISC_OFF + 8, :]       # (8, 128) fp32
    tok_oh = (ids[:, 0:1] ==
              jax.lax.broadcasted_iota(jnp.int32, (nt, VOCAB), 1)).astype(jnp.float32)
    tok = jnp.dot(tok_oh, vslab_ref[V_TOK_OFF:V_TOK_OFF + VOCAB, :H],
                  preferred_element_type=jnp.float32)
    pos_oh = (ids[:, 1:2] ==
              jax.lax.broadcasted_iota(jnp.int32, (nt, MAX_POS), 1)).astype(jnp.float32)
    pos = jnp.dot(pos_oh, vslab_ref[V_POS_OFF:V_POS_OFF + MAX_POS, :H],
                  preferred_element_type=jnp.float32)
    emb = layer_norm(tok + pos, misc[0:1, :H], misc[1:2, :H])
    x = emb[:ne]                                          # encoder stream
    y = emb[ne:]                                          # decoder stream

    bias_all = bias_ref[...]                              # (3, Qmax, Kmax)
    bias_enc = bias_all[0, :ne, :ne]
    bias_self = bias_all[1, :nd, :nd]
    bias_cross = bias_all[2, :nd, :ne]

    # ---------------- encoder ----------------
    for l in range(NUM_ENC_LAYERS):
        ev = vslab_ref[V_ENC_OFF + 8 * l:V_ENC_OFF + 8 * l + 8, :]
        qkv = dot_bf(x, Wv(f"e{l}_wqkv")) + ev[0:1, :3 * H]
        ctx = attend(qkv[:, :H], qkv[:, H:2 * H], qkv[:, 2 * H:], bias_enc)
        attn = dot_bf(ctx, Wv(f"e{l}_wo")) + ev[1:2, :H]
        x = layer_norm(x + attn, ev[2:3, :H], ev[3:4, :H])

        h1 = jnp.maximum(dot_bf(x, Wv(f"e{l}_w1")) + ev[4:5, :F], 0.0)
        ffn = dot_bf(h1, Wv(f"e{l}_w2")) + ev[5:6, :H]
        x = layer_norm(x + ffn, ev[6:7, :H], ev[7:8, :H])

    # Hoisted cross-attention K/V: enc_state is loop-invariant across decoder layers.
    kvd = 2 * H * NUM_DEC_LAYERS
    kv_all = dot_bf(x, Wv("wkvc")) + misc[3:4, :kvd]      # (ne, 128) lane-dense

    # ---------------- decoder ----------------
    for l in range(NUM_DEC_LAYERS):
        dv = vslab_ref[V_DEC_OFF + 16 * l:V_DEC_OFF + 16 * l + 16, :]
        # self-attention
        qkv = dot_bf(y, Wv(f"d{l}_wqkv")) + dv[0:1, :3 * H]
        ctx = attend(qkv[:, :H], qkv[:, H:2 * H], qkv[:, 2 * H:], bias_self)
        attn = dot_bf(ctx, Wv(f"d{l}_wos")) + dv[1:2, :H]
        y = layer_norm(y + attn, dv[2:3, :H], dv[3:4, :H])

        # encoder-decoder cross-attention (K/V precomputed above)
        qc = dot_bf(y, Wv(f"d{l}_wqc")) + dv[4:5, :H]
        kv = kv_all[:, l * 2 * H:(l + 1) * 2 * H]
        ctx = attend(qc, kv[:, :H], kv[:, H:], bias_cross)
        attn = dot_bf(ctx, Wv(f"d{l}_woc")) + dv[5:6, :H]
        y = layer_norm(y + attn, dv[6:7, :H], dv[7:8, :H])

        # feed-forward
        h1 = jnp.maximum(dot_bf(y, Wv(f"d{l}_w1")) + dv[8:9, :F], 0.0)
        ffn = dot_bf(h1, Wv(f"d{l}_w2")) + dv[9:10, :H]
        y = layer_norm(y + ffn, dv[10:11, :H], dv[11:12, :H])

    if return_logits:
        out = dot_bf(y, Wv("lm_w")) + misc[2:3, :]        # (nd, 128), lane-dense
    else:
        out = jnp.concatenate([y, jnp.zeros((nd, LANE - H), jnp.float32)], axis=-1)
    out_ref[...] = out


# ----------------------------- wrapper ----------------------------------------
def _block_diag_bias(mask):
    """{0,1} mask (B,1,Sq,Sk) -> additive bias (B*Sq, B*Sk): 0 where attention is
    allowed within the same batch element, -1e9 otherwise (incl. cross-batch)."""
    B, _, Sq, Sk = mask.shape
    m = mask[:, 0].astype(jnp.float32)                    # (B, Sq, Sk)
    eye = jnp.eye(B, dtype=jnp.float32)                   # (B, B)
    allowed = m[:, :, None, :] * eye[:, None, :, None]    # (B, Sq, B, Sk)
    return (allowed.reshape(B * Sq, B * Sk) - 1.0) * (-NEG_INF)


@functools.partial(jax.jit, static_argnames=("return_logits",))
def full_transformer_forward(
    wslab,
    vslab,
    input_ids_encoder,
    input_ids_decoder,
    attention_mask_encoder,
    attention_mask_decoder_self,
    attention_mask_decoder_enc_dec,
    return_logits=True,
):
    # NOTE: the DecoderBlock branch where hidden_states_encoder / cross-mask are None
    # (cross-attention skipped) is not exercised by FullTransformer.forward and is not
    # implemented here; real masks are always supplied.
    B, S_ENC = input_ids_encoder.shape
    _, S_DEC = input_ids_decoder.shape
    ne, nd = B * S_ENC, B * S_DEC

    # One int32 operand: (token id, position) for encoder rows then decoder rows.
    enc_ids = input_ids_encoder.reshape(ne).astype(jnp.int32)
    dec_ids = input_ids_decoder.reshape(nd).astype(jnp.int32)
    pos_enc = jnp.tile(jnp.arange(S_ENC, dtype=jnp.int32), B)
    pos_dec = jnp.tile(jnp.arange(S_DEC, dtype=jnp.int32), B)
    ids = jnp.stack([jnp.concatenate([enc_ids, dec_ids]),
                     jnp.concatenate([pos_enc, pos_dec])], axis=1)      # (ne+nd, 2)

    # One fp32 operand with all three additive attention biases.
    bias_enc = _block_diag_bias(attention_mask_encoder)                 # (ne, ne)
    bias_self = _block_diag_bias(attention_mask_decoder_self)           # (nd, nd)
    bias_cross = _block_diag_bias(attention_mask_decoder_enc_dec)       # (nd, ne)
    qmax, kmax = max(ne, nd), max(ne, nd)

    def _pad(bm):
        return jnp.pad(bm, ((0, qmax - bm.shape[0]), (0, kmax - bm.shape[1])))

    bias = jnp.stack([_pad(bias_enc), _pad(bias_self), _pad(bias_cross)])

    kernel = functools.partial(_fused_transformer_kernel, ne=ne, nd=nd,
                               return_logits=return_logits)
    out = pl.pallas_call(
        kernel,
        out_shape=jax.ShapeDtypeStruct((nd, LANE), jnp.float32),
        compiler_params=pltpu.CompilerParams(vmem_limit_bytes=4 * 1024 * 1024),
    )(ids, bias, wslab, vslab)

    out_dim = VOCAB if return_logits else HIDDEN
    return out[:, :out_dim].reshape(B, S_DEC, out_dim)


# ----------------------------- parameter packing -----------------------------
def pack_params(params):
    """Pack the per-module parameter dict into the two VMEM slabs (done once).

    Also folds 1/sqrt(head_dim) into the Q projection weights/biases, concatenates
    cross-attn K/V weights across decoder layers, and zero-pads the lm head to
    128 lanes so the kernel's output store is lane-dense."""
    H, F = HIDDEN, FFN_DIM
    scale = 1.0 / math.sqrt(HEAD_DIM)
    E, D = params["enc"], params["dec"]

    wslab = jnp.zeros((W_ROWS, LANE), jnp.float32)

    def putw(slab, name, arr):
        off, rows, cols = W_LAYOUT[name]
        return slab.at[off:off + rows, :cols].set(arr.astype(jnp.float32))

    for l in range(NUM_ENC_LAYERS):
        wqkv = E["wqkv"][l].at[:, :H].multiply(scale)
        wslab = putw(wslab, f"e{l}_wqkv", wqkv)
        wslab = putw(wslab, f"e{l}_wo", E["wo"][l])
        wslab = putw(wslab, f"e{l}_w1", E["w1"][l])
        wslab = putw(wslab, f"e{l}_w2", E["w2"][l])
    for l in range(NUM_DEC_LAYERS):
        wqkv = D["wqkv"][l].at[:, :H].multiply(scale)
        wslab = putw(wslab, f"d{l}_wqkv", wqkv)
        wslab = putw(wslab, f"d{l}_wos", D["wo_s"][l])
        wslab = putw(wslab, f"d{l}_wqc", D["wq_c"][l] * scale)
        wslab = putw(wslab, f"d{l}_woc", D["wo_c"][l])
        wslab = putw(wslab, f"d{l}_w1", D["w1"][l])
        wslab = putw(wslab, f"d{l}_w2", D["w2"][l])
    wkvc = jnp.concatenate([D["wkv_c"][l] for l in range(NUM_DEC_LAYERS)], axis=1)
    wslab = putw(wslab, "wkvc", wkvc)
    wslab = putw(wslab, "lm_w",
                 jnp.pad(params["lm"]["w"], ((0, 0), (0, LANE - VOCAB))))
    wslab = wslab.astype(jnp.bfloat16)

    vslab = jnp.zeros((V_ROWS, LANE), jnp.float32)

    def putv(slab, row, vec):
        v = jnp.reshape(vec, (-1,)).astype(jnp.float32)
        return slab.at[row, :v.shape[0]].set(v)

    vslab = vslab.at[V_TOK_OFF:V_TOK_OFF + VOCAB, :H].set(params["emb"]["tok"])
    vslab = vslab.at[V_POS_OFF:V_POS_OFF + MAX_POS, :H].set(params["emb"]["pos"])
    vslab = putv(vslab, V_MISC_OFF + 0, params["emb"]["g"])
    vslab = putv(vslab, V_MISC_OFF + 1, params["emb"]["b"])
    vslab = putv(vslab, V_MISC_OFF + 2, params["lm"]["b"])
    bkvc = jnp.concatenate([D["bkv_c"][l].reshape(-1) for l in range(NUM_DEC_LAYERS)])
    vslab = putv(vslab, V_MISC_OFF + 3, bkvc)

    for l in range(NUM_ENC_LAYERS):
        base = V_ENC_OFF + 8 * l
        bqkv = E["bqkv"][l].at[:, :H].multiply(scale)
        vecs = [bqkv, E["bo"][l], E["ln1_g"][l], E["ln1_b"][l],
                E["b1"][l], E["b2"][l], E["ln2_g"][l], E["ln2_b"][l]]
        for i, vec in enumerate(vecs):
            vslab = putv(vslab, base + i, vec)
    for l in range(NUM_DEC_LAYERS):
        base = V_DEC_OFF + 16 * l
        bqkv = D["bqkv"][l].at[:, :H].multiply(scale)
        vecs = [bqkv, D["bo_s"][l], D["ln1_g"][l], D["ln1_b"][l],
                D["bq_c"][l] * scale, D["bo_c"][l], D["ln2_g"][l], D["ln2_b"][l],
                D["b1"][l], D["b2"][l], D["ln3_g"][l], D["ln3_b"][l]]
        for i, vec in enumerate(vecs):
            vslab = putv(vslab, base + i, vec)
    return wslab, vslab


# ----------------------------- parameter init --------------------------------
def init_params(key):
    H, F, V = HIDDEN, FFN_DIM, VOCAB
    Le, Ld = NUM_ENC_LAYERS, NUM_DEC_LAYERS
    keys = jax.random.split(key, 16)

    def nrm(k, shape):
        return jax.random.normal(k, shape, jnp.float32) * 0.02

    emb = dict(
        tok=nrm(keys[0], (V, H)),
        pos=nrm(keys[1], (MAX_POS, H)),
        g=jnp.ones((1, H), jnp.float32),
        b=jnp.zeros((1, H), jnp.float32),
    )
    enc = dict(
        wqkv=nrm(keys[2], (Le, H, 3 * H)), bqkv=jnp.zeros((Le, 1, 3 * H), jnp.float32),
        wo=nrm(keys[3], (Le, H, H)),       bo=jnp.zeros((Le, 1, H), jnp.float32),
        ln1_g=jnp.ones((Le, 1, H), jnp.float32), ln1_b=jnp.zeros((Le, 1, H), jnp.float32),
        w1=nrm(keys[4], (Le, H, F)),       b1=jnp.zeros((Le, 1, F), jnp.float32),
        w2=nrm(keys[5], (Le, F, H)),       b2=jnp.zeros((Le, 1, H), jnp.float32),
        ln2_g=jnp.ones((Le, 1, H), jnp.float32), ln2_b=jnp.zeros((Le, 1, H), jnp.float32),
    )
    dec = dict(
        wqkv=nrm(keys[6], (Ld, H, 3 * H)), bqkv=jnp.zeros((Ld, 1, 3 * H), jnp.float32),
        wo_s=nrm(keys[7], (Ld, H, H)),     bo_s=jnp.zeros((Ld, 1, H), jnp.float32),
        ln1_g=jnp.ones((Ld, 1, H), jnp.float32), ln1_b=jnp.zeros((Ld, 1, H), jnp.float32),
        wq_c=nrm(keys[8], (Ld, H, H)),     bq_c=jnp.zeros((Ld, 1, H), jnp.float32),
        wkv_c=nrm(keys[9], (Ld, H, 2 * H)), bkv_c=jnp.zeros((Ld, 1, 2 * H), jnp.float32),
        wo_c=nrm(keys[10], (Ld, H, H)),    bo_c=jnp.zeros((Ld, 1, H), jnp.float32),
        ln2_g=jnp.ones((Ld, 1, H), jnp.float32), ln2_b=jnp.zeros((Ld, 1, H), jnp.float32),
        w1=nrm(keys[11], (Ld, H, F)),      b1=jnp.zeros((Ld, 1, F), jnp.float32),
        w2=nrm(keys[12], (Ld, F, H)),      b2=jnp.zeros((Ld, 1, H), jnp.float32),
        ln3_g=jnp.ones((Ld, 1, H), jnp.float32), ln3_b=jnp.zeros((Ld, 1, H), jnp.float32),
    )
    lm = dict(w=nrm(keys[13], (H, V)), b=jnp.zeros((1, V), jnp.float32))
    return dict(emb=emb, enc=enc, dec=dec, lm=lm)


# ----------------------------- main -------------------------------------------
if __name__ == "__main__":
    B, S_ENC, S_DEC = 2, 8, 8
    root = jax.random.PRNGKey(0)
    k_params, k_enc_ids, k_dec_ids = jax.random.split(root, 3)

    params = init_params(k_params)
    wslab, vslab = pack_params(params)   # one-time packing (outside the hot path)

    input_ids_encoder = jax.random.randint(k_enc_ids, (B, S_ENC), 0, VOCAB, jnp.int32)
    input_ids_decoder = jax.random.randint(k_dec_ids, (B, S_DEC), 0, VOCAB, jnp.int32)

    # {0,1} masks: encoder with per-batch padding, decoder-self causal, enc-dec padding.
    enc_lengths = jnp.array([S_ENC, S_ENC - 2], jnp.int32)
    key_valid = (jnp.arange(S_ENC)[None, :] < enc_lengths[:, None]).astype(jnp.float32)
    attention_mask_encoder = jnp.broadcast_to(
        key_valid[:, None, None, :], (B, 1, S_ENC, S_ENC)).astype(jnp.float32)
    causal = jnp.tril(jnp.ones((S_DEC, S_DEC), jnp.float32))
    attention_mask_decoder_self = jnp.broadcast_to(
        causal[None, None, :, :], (B, 1, S_DEC, S_DEC)).astype(jnp.float32)
    attention_mask_decoder_enc_dec = jnp.broadcast_to(
        key_valid[:, None, None, :], (B, 1, S_DEC, S_ENC)).astype(jnp.float32)

    logits = full_transformer_forward(
        wslab,
        vslab,
        input_ids_encoder,
        input_ids_decoder,
        attention_mask_encoder,
        attention_mask_decoder_self,
        attention_mask_decoder_enc_dec,
    )
    logits = jax.block_until_ready(logits)
    assert logits.shape == (B, S_DEC, VOCAB)
    assert bool(jnp.all(jnp.isfinite(logits)))
    print("KERNEL_OK")
</pallas_src>

<mosaic_0001>
module attributes {stable_mosaic.version = 11 : i64} {
  func.func @_fused_transformer_kernel(%arg0: memref<32x2xi32, #tpu.memory_space<vmem>>, %arg1: memref<3x16x16xf32, #tpu.memory_space<vmem>>, %arg2: memref<832x128xbf16, #tpu.memory_space<vmem>>, %arg3: memref<136x128xf32, #tpu.memory_space<vmem>>, %arg4: memref<16x128xf32, #tpu.memory_space<vmem>>) attributes {dimension_semantics = [], scalar_prefetch = 0 : i64, scratch_operands = 0 : i64, tpu.core_type = #tpu.core_type<tc>} {
    %0 = tpu.iota {dimensions = array<i32: 1>} : vector<1x32xi32>
    %c0_i32 = arith.constant 0 : i32
    %1 = vector.broadcast %c0_i32 : i32 to vector<1x32xi32>
    %2 = arith.cmpi sge, %0, %1 : vector<1x32xi32>
    %c8_i32 = arith.constant 8 : i32
    %3 = vector.broadcast %c8_i32 : i32 to vector<1x32xi32>
    %4 = arith.cmpi slt, %0, %3 : vector<1x32xi32>
    %5 = arith.andi %2, %4 : vector<1x32xi1>
    %6 = arith.extui %5 : vector<1x32xi1> to vector<1x32xi32>
    %7 = arith.sitofp %6 : vector<1x32xi32> to vector<1x32xf32>
    %c8_i32_0 = arith.constant 8 : i32
    %8 = vector.broadcast %c8_i32_0 : i32 to vector<1x32xi32>
    %9 = arith.cmpi sge, %0, %8 : vector<1x32xi32>
    %c16_i32 = arith.constant 16 : i32
    %10 = vector.broadcast %c16_i32 : i32 to vector<1x32xi32>
    %11 = arith.cmpi slt, %0, %10 : vector<1x32xi32>
    %12 = arith.andi %9, %11 : vector<1x32xi1>
    %13 = arith.extui %12 : vector<1x32xi1> to vector<1x32xi32>
    %14 = arith.sitofp %13 : vector<1x32xi32> to vector<1x32xf32>
    %c16_i32_1 = arith.constant 16 : i32
    %15 = vector.broadcast %c16_i32_1 : i32 to vector<1x32xi32>
    %16 = arith.cmpi sge, %0, %15 : vector<1x32xi32>
    %c24_i32 = arith.constant 24 : i32
    %17 = vector.broadcast %c24_i32 : i32 to vector<1x32xi32>
    %18 = arith.cmpi slt, %0, %17 : vector<1x32xi32>
    %19 = arith.andi %16, %18 : vector<1x32xi1>
    %20 = arith.extui %19 : vector<1x32xi1> to vector<1x32xi32>
    %21 = arith.sitofp %20 : vector<1x32xi32> to vector<1x32xf32>
    %c24_i32_2 = arith.constant 24 : i32
    %22 = vector.broadcast %c24_i32_2 : i32 to vector<1x32xi32>
    %23 = arith.cmpi sge, %0, %22 : vector<1x32xi32>
    %c32_i32 = arith.constant 32 : i32
    %24 = vector.broadcast %c32_i32 : i32 to vector<1x32xi32>
    %25 = arith.cmpi slt, %0, %24 : vector<1x32xi32>
    %26 = arith.andi %23, %25 : vector<1x32xi1>
    %27 = arith.extui %26 : vector<1x32xi1> to vector<1x32xi32>
    %28 = arith.sitofp %27 : vector<1x32xi32> to vector<1x32xf32>
    %c0 = arith.constant 0 : index
    %c0_3 = arith.constant 0 : index
    %29 = vector.load %arg0[%c0, %c0_3] : memref<32x2xi32, #tpu.memory_space<vmem>>, vector<32x2xi32>
    %c80 = arith.constant 80 : index
    %c0_4 = arith.constant 0 : index
    %30 = vector.load %arg3[%c80, %c0_4] : memref<136x128xf32, #tpu.memory_space<vmem>>, vector<8x128xf32>
    %31 = vector.extract_strided_slice %29 {offsets = [0, 0], sizes = [32, 1], strides = [1, 1]} : vector<32x2xi32> to vector<32x1xi32>
    %32 = tpu.iota {dimensions = array<i32: 1>} : vector<32x64xi32>
    %33 = vector.broadcast %31 : vector<32x1xi32> to vector<32x64xi32>
    %34 = arith.cmpi eq, %33, %32 : vector<32x64xi32>
    %35 = arith.extui %34 : vector<32x64xi1> to vector<32x64xi32>
    %36 = arith.sitofp %35 : vector<32x64xi32> to vector<32x64xf32>
    %c0_5 = arith.constant 0 : index
    %c0_6 = arith.constant 0 : index
    %37 = vector.load %arg3[%c0_5, %c0_6] : memref<136x128xf32, #tpu.memory_space<vmem>>, vector<64x32xf32>
    %cst = arith.constant dense<0.000000e+00> : vector<32x32xf32>
    %38 = tpu.matmul %36, %37, %cst {dimension_numbers = #tpu.dot_dimension_numbers<[1], [0], [0], [1], [0, 0, 1, 1], [], []>} : vector<32x64xf32>, vector<64x32xf32>, vector<32x32xf32> -> vector<32x32xf32>
    %39 = vector.extract_strided_slice %29 {offsets = [0, 1], sizes = [32, 1], strides = [1, 1]} : vector<32x2xi32> to vector<32x1xi32>
    %40 = tpu.iota {dimensions = array<i32: 1>} : vector<32x16xi32>
    %41 = vector.broadcast %39 : vector<32x1xi32> to vector<32x16xi32>
    %42 = arith.cmpi eq, %41, %40 : vector<32x16xi32>
    %43 = arith.extui %42 : vector<32x16xi1> to vector<32x16xi32>
    %44 = arith.sitofp %43 : vector<32x16xi32> to vector<32x16xf32>
    %c64 = arith.constant 64 : index
    %c0_7 = arith.constant 0 : index
    %45 = vector.load %arg3[%c64, %c0_7] : memref<136x128xf32, #tpu.memory_space<vmem>>, vector<16x32xf32>
    %cst_8 = arith.constant dense<0.000000e+00> : vector<32x32xf32>
    %46 = tpu.matmul %44, %45, %cst_8 {dimension_numbers = #tpu.dot_dimension_numbers<[1], [0], [0], [1], [0, 0, 1, 1], [], []>} : vector<32x16xf32>, vector<16x32xf32>, vector<32x32xf32> -> vector<32x32xf32>
    %47 = arith.addf %38, %46 : vector<32x32xf32>
    %48 = vector.extract_strided_slice %30 {offsets = [0, 0], sizes = [1, 32], strides = [1, 1]} : vector<8x128xf32> to vector<1x32xf32>
    %49 = vector.extract_strided_slice %30 {offsets = [1, 0], sizes = [1, 32], strides = [1, 1]} : vector<8x128xf32> to vector<1x32xf32>
    %cst_9 = arith.constant dense<0.000000e+00> : vector<32xf32>
    %50 = vector.multi_reduction <add>, %47, %cst_9 [1] : vector<32x32xf32> to vector<32xf32>
    %51 = vector.shape_cast %50 : vector<32xf32> to vector<32x1xf32>
    %cst_10 = arith.constant 3.200000e+01 : f32
    %52 = vector.broadcast %cst_10 : f32 to vector<32x1xf32>
    %53 = arith.divf %51, %52 : vector<32x1xf32>
    %54 = vector.broadcast %53 : vector<32x1xf32> to vector<32x32xf32>
    %55 = arith.subf %47, %54 : vector<32x32xf32>
    %56 = arith.mulf %55, %55 : vector<32x32xf32>
    %cst_11 = arith.constant dense<0.000000e+00> : vector<32xf32>
    %57 = vector.multi_reduction <add>, %56, %cst_11 [1] : vector<32x32xf32> to vector<32xf32>
    %58 = vector.shape_cast %57 : vector<32xf32> to vector<32x1xf32>
    %cst_12 = arith.constant 3.200000e+01 : f32
    %59 = vector.broadcast %cst_12 : f32 to vector<32x1xf32>
    %60 = arith.divf %58, %59 : vector<32x1xf32>
    %61 = vector.broadcast %53 : vector<32x1xf32> to vector<32x32xf32>
    %62 = arith.subf %47, %61 : vector<32x32xf32>
    %cst_13 = arith.constant 9.99999974E-6 : f32
    %63 = vector.broadcast %cst_13 : f32 to vector<32x1xf32>
    %64 = arith.addf %60, %63 : vector<32x1xf32>
    %65 = math.rsqrt %64 : vector<32x1xf32>
    %66 = vector.broadcast %65 : vector<32x1xf32> to vector<32x32xf32>
    %67 = arith.mulf %62, %66 : vector<32x32xf32>
    %68 = vector.broadcast %48 : vector<1x32xf32> to vector<32x32xf32>
    %69 = arith.mulf %67, %68 : vector<32x32xf32>
    %70 = vector.broadcast %49 : vector<1x32xf32> to vector<32x32xf32>
    %71 = arith.addf %69, %70 : vector<32x32xf32>
    %72 = vector.extract_strided_slice %71 {offsets = [0, 0], sizes = [16, 32], strides = [1, 1]} : vector<32x32xf32> to vector<16x32xf32>
    %73 = vector.extract_strided_slice %71 {offsets = [16, 0], sizes = [16, 32], strides = [1, 1]} : vector<32x32xf32> to vector<16x32xf32>
    %c0_14 = arith.constant 0 : index
    %c0_15 = arith.constant 0 : index
    %c0_16 = arith.constant 0 : index
    %74 = vector.load %arg1[%c0_14, %c0_15, %c0_16] : memref<3x16x16xf32, #tpu.memory_space<vmem>>, vector<3x16x16xf32>
    %75 = vector.extract_strided_slice %74 {offsets = [0, 0, 0], sizes = [1, 16, 16], strides = [1, 1, 1]} : vector<3x16x16xf32> to vector<1x16x16xf32>
    %76 = vector.shape_cast %75 : vector<1x16x16xf32> to vector<16x16xf32>
    %77 = vector.extract_strided_slice %74 {offsets = [1, 0, 0], sizes = [1, 16, 16], strides = [1, 1, 1]} : vector<3x16x16xf32> to vector<1x16x16xf32>
    %78 = vector.shape_cast %77 : vector<1x16x16xf32> to vector<16x16xf32>
    %79 = vector.extract_strided_slice %74 {offsets = [2, 0, 0], sizes = [1, 16, 16], strides = [1, 1, 1]} : vector<3x16x16xf32> to vector<1x16x16xf32>
    %80 = vector.shape_cast %79 : vector<1x16x16xf32> to vector<16x16xf32>
    %c88 = arith.constant 88 : index
    %c0_17 = arith.constant 0 : index
    %81 = vector.load %arg3[%c88, %c0_17] : memref<136x128xf32, #tpu.memory_space<vmem>>, vector<8x128xf32>
    %c0_18 = arith.constant 0 : index
    %c0_19 = arith.constant 0 : index
    %82 = vector.load %arg2[%c0_18, %c0_19] : memref<832x128xbf16, #tpu.memory_space<vmem>>, vector<32x96xbf16>
    %83 = arith.truncf %72 : vector<16x32xf32> to vector<16x32xbf16>
    %cst_20 = arith.constant dense<0.000000e+00> : vector<16x96xf32>
    %84 = tpu.matmul %83, %82, %cst_20 {dimension_numbers = #tpu.dot_dimension_numbers<[1], [0], [0], [1], [0, 0, 1, 1], [], []>} : vector<16x32xbf16>, vector<32x96xbf16>, vector<16x96xf32> -> vector<16x96xf32>
    %85 = vector.extract_strided_slice %81 {offsets = [0, 0], sizes = [1, 96], strides = [1, 1]} : vector<8x128xf32> to vector<1x96xf32>
    %86 = vector.broadcast %85 : vector<1x96xf32> to vector<16x96xf32>
    %87 = arith.addf %84, %86 : vector<16x96xf32>
    %88 = vector.extract_strided_slice %87 {offsets = [0, 0], sizes = [16, 32], strides = [1, 1]} : vector<16x96xf32> to vector<16x32xf32>
    %89 = vector.extract_strided_slice %87 {offsets = [0, 32], sizes = [16, 32], strides = [1, 1]} : vector<16x96xf32> to vector<16x32xf32>
    %90 = vector.extract_strided_slice %87 {offsets = [0, 64], sizes = [16, 32], strides = [1, 1]} : vector<16x96xf32> to vector<16x32xf32>
    %91 = arith.truncf %89 : vector<16x32xf32> to vector<16x32xbf16>
    %92 = vector.broadcast %7 : vector<1x32xf32> to vector<16x32xf32>
    %93 = arith.mulf %88, %92 : vector<16x32xf32>
    %94 = arith.truncf %93 : vector<16x32xf32> to vector<16x32xbf16>
    %cst_21 = arith.constant dense<0.000000e+00> : vector<16x16xf32>
    %95 = tpu.matmul %94, %91, %cst_21 {dimension_numbers = #tpu.dot_dimension_numbers<[1], [1], [0], [0], [0, 0, 1, 0], [], []>} : vector<16x32xbf16>, vector<16x32xbf16>, vector<16x16xf32> -> vector<16x16xf32>
    %96 = arith.addf %95, %76 : vector<16x16xf32>
    %97 = vector.broadcast %14 : vector<1x32xf32> to vector<16x32xf32>
    %98 = arith.mulf %88, %97 : vector<16x32xf32>
    %99 = arith.truncf %98 : vector<16x32xf32> to vector<16x32xbf16>
    %cst_22 = arith.constant dense<0.000000e+00> : vector<16x16xf32>
    %100 = tpu.matmul %99, %91, %cst_22 {dimension_numbers = #tpu.dot_dimension_numbers<[1], [1], [0], [0], [0, 0, 1, 0], [], []>} : vector<16x32xbf16>, vector<16x32xbf16>, vector<16x16xf32> -> vector<16x16xf32>
    %101 = arith.addf %100, %76 : vector<16x16xf32>
    %102 = vector.broadcast %21 : vector<1x32xf32> to vector<16x32xf32>
    %103 = arith.mulf %88, %102 : vector<16x32xf32>
    %104 = arith.truncf %103 : vector<16x32xf32> to vector<16x32xbf16>
    %cst_23 = arith.constant dense<0.000000e+00> : vector<16x16xf32>
    %105 = tpu.matmul %104, %91, %cst_23 {dimension_numbers = #tpu.dot_dimension_numbers<[1], [1], [0], [0], [0, 0, 1, 0], [], []>} : vector<16x32xbf16>, vector<16x32xbf16>, vector<16x16xf32> -> vector<16x16xf32>
    %106 = arith.addf %105, %76 : vector<16x16xf32>
    %107 = vector.broadcast %28 : vector<1x32xf32> to vector<16x32xf32>
    %108 = arith.mulf %88, %107 : vector<16x32xf32>
    %109 = arith.truncf %108 : vector<16x32xf32> to vector<16x32xbf16>
    %cst_24 = arith.constant dense<0.000000e+00> : vector<16x16xf32>
    %110 = tpu.matmul %109, %91, %cst_24 {dimension_numbers = #tpu.dot_dimension_numbers<[1], [1], [0], [0], [0, 0, 1, 0], [], []>} : vector<16x32xbf16>, vector<16x32xbf16>, vector<16x16xf32> -> vector<16x16xf32>
    %111 = arith.addf %110, %76 : vector<16x16xf32>
    %112 = tpu.concatenate %96, %101, %106, %111 in 0 : vector<16x16xf32>, vector<16x16xf32>, vector<16x16xf32>, vector<16x16xf32> -> vector<64x16xf32>
    %cst_25 = arith.constant dense<0xFF800000> : vector<64xf32>
    %113 = vector.multi_reduction <maximumf>, %112, %cst_25 [1] : vector<64x16xf32> to vector<64xf32>
    %114 = vector.shape_cast %113 : vector<64xf32> to vector<64x1xf32>
    %115 = vector.broadcast %114 : vector<64x1xf32> to vector<64x16xf32>
    %116 = arith.subf %112, %115 : vector<64x16xf32>
    %117 = math.exp %116 : vector<64x16xf32>
    %cst_26 = arith.constant dense<0.000000e+00> : vector<64xf32>
    %118 = vector.multi_reduction <add>, %117, %cst_26 [1] : vector<64x16xf32> to vector<64xf32>
    %119 = vector.shape_cast %118 : vector<64xf32> to vector<64x1xf32>
    %120 = tpu.reciprocal %119 {approx = true} : vector<64x1xf32> -> vector<64x1xf32>
    %121 = vector.broadcast %120 : vector<64x1xf32> to vector<64x16xf32>
    %122 = arith.mulf %117, %121 : vector<64x16xf32>
    %123 = arith.truncf %122 : vector<64x16xf32> to vector<64x16xbf16>
    %124 = arith.truncf %90 : vector<16x32xf32> to vector<16x32xbf16>
    %cst_27 = arith.constant dense<0.000000e+00> : vector<64x32xf32>
    %125 = tpu.matmul %123, %124, %cst_27 {dimension_numbers = #tpu.dot_dimension_numbers<[1], [0], [0], [1], [0, 0, 1, 1], [], []>} : vector<64x16xbf16>, vector<16x32xbf16>, vector<64x32xf32> -> vector<64x32xf32>
    %126 = vector.extract_strided_slice %125 {offsets = [0, 0], sizes = [16, 32], strides = [1, 1]} : vector<64x32xf32> to vector<16x32xf32>
    %127 = vector.broadcast %7 : vector<1x32xf32> to vector<16x32xf32>
    %128 = arith.mulf %126, %127 : vector<16x32xf32>
    %129 = vector.extract_strided_slice %125 {offsets = [16, 0], sizes = [16, 32], strides = [1, 1]} : vector<64x32xf32> to vector<16x32xf32>
    %130 = vector.broadcast %14 : vector<1x32xf32> to vector<16x32xf32>
    %131 = arith.mulf %129, %130 : vector<16x32xf32>
    %132 = arith.addf %128, %131 : vector<16x32xf32>
    %133 = vector.extract_strided_slice %125 {offsets = [32, 0], sizes = [16, 32], strides = [1, 1]} : vector<64x32xf32> to vector<16x32xf32>
    %134 = vector.broadcast %21 : vector<1x32xf32> to vector<16x32xf32>
    %135 = arith.mulf %133, %134 : vector<16x32xf32>
    %136 = arith.addf %132, %135 : vector<16x32xf32>
    %137 = vector.extract_strided_slice %125 {offsets = [48, 0], sizes = [16, 32], strides = [1, 1]} : vector<64x32xf32> to vector<16x32xf32>
    %138 = vector.broadcast %28 : vector<1x32xf32> to vector<16x32xf32>
    %139 = arith.mulf %137, %138 : vector<16x32xf32>
    %140 = arith.addf %136, %139 : vector<16x32xf32>
    %c32 = arith.constant 32 : index
    %c0_28 = arith.constant 0 : index
    %141 = vector.load %arg2[%c32, %c0_28] : memref<832x128xbf16, #tpu.memory_space<vmem>>, vector<32x32xbf16>
    %142 = arith.truncf %140 : vector<16x32xf32> to vector<16x32xbf16>
    %cst_29 = arith.constant dense<0.000000e+00> : vector<16x32xf32>
    %143 = tpu.matmul %142, %141, %cst_29 {dimension_numbers = #tpu.dot_dimension_numbers<[1], [0], [0], [1], [0, 0, 1, 1], [], []>} : vector<16x32xbf16>, vector<32x32xbf16>, vector<16x32xf32> -> vector<16x32xf32>
    %144 = vector.extract_strided_slice %81 {offsets = [1, 0], sizes = [1, 32], strides = [1, 1]} : vector<8x128xf32> to vector<1x32xf32>
    %145 = vector.broadcast %144 : vector<1x32xf32> to vector<16x32xf32>
    %146 = arith.addf %143, %145 : vector<16x32xf32>
    %147 = arith.addf %72, %146 : vector<16x32xf32>
    %148 = vector.extract_strided_slice %81 {offsets = [2, 0], sizes = [1, 32], strides = [1, 1]} : vector<8x128xf32> to vector<1x32xf32>
    %149 = vector.extract_strided_slice %81 {offsets = [3, 0], sizes = [1, 32], strides = [1, 1]} : vector<8x128xf32> to vector<1x32xf32>
    %cst_30 = arith.constant dense<0.000000e+00> : vector<16xf32>
    %150 = vector.multi_reduction <add>, %147, %cst_30 [1] : vector<16x32xf32> to vector<16xf32>
    %151 = vector.shape_cast %150 : vector<16xf32> to vector<16x1xf32>
    %cst_31 = arith.constant 3.200000e+01 : f32
    %152 = vector.broadcast %cst_31 : f32 to vector<16x1xf32>
    %153 = arith.divf %151, %152 : vector<16x1xf32>
    %154 = vector.broadcast %153 : vector<16x1xf32> to vector<16x32xf32>
    %155 = arith.subf %147, %154 : vector<16x32xf32>
    %156 = arith.mulf %155, %155 : vector<16x32xf32>
    %cst_32 = arith.constant dense<0.000000e+00> : vector<16xf32>
    %157 = vector.multi_reduction <add>, %156, %cst_32 [1] : vector<16x32xf32> to vector<16xf32>
    %158 = vector.shape_cast %157 : vector<16xf32> to vector<16x1xf32>
    %cst_33 = arith.constant 3.200000e+01 : f32
    %159 = vector.broadcast %cst_33 : f32 to vector<16x1xf32>
    %160 = arith.divf %158, %159 : vector<16x1xf32>
    %161 = vector.broadcast %153 : vector<16x1xf32> to vector<16x32xf32>
    %162 = arith.subf %147, %161 : vector<16x32xf32>
    %cst_34 = arith.constant 9.99999974E-6 : f32
    %163 = vector.broadcast %cst_34 : f32 to vector<16x1xf32>
    %164 = arith.addf %160, %163 : vector<16x1xf32>
    %165 = math.rsqrt %164 : vector<16x1xf32>
    %166 = vector.broadcast %165 : vector<16x1xf32> to vector<16x32xf32>
    %167 = arith.mulf %162, %166 : vector<16x32xf32>
    %168 = vector.broadcast %148 : vector<1x32xf32> to vector<16x32xf32>
    %169 = arith.mulf %167, %168 : vector<16x32xf32>
    %170 = vector.broadcast %149 : vector<1x32xf32> to vector<16x32xf32>
    %171 = arith.addf %169, %170 : vector<16x32xf32>
    %c64_35 = arith.constant 64 : index
    %c0_36 = arith.constant 0 : index
    %172 = vector.load %arg2[%c64_35, %c0_36] : memref<832x128xbf16, #tpu.memory_space<vmem>>, vector<32x64xbf16>
    %173 = arith.truncf %171 : vector<16x32xf32> to vector<16x32xbf16>
    %cst_37 = arith.constant dense<0.000000e+00> : vector<16x64xf32>
    %174 = tpu.matmul %173, %172, %cst_37 {dimension_numbers = #tpu.dot_dimension_numbers<[1], [0], [0], [1], [0, 0, 1, 1], [], []>} : vector<16x32xbf16>, vector<32x64xbf16>, vector<16x64xf32> -> vector<16x64xf32>
    %175 = vector.extract_strided_slice %81 {offsets = [4, 0], sizes = [1, 64], strides = [1, 1]} : vector<8x128xf32> to vector<1x64xf32>
    %176 = vector.broadcast %175 : vector<1x64xf32> to vector<16x64xf32>
    %177 = arith.addf %174, %176 : vector<16x64xf32>
    %cst_38 = arith.constant 0.000000e+00 : f32
    %178 = vector.broadcast %cst_38 : f32 to vector<16x64xf32>
    %179 = arith.maximumf %177, %178 : vector<16x64xf32>
    %c96 = arith.constant 96 : index
    %c0_39 = arith.constant 0 : index
    %180 = vector.load %arg2[%c96, %c0_39] : memref<832x128xbf16, #tpu.memory_space<vmem>>, vector<64x32xbf16>
    %181 = arith.truncf %179 : vector<16x64xf32> to vector<16x64xbf16>
    %cst_40 = arith.constant dense<0.000000e+00> : vector<16x32xf32>
    %182 = tpu.matmul %181, %180, %cst_40 {dimension_numbers = #tpu.dot_dimension_numbers<[1], [0], [0], [1], [0, 0, 1, 1], [], []>} : vector<16x64xbf16>, vector<64x32xbf16>, vector<16x32xf32> -> vector<16x32xf32>
    %183 = vector.extract_strided_slice %81 {offsets = [5, 0], sizes = [1, 32], strides = [1, 1]} : vector<8x128xf32> to vector<1x32xf32>
    %184 = vector.broadcast %183 : vector<1x32xf32> to vector<16x32xf32>
    %185 = arith.addf %182, %184 : vector<16x32xf32>
    %186 = arith.addf %171, %185 : vector<16x32xf32>
    %187 = vector.extract_strided_slice %81 {offsets = [6, 0], sizes = [1, 32], strides = [1, 1]} : vector<8x128xf32> to vector<1x32xf32>
    %188 = vector.extract_strided_slice %81 {offsets = [7, 0], sizes = [1, 32], strides = [1, 1]} : vector<8x128xf32> to vector<1x32xf32>
    %cst_41 = arith.constant dense<0.000000e+00> : vector<16xf32>
    %189 = vector.multi_reduction <add>, %186, %cst_41 [1] : vector<16x32xf32> to vector<16xf32>
    %190 = vector.shape_cast %189 : vector<16xf32> to vector<16x1xf32>
    %cst_42 = arith.constant 3.200000e+01 : f32
    %191 = vector.broadcast %cst_42 : f32 to vector<16x1xf32>
    %192 = arith.divf %190, %191 : vector<16x1xf32>
    %193 = vector.broadcast %192 : vector<16x1xf32> to vector<16x32xf32>
    %194 = arith.subf %186, %193 : vector<16x32xf32>
    %195 = arith.mulf %194, %194 : vector<16x32xf32>
    %cst_43 = arith.constant dense<0.000000e+00> : vector<16xf32>
    %196 = vector.multi_reduction <add>, %195, %cst_43 [1] : vector<16x32xf32> to vector<16xf32>
    %197 = vector.shape_cast %196 : vector<16xf32> to vector<16x1xf32>
    %cst_44 = arith.constant 3.200000e+01 : f32
    %198 = vector.broadcast %cst_44 : f32 to vector<16x1xf32>
    %199 = arith.divf %197, %198 : vector<16x1xf32>
    %200 = vector.broadcast %192 : vector<16x1xf32> to vector<16x32xf32>
    %201 = arith.subf %186, %200 : vector<16x32xf32>
    %cst_45 = arith.constant 9.99999974E-6 : f32
    %202 = vector.broadcast %cst_45 : f32 to vector<16x1xf32>
    %203 = arith.addf %199, %202 : vector<16x1xf32>
    %204 = math.rsqrt %203 : vector<16x1xf32>
    %205 = vector.broadcast %204 : vector<16x1xf32> to vector<16x32xf32>
    %206 = arith.mulf %201, %205 : vector<16x32xf32>
    %207 = vector.broadcast %187 : vector<1x32xf32> to vector<16x32xf32>
    %208 = arith.mulf %206, %207 : vector<16x32xf32>
    %209 = vector.broadcast %188 : vector<1x32xf32> to vector<16x32xf32>
    %210 = arith.addf %208, %209 : vector<16x32xf32>
    %c96_46 = arith.constant 96 : index
    %c0_47 = arith.constant 0 : index
    %211 = vector.load %arg3[%c96_46, %c0_47] : memref<136x128xf32, #tpu.memory_space<vmem>>, vector<8x128xf32>
    %c160 = arith.constant 160 : index
    %c0_48 = arith.constant 0 : index
    %212 = vector.load %arg2[%c160, %c0_48] : memref<832x128xbf16, #tpu.memory_space<vmem>>, vector<32x96xbf16>
    %213 = arith.truncf %210 : vector<16x32xf32> to vector<16x32xbf16>
    %cst_49 = arith.constant dense<0.000000e+00> : vector<16x96xf32>
    %214 = tpu.matmul %213, %212, %cst_49 {dimension_numbers = #tpu.dot_dimension_numbers<[1], [0], [0], [1], [0, 0, 1, 1], [], []>} : vector<16x32xbf16>, vector<32x96xbf16>, vector<16x96xf32> -> vector<16x96xf32>
    %215 = vector.extract_strided_slice %211 {offsets = [0, 0], sizes = [1, 96], strides = [1, 1]} : vector<8x128xf32> to vector<1x96xf32>
    %216 = vector.broadcast %215 : vector<1x96xf32> to vector<16x96xf32>
    %217 = arith.addf %214, %216 : vector<16x96xf32>
    %218 = vector.extract_strided_slice %217 {offsets = [0, 0], sizes = [16, 32], strides = [1, 1]} : vector<16x96xf32> to vector<16x32xf32>
    %219 = vector.extract_strided_slice %217 {offsets = [0, 32], sizes = [16, 32], strides = [1, 1]} : vector<16x96xf32> to vector<16x32xf32>
    %220 = vector.extract_strided_slice %217 {offsets = [0, 64], sizes = [16, 32], strides = [1, 1]} : vector<16x96xf32> to vector<16x32xf32>
    %221 = arith.truncf %219 : vector<16x32xf32> to vector<16x32xbf16>
    %222 = vector.broadcast %7 : vector<1x32xf32> to vector<16x32xf32>
    %223 = arith.mulf %218, %222 : vector<16x32xf32>
    %224 = arith.truncf %223 : vector<16x32xf32> to vector<16x32xbf16>
    %cst_50 = arith.constant dense<0.000000e+00> : vector<16x16xf32>
    %225 = tpu.matmul %224, %221, %cst_50 {dimension_numbers = #tpu.dot_dimension_numbers<[1], [1], [0], [0], [0, 0, 1, 0], [], []>} : vector<16x32xbf16>, vector<16x32xbf16>, vector<16x16xf32> -> vector<16x16xf32>
    %226 = arith.addf %225, %76 : vector<16x16xf32>
    %227 = vector.broadcast %14 : vector<1x32xf32> to vector<16x32xf32>
    %228 = arith.mulf %218, %227 : vector<16x32xf32>
    %229 = arith.truncf %228 : vector<16x32xf32> to vector<16x32xbf16>
    %cst_51 = arith.constant dense<0.000000e+00> : vector<16x16xf32>
    %230 = tpu.matmul %229, %221, %cst_51 {dimension_numbers = #tpu.dot_dimension_numbers<[1], [1], [0], [0], [0, 0, 1, 0], [], []>} : vector<16x32xbf16>, vector<16x32xbf16>, vector<16x16xf32> -> vector<16x16xf32>
    %231 = arith.addf %230, %76 : vector<16x16xf32>
    %232 = vector.broadcast %21 : vector<1x32xf32> to vector<16x32xf32>
    %233 = arith.mulf %218, %232 : vector<16x32xf32>
    %234 = arith.truncf %233 : vector<16x32xf32> to vector<16x32xbf16>
    %cst_52 = arith.constant dense<0.000000e+00> : vector<16x16xf32>
    %235 = tpu.matmul %234, %221, %cst_52 {dimension_numbers = #tpu.dot_dimension_numbers<[1], [1], [0], [0], [0, 0, 1, 0], [], []>} : vector<16x32xbf16>, vector<16x32xbf16>, vector<16x16xf32> -> vector<16x16xf32>
    %236 = arith.addf %235, %76 : vector<16x16xf32>
    %237 = vector.broadcast %28 : vector<1x32xf32> to vector<16x32xf32>
    %238 = arith.mulf %218, %237 : vector<16x32xf32>
    %239 = arith.truncf %238 : vector<16x32xf32> to vector<16x32xbf16>
    %cst_53 = arith.constant dense<0.000000e+00> : vector<16x16xf32>
    %240 = tpu.matmul %239, %221, %cst_53 {dimension_numbers = #tpu.dot_dimension_numbers<[1], [1], [0], [0], [0, 0, 1, 0], [], []>} : vector<16x32xbf16>, vector<16x32xbf16>, vector<16x16xf32> -> vector<16x16xf32>
    %241 = arith.addf %240, %76 : vector<16x16xf32>
    %242 = tpu.concatenate %226, %231, %236, %241 in 0 : vector<16x16xf32>, vector<16x16xf32>, vector<16x16xf32>, vector<16x16xf32> -> vector<64x16xf32>
    %cst_54 = arith.constant dense<0xFF800000> : vector<64xf32>
    %243 = vector.multi_reduction <maximumf>, %242, %cst_54 [1] : vector<64x16xf32> to vector<64xf32>
    %244 = vector.shape_cast %243 : vector<64xf32> to vector<64x1xf32>
    %245 = vector.broadcast %244 : vector<64x1xf32> to vector<64x16xf32>
    %246 = arith.subf %242, %245 : vector<64x16xf32>
    %247 = math.exp %246 : vector<64x16xf32>
    %cst_55 = arith.constant dense<0.000000e+00> : vector<64xf32>
    %248 = vector.multi_reduction <add>, %247, %cst_55 [1] : vector<64x16xf32> to vector<64xf32>
    %249 = vector.shape_cast %248 : vector<64xf32> to vector<64x1xf32>
    %250 = tpu.reciprocal %249 {approx = true} : vector<64x1xf32> -> vector<64x1xf32>
    %251 = vector.broadcast %250 : vector<64x1xf32> to vector<64x16xf32>
    %252 = arith.mulf %247, %251 : vector<64x16xf32>
    %253 = arith.truncf %252 : vector<64x16xf32> to vector<64x16xbf16>
    %254 = arith.truncf %220 : vector<16x32xf32> to vector<16x32xbf16>
    %cst_56 = arith.constant dense<0.000000e+00> : vector<64x32xf32>
    %255 = tpu.matmul %253, %254, %cst_56 {dimension_numbers = #tpu.dot_dimension_numbers<[1], [0], [0], [1], [0, 0, 1, 1], [], []>} : vector<64x16xbf16>, vector<16x32xbf16>, vector<64x32xf32> -> vector<64x32xf32>
    %256 = vector.extract_strided_slice %255 {offsets = [0, 0], sizes = [16, 32], strides = [1, 1]} : vector<64x32xf32> to vector<16x32xf32>
    %257 = vector.broadcast %7 : vector<1x32xf32> to vector<16x32xf32>
    %258 = arith.mulf %256, %257 : vector<16x32xf32>
    %259 = vector.extract_strided_slice %255 {offsets = [16, 0], sizes = [16, 32], strides = [1, 1]} : vector<64x32xf32> to vector<16x32xf32>
    %260 = vector.broadcast %14 : vector<1x32xf32> to vector<16x32xf32>
    %261 = arith.mulf %259, %260 : vector<16x32xf32>
    %262 = arith.addf %258, %261 : vector<16x32xf32>
    %263 = vector.extract_strided_slice %255 {offsets = [32, 0], sizes = [16, 32], strides = [1, 1]} : vector<64x32xf32> to vector<16x32xf32>
    %264 = vector.broadcast %21 : vector<1x32xf32> to vector<16x32xf32>
    %265 = arith.mulf %263, %264 : vector<16x32xf32>
    %266 = arith.addf %262, %265 : vector<16x32xf32>
    %267 = vector.extract_strided_slice %255 {offsets = [48, 0], sizes = [16, 32], strides = [1, 1]} : vector<64x32xf32> to vector<16x32xf32>
    %268 = vector.broadcast %28 : vector<1x32xf32> to vector<16x32xf32>
    %269 = arith.mulf %267, %268 : vector<16x32xf32>
    %270 = arith.addf %266, %269 : vector<16x32xf32>
    %c192 = arith.constant 192 : index
    %c0_57 = arith.constant 0 : index
    %271 = vector.load %arg2[%c192, %c0_57] : memref<832x128xbf16, #tpu.memory_space<vmem>>, vector<32x32xbf16>
    %272 = arith.truncf %270 : vector<16x32xf32> to vector<16x32xbf16>
    %cst_58 = arith.constant dense<0.000000e+00> : vector<16x32xf32>
    %273 = tpu.matmul %272, %271, %cst_58 {dimension_numbers = #tpu.dot_dimension_numbers<[1], [0], [0], [1], [0, 0, 1, 1], [], []>} : vector<16x32xbf16>, vector<32x32xbf16>, vector<16x32xf32> -> vector<16x32xf32>
    %274 = vector.extract_strided_slice %211 {offsets = [1, 0], sizes = [1, 32], strides = [1, 1]} : vector<8x128xf32> to vector<1x32xf32>
    %275 = vector.broadcast %274 : vector<1x32xf32> to vector<16x32xf32>
    %276 = arith.addf %273, %275 : vector<16x32xf32>
    %277 = arith.addf %210, %276 : vector<16x32xf32>
    %278 = vector.extract_strided_slice %211 {offsets = [2, 0], sizes = [1, 32], strides = [1, 1]} : vector<8x128xf32> to vector<1x32xf32>
    %279 = vector.extract_strided_slice %211 {offsets = [3, 0], sizes = [1, 32], strides = [1, 1]} : vector<8x128xf32> to vector<1x32xf32>
    %cst_59 = arith.constant dense<0.000000e+00> : vector<16xf32>
    %280 = vector.multi_reduction <add>, %277, %cst_59 [1] : vector<16x32xf32> to vector<16xf32>
    %281 = vector.shape_cast %280 : vector<16xf32> to vector<16x1xf32>
    %cst_60 = arith.constant 3.200000e+01 : f32
    %282 = vector.broadcast %cst_60 : f32 to vector<16x1xf32>
    %283 = arith.divf %281, %282 : vector<16x1xf32>
    %284 = vector.broadcast %283 : vector<16x1xf32> to vector<16x32xf32>
    %285 = arith.subf %277, %284 : vector<16x32xf32>
    %286 = arith.mulf %285, %285 : vector<16x32xf32>
    %cst_61 = arith.constant dense<0.000000e+00> : vector<16xf32>
    %287 = vector.multi_reduction <add>, %286, %cst_61 [1] : vector<16x32xf32> to vector<16xf32>
    %288 = vector.shape_cast %287 : vector<16xf32> to vector<16x1xf32>
    %cst_62 = arith.constant 3.200000e+01 : f32
    %289 = vector.broadcast %cst_62 : f32 to vector<16x1xf32>
    %290 = arith.divf %288, %289 : vector<16x1xf32>
    %291 = vector.broadcast %283 : vector<16x1xf32> to vector<16x32xf32>
    %292 = arith.subf %277, %291 : vector<16x32xf32>
    %cst_63 = arith.constant 9.99999974E-6 : f32
    %293 = vector.broadcast %cst_63 : f32 to vector<16x1xf32>
    %294 = arith.addf %290, %293 : vector<16x1xf32>
    %295 = math.rsqrt %294 : vector<16x1xf32>
    %296 = vector.broadcast %295 : vector<16x1xf32> to vector<16x32xf32>
    %297 = arith.mulf %292, %296 : vector<16x32xf32>
    %298 = vector.broadcast %278 : vector<1x32xf32> to vector<16x32xf32>
    %299 = arith.mulf %297, %298 : vector<16x32xf32>
    %300 = vector.broadcast %279 : vector<1x32xf32> to vector<16x32xf32>
    %301 = arith.addf %299, %300 : vector<16x32xf32>
    %c224 = arith.constant 224 : index
    %c0_64 = arith.constant 0 : index
    %302 = vector.load %arg2[%c224, %c0_64] : memref<832x128xbf16, #tpu.memory_space<vmem>>, vector<32x64xbf16>
    %303 = arith.truncf %301 : vector<16x32xf32> to vector<16x32xbf16>
    %cst_65 = arith.constant dense<0.000000e+00> : vector<16x64xf32>
    %304 = tpu.matmul %303, %302, %cst_65 {dimension_numbers = #tpu.dot_dimension_numbers<[1], [0], [0], [1], [0, 0, 1, 1], [], []>} : vector<16x32xbf16>, vector<32x64xbf16>, vector<16x64xf32> -> vector<16x64xf32>
    %305 = vector.extract_strided_slice %211 {offsets = [4, 0], sizes = [1, 64], strides = [1, 1]} : vector<8x128xf32> to vector<1x64xf32>
    %306 = vector.broadcast %305 : vector<1x64xf32> to vector<16x64xf32>
    %307 = arith.addf %304, %306 : vector<16x64xf32>
    %cst_66 = arith.constant 0.000000e+00 : f32
    %308 = vector.broadcast %cst_66 : f32 to vector<16x64xf32>
    %309 = arith.maximumf %307, %308 : vector<16x64xf32>
    %c256 = arith.constant 256 : index
    %c0_67 = arith.constant 0 : index
    %310 = vector.load %arg2[%c256, %c0_67] : memref<832x128xbf16, #tpu.memory_space<vmem>>, vector<64x32xbf16>
    %311 = arith.truncf %309 : vector<16x64xf32> to vector<16x64xbf16>
    %cst_68 = arith.constant dense<0.000000e+00> : vector<16x32xf32>
    %312 = tpu.matmul %311, %310, %cst_68 {dimension_numbers = #tpu.dot_dimension_numbers<[1], [0], [0], [1], [0, 0, 1, 1], [], []>} : vector<16x64xbf16>, vector<64x32xbf16>, vector<16x32xf32> -> vector<16x32xf32>
    %313 = vector.extract_strided_slice %211 {offsets = [5, 0], sizes = [1, 32], strides = [1, 1]} : vector<8x128xf32> to vector<1x32xf32>
    %314 = vector.broadcast %313 : vector<1x32xf32> to vector<16x32xf32>
    %315 = arith.addf %312, %314 : vector<16x32xf32>
    %316 = arith.addf %301, %315 : vector<16x32xf32>
    %317 = vector.extract_strided_slice %211 {offsets = [6, 0], sizes = [1, 32], strides = [1, 1]} : vector<8x128xf32> to vector<1x32xf32>
    %318 = vector.extract_strided_slice %211 {offsets = [7, 0], sizes = [1, 32], strides = [1, 1]} : vector<8x128xf32> to vector<1x32xf32>
    %cst_69 = arith.constant dense<0.000000e+00> : vector<16xf32>
    %319 = vector.multi_reduction <add>, %316, %cst_69 [1] : vector<16x32xf32> to vector<16xf32>
    %320 = vector.shape_cast %319 : vector<16xf32> to vector<16x1xf32>
    %cst_70 = arith.constant 3.200000e+01 : f32
    %321 = vector.broadcast %cst_70 : f32 to vector<16x1xf32>
    %322 = arith.divf %320, %321 : vector<16x1xf32>
    %323 = vector.broadcast %322 : vector<16x1xf32> to vector<16x32xf32>
    %324 = arith.subf %316, %323 : vector<16x32xf32>
    %325 = arith.mulf %324, %324 : vector<16x32xf32>
    %cst_71 = arith.constant dense<0.000000e+00> : vector<16xf32>
    %326 = vector.multi_reduction <add>, %325, %cst_71 [1] : vector<16x32xf32> to vector<16xf32>
    %327 = vector.shape_cast %326 : vector<16xf32> to vector<16x1xf32>
    %cst_72 = arith.constant 3.200000e+01 : f32
    %328 = vector.broadcast %cst_72 : f32 to vector<16x1xf32>
    %329 = arith.divf %327, %328 : vector<16x1xf32>
    %330 = vector.broadcast %322 : vector<16x1xf32> to vector<16x32xf32>
    %331 = arith.subf %316, %330 : vector<16x32xf32>
    %cst_73 = arith.constant 9.99999974E-6 : f32
    %332 = vector.broadcast %cst_73 : f32 to vector<16x1xf32>
    %333 = arith.addf %329, %332 : vector<16x1xf32>
    %334 = math.rsqrt %333 : vector<16x1xf32>
    %335 = vector.broadcast %334 : vector<16x1xf32> to vector<16x32xf32>
    %336 = arith.mulf %331, %335 : vector<16x32xf32>
    %337 = vector.broadcast %317 : vector<1x32xf32> to vector<16x32xf32>
    %338 = arith.mulf %336, %337 : vector<16x32xf32>
    %339 = vector.broadcast %318 : vector<1x32xf32> to vector<16x32xf32>
    %340 = arith.addf %338, %339 : vector<16x32xf32>
    %c768 = arith.constant 768 : index
    %c0_74 = arith.constant 0 : index
    %341 = vector.load %arg2[%c768, %c0_74] : memref<832x128xbf16, #tpu.memory_space<vmem>>, vector<32x128xbf16>
    %342 = arith.truncf %340 : vector<16x32xf32> to vector<16x32xbf16>
    %cst_75 = arith.constant dense<0.000000e+00> : vector<16x128xf32>
    %343 = tpu.matmul %342, %341, %cst_75 {dimension_numbers = #tpu.dot_dimension_numbers<[1], [0], [0], [1], [0, 0, 1, 1], [], []>} : vector<16x32xbf16>, vector<32x128xbf16>, vector<16x128xf32> -> vector<16x128xf32>
    %344 = vector.extract_strided_slice %30 {offsets = [3, 0], sizes = [1, 128], strides = [1, 1]} : vector<8x128xf32> to vector<1x128xf32>
    %345 = vector.broadcast %344 : vector<1x128xf32> to vector<16x128xf32>
    %346 = arith.addf %343, %345 : vector<16x128xf32>
    %c104 = arith.constant 104 : index
    %c0_76 = arith.constant 0 : index
    %347 = vector.load %arg3[%c104, %c0_76] : memref<136x128xf32, #tpu.memory_space<vmem>>, vector<16x128xf32>
    %c320 = arith.constant 320 : index
    %c0_77 = arith.constant 0 : index
    %348 = vector.load %arg2[%c320, %c0_77] : memref<832x128xbf16, #tpu.memory_space<vmem>>, vector<32x96xbf16>
    %349 = arith.truncf %73 : vector<16x32xf32> to vector<16x32xbf16>
    %cst_78 = arith.constant dense<0.000000e+00> : vector<16x96xf32>
    %350 = tpu.matmul %349, %348, %cst_78 {dimension_numbers = #tpu.dot_dimension_numbers<[1], [0], [0], [1], [0, 0, 1, 1], [], []>} : vector<16x32xbf16>, vector<32x96xbf16>, vector<16x96xf32> -> vector<16x96xf32>
    %351 = vector.extract_strided_slice %347 {offsets = [0, 0], sizes = [1, 96], strides = [1, 1]} : vector<16x128xf32> to vector<1x96xf32>
    %352 = vector.broadcast %351 : vector<1x96xf32> to vector<16x96xf32>
    %353 = arith.addf %350, %352 : vector<16x96xf32>
    %354 = vector.extract_strided_slice %353 {offsets = [0, 0], sizes = [16, 32], strides = [1, 1]} : vector<16x96xf32> to vector<16x32xf32>
    %355 = vector.extract_strided_slice %353 {offsets = [0, 32], sizes = [16, 32], strides = [1, 1]} : vector<16x96xf32> to vector<16x32xf32>
    %356 = vector.extract_strided_slice %353 {offsets = [0, 64], sizes = [16, 32], strides = [1, 1]} : vector<16x96xf32> to vector<16x32xf32>
    %357 = arith.truncf %355 : vector<16x32xf32> to vector<16x32xbf16>
    %358 = vector.broadcast %7 : vector<1x32xf32> to vector<16x32xf32>
    %359 = arith.mulf %354, %358 : vector<16x32xf32>
    %360 = arith.truncf %359 : vector<16x32xf32> to vector<16x32xbf16>
    %cst_79 = arith.constant dense<0.000000e+00> : vector<16x16xf32>
    %361 = tpu.matmul %360, %357, %cst_79 {dimension_numbers = #tpu.dot_dimension_numbers<[1], [1], [0], [0], [0, 0, 1, 0], [], []>} : vector<16x32xbf16>, vector<16x32xbf16>, vector<16x16xf32> -> vector<16x16xf32>
    %362 = arith.addf %361, %78 : vector<16x16xf32>
    %363 = vector.broadcast %14 : vector<1x32xf32> to vector<16x32xf32>
    %364 = arith.mulf %354, %363 : vector<16x32xf32>
    %365 = arith.truncf %364 : vector<16x32xf32> to vector<16x32xbf16>
    %cst_80 = arith.constant dense<0.000000e+00> : vector<16x16xf32>
    %366 = tpu.matmul %365, %357, %cst_80 {dimension_numbers = #tpu.dot_dimension_numbers<[1], [1], [0], [0], [0, 0, 1, 0], [], []>} : vector<16x32xbf16>, vector<16x32xbf16>, vector<16x16xf32> -> vector<16x16xf32>
    %367 = arith.addf %366, %78 : vector<16x16xf32>
    %368 = vector.broadcast %21 : vector<1x32xf32> to vector<16x32xf32>
    %369 = arith.mulf %354, %368 : vector<16x32xf32>
    %370 = arith.truncf %369 : vector<16x32xf32> to vector<16x32xbf16>
    %cst_81 = arith.constant dense<0.000000e+00> : vector<16x16xf32>
    %371 = tpu.matmul %370, %357, %cst_81 {dimension_numbers = #tpu.dot_dimension_numbers<[1], [1], [0], [0], [0, 0, 1, 0], [], []>} : vector<16x32xbf16>, vector<16x32xbf16>, vector<16x16xf32> -> vector<16x16xf32>
    %372 = arith.addf %371, %78 : vector<16x16xf32>
    %373 = vector.broadcast %28 : vector<1x32xf32> to vector<16x32xf32>
    %374 = arith.mulf %354, %373 : vector<16x32xf32>
    %375 = arith.truncf %374 : vector<16x32xf32> to vector<16x32xbf16>
    %cst_82 = arith.constant dense<0.000000e+00> : vector<16x16xf32>
    %376 = tpu.matmul %375, %357, %cst_82 {dimension_numbers = #tpu.dot_dimension_numbers<[1], [1], [0], [0], [0, 0, 1, 0], [], []>} : vector<16x32xbf16>, vector<16x32xbf16>, vector<16x16xf32> -> vector<16x16xf32>
    %377 = arith.addf %376, %78 : vector<16x16xf32>
    %378 = tpu.concatenate %362, %367, %372, %377 in 0 : vector<16x16xf32>, vector<16x16xf32>, vector<16x16xf32>, vector<16x16xf32> -> vector<64x16xf32>
    %cst_83 = arith.constant dense<0xFF800000> : vector<64xf32>
    %379 = vector.multi_reduction <maximumf>, %378, %cst_83 [1] : vector<64x16xf32> to vector<64xf32>
    %380 = vector.shape_cast %379 : vector<64xf32> to vector<64x1xf32>
    %381 = vector.broadcast %380 : vector<64x1xf32> to vector<64x16xf32>
    %382 = arith.subf %378, %381 : vector<64x16xf32>
    %383 = math.exp %382 : vector<64x16xf32>
    %cst_84 = arith.constant dense<0.000000e+00> : vector<64xf32>
    %384 = vector.multi_reduction <add>, %383, %cst_84 [1] : vector<64x16xf32> to vector<64xf32>
    %385 = vector.shape_cast %384 : vector<64xf32> to vector<64x1xf32>
    %386 = tpu.reciprocal %385 {approx = true} : vector<64x1xf32> -> vector<64x1xf32>
    %387 = vector.broadcast %386 : vector<64x1xf32> to vector<64x16xf32>
    %388 = arith.mulf %383, %387 : vector<64x16xf32>
    %389 = arith.truncf %388 : vector<64x16xf32> to vector<64x16xbf16>
    %390 = arith.truncf %356 : vector<16x32xf32> to vector<16x32xbf16>
    %cst_85 = arith.constant dense<0.000000e+00> : vector<64x32xf32>
    %391 = tpu.matmul %389, %390, %cst_85 {dimension_numbers = #tpu.dot_dimension_numbers<[1], [0], [0], [1], [0, 0, 1, 1], [], []>} : vector<64x16xbf16>, vector<16x32xbf16>, vector<64x32xf32> -> vector<64x32xf32>
    %392 = vector.extract_strided_slice %391 {offsets = [0, 0], sizes = [16, 32], strides = [1, 1]} : vector<64x32xf32> to vector<16x32xf32>
    %393 = vector.broadcast %7 : vector<1x32xf32> to vector<16x32xf32>
    %394 = arith.mulf %392, %393 : vector<16x32xf32>
    %395 = vector.extract_strided_slice %391 {offsets = [16, 0], sizes = [16, 32], strides = [1, 1]} : vector<64x32xf32> to vector<16x32xf32>
    %396 = vector.broadcast %14 : vector<1x32xf32> to vector<16x32xf32>
    %397 = arith.mulf %395, %396 : vector<16x32xf32>
    %398 = arith.addf %394, %397 : vector<16x32xf32>
    %399 = vector.extract_strided_slice %391 {offsets = [32, 0], sizes = [16, 32], strides = [1, 1]} : vector<64x32xf32> to vector<16x32xf32>
    %400 = vector.broadcast %21 : vector<1x32xf32> to vector<16x32xf32>
    %401 = arith.mulf %399, %400 : vector<16x32xf32>
    %402 = arith.addf %398, %401 : vector<16x32xf32>
    %403 = vector.extract_strided_slice %391 {offsets = [48, 0], sizes = [16, 32], strides = [1, 1]} : vector<64x32xf32> to vector<16x32xf32>
    %404 = vector.broadcast %28 : vector<1x32xf32> to vector<16x32xf32>
    %405 = arith.mulf %403, %404 : vector<16x32xf32>
    %406 = arith.addf %402, %405 : vector<16x32xf32>
    %c352 = arith.constant 352 : index
    %c0_86 = arith.constant 0 : index
    %407 = vector.load %arg2[%c352, %c0_86] : memref<832x128xbf16, #tpu.memory_space<vmem>>, vector<32x32xbf16>
    %408 = arith.truncf %406 : vector<16x32xf32> to vector<16x32xbf16>
    %cst_87 = arith.constant dense<0.000000e+00> : vector<16x32xf32>
    %409 = tpu.matmul %408, %407, %cst_87 {dimension_numbers = #tpu.dot_dimension_numbers<[1], [0], [0], [1], [0, 0, 1, 1], [], []>} : vector<16x32xbf16>, vector<32x32xbf16>, vector<16x32xf32> -> vector<16x32xf32>
    %410 = vector.extract_strided_slice %347 {offsets = [1, 0], sizes = [1, 32], strides = [1, 1]} : vector<16x128xf32> to vector<1x32xf32>
    %411 = vector.broadcast %410 : vector<1x32xf32> to vector<16x32xf32>
    %412 = arith.addf %409, %411 : vector<16x32xf32>
    %413 = arith.addf %73, %412 : vector<16x32xf32>
    %414 = vector.extract_strided_slice %347 {offsets = [2, 0], sizes = [1, 32], strides = [1, 1]} : vector<16x128xf32> to vector<1x32xf32>
    %415 = vector.extract_strided_slice %347 {offsets = [3, 0], sizes = [1, 32], strides = [1, 1]} : vector<16x128xf32> to vector<1x32xf32>
    %cst_88 = arith.constant dense<0.000000e+00> : vector<16xf32>
    %416 = vector.multi_reduction <add>, %413, %cst_88 [1] : vector<16x32xf32> to vector<16xf32>
    %417 = vector.shape_cast %416 : vector<16xf32> to vector<16x1xf32>
    %cst_89 = arith.constant 3.200000e+01 : f32
    %418 = vector.broadcast %cst_89 : f32 to vector<16x1xf32>
    %419 = arith.divf %417, %418 : vector<16x1xf32>
    %420 = vector.broadcast %419 : vector<16x1xf32> to vector<16x32xf32>
    %421 = arith.subf %413, %420 : vector<16x32xf32>
    %422 = arith.mulf %421, %421 : vector<16x32xf32>
    %cst_90 = arith.constant dense<0.000000e+00> : vector<16xf32>
    %423 = vector.multi_reduction <add>, %422, %cst_90 [1] : vector<16x32xf32> to vector<16xf32>
    %424 = vector.shape_cast %423 : vector<16xf32> to vector<16x1xf32>
    %cst_91 = arith.constant 3.200000e+01 : f32
    %425 = vector.broadcast %cst_91 : f32 to vector<16x1xf32>
    %426 = arith.divf %424, %425 : vector<16x1xf32>
    %427 = vector.broadcast %419 : vector<16x1xf32> to vector<16x32xf32>
    %428 = arith.subf %413, %427 : vector<16x32xf32>
    %cst_92 = arith.constant 9.99999974E-6 : f32
    %429 = vector.broadcast %cst_92 : f32 to vector<16x1xf32>
    %430 = arith.addf %426, %429 : vector<16x1xf32>
    %431 = math.rsqrt %430 : vector<16x1xf32>
    %432 = vector.broadcast %431 : vector<16x1xf32> to vector<16x32xf32>
    %433 = arith.mulf %428, %432 : vector<16x32xf32>
    %434 = vector.broadcast %414 : vector<1x32xf32> to vector<16x32xf32>
    %435 = arith.mulf %433, %434 : vector<16x32xf32>
    %436 = vector.broadcast %415 : vector<1x32xf32> to vector<16x32xf32>
    %437 = arith.addf %435, %436 : vector<16x32xf32>
    %c384 = arith.constant 384 : index
    %c0_93 = arith.constant 0 : index
    %438 = vector.load %arg2[%c384, %c0_93] : memref<832x128xbf16, #tpu.memory_space<vmem>>, vector<32x32xbf16>
    %439 = arith.truncf %437 : vector<16x32xf32> to vector<16x32xbf16>
    %cst_94 = arith.constant dense<0.000000e+00> : vector<16x32xf32>
    %440 = tpu.matmul %439, %438, %cst_94 {dimension_numbers = #tpu.dot_dimension_numbers<[1], [0], [0], [1], [0, 0, 1, 1], [], []>} : vector<16x32xbf16>, vector<32x32xbf16>, vector<16x32xf32> -> vector<16x32xf32>
    %441 = vector.extract_strided_slice %347 {offsets = [4, 0], sizes = [1, 32], strides = [1, 1]} : vector<16x128xf32> to vector<1x32xf32>
    %442 = vector.broadcast %441 : vector<1x32xf32> to vector<16x32xf32>
    %443 = arith.addf %440, %442 : vector<16x32xf32>
    %444 = vector.extract_strided_slice %346 {offsets = [0, 0], sizes = [16, 64], strides = [1, 1]} : vector<16x128xf32> to vector<16x64xf32>
    %445 = vector.extract_strided_slice %444 {offsets = [0, 0], sizes = [16, 32], strides = [1, 1]} : vector<16x64xf32> to vector<16x32xf32>
    %446 = vector.extract_strided_slice %444 {offsets = [0, 32], sizes = [16, 32], strides = [1, 1]} : vector<16x64xf32> to vector<16x32xf32>
    %447 = arith.truncf %445 : vector<16x32xf32> to vector<16x32xbf16>
    %448 = vector.broadcast %7 : vector<1x32xf32> to vector<16x32xf32>
    %449 = arith.mulf %443, %448 : vector<16x32xf32>
    %450 = arith.truncf %449 : vector<16x32xf32> to vector<16x32xbf16>
    %cst_95 = arith.constant dense<0.000000e+00> : vector<16x16xf32>
    %451 = tpu.matmul %450, %447, %cst_95 {dimension_numbers = #tpu.dot_dimension_numbers<[1], [1], [0], [0], [0, 0, 1, 0], [], []>} : vector<16x32xbf16>, vector<16x32xbf16>, vector<16x16xf32> -> vector<16x16xf32>
    %452 = arith.addf %451, %80 : vector<16x16xf32>
    %453 = vector.broadcast %14 : vector<1x32xf32> to vector<16x32xf32>
    %454 = arith.mulf %443, %453 : vector<16x32xf32>
    %455 = arith.truncf %454 : vector<16x32xf32> to vector<16x32xbf16>
    %cst_96 = arith.constant dense<0.000000e+00> : vector<16x16xf32>
    %456 = tpu.matmul %455, %447, %cst_96 {dimension_numbers = #tpu.dot_dimension_numbers<[1], [1], [0], [0], [0, 0, 1, 0], [], []>} : vector<16x32xbf16>, vector<16x32xbf16>, vector<16x16xf32> -> vector<16x16xf32>
    %457 = arith.addf %456, %80 : vector<16x16xf32>
    %458 = vector.broadcast %21 : vector<1x32xf32> to vector<16x32xf32>
    %459 = arith.mulf %443, %458 : vector<16x32xf32>
    %460 = arith.truncf %459 : vector<16x32xf32> to vector<16x32xbf16>
    %cst_97 = arith.constant dense<0.000000e+00> : vector<16x16xf32>
    %461 = tpu.matmul %460, %447, %cst_97 {dimension_numbers = #tpu.dot_dimension_numbers<[1], [1], [0], [0], [0, 0, 1, 0], [], []>} : vector<16x32xbf16>, vector<16x32xbf16>, vector<16x16xf32> -> vector<16x16xf32>
    %462 = arith.addf %461, %80 : vector<16x16xf32>
    %463 = vector.broadcast %28 : vector<1x32xf32> to vector<16x32xf32>
    %464 = arith.mulf %443, %463 : vector<16x32xf32>
    %465 = arith.truncf %464 : vector<16x32xf32> to vector<16x32xbf16>
    %cst_98 = arith.constant dense<0.000000e+00> : vector<16x16xf32>
    %466 = tpu.matmul %465, %447, %cst_98 {dimension_numbers = #tpu.dot_dimension_numbers<[1], [1], [0], [0], [0, 0, 1, 0], [], []>} : vector<16x32xbf16>, vector<16x32xbf16>, vector<16x16xf32> -> vector<16x16xf32>
    %467 = arith.addf %466, %80 : vector<16x16xf32>
    %468 = tpu.concatenate %452, %457, %462, %467 in 0 : vector<16x16xf32>, vector<16x16xf32>, vector<16x16xf32>, vector<16x16xf32> -> vector<64x16xf32>
    %cst_99 = arith.constant dense<0xFF800000> : vector<64xf32>
    %469 = vector.multi_reduction <maximumf>, %468, %cst_99 [1] : vector<64x16xf32> to vector<64xf32>
    %470 = vector.shape_cast %469 : vector<64xf32> to vector<64x1xf32>
    %471 = vector.broadcast %470 : vector<64x1xf32> to vector<64x16xf32>
    %472 = arith.subf %468, %471 : vector<64x16xf32>
    %473 = math.exp %472 : vector<64x16xf32>
    %cst_100 = arith.constant dense<0.000000e+00> : vector<64xf32>
    %474 = vector.multi_reduction <add>, %473, %cst_100 [1] : vector<64x16xf32> to vector<64xf32>
    %475 = vector.shape_cast %474 : vector<64xf32> to vector<64x1xf32>
    %476 = tpu.reciprocal %475 {approx = true} : vector<64x1xf32> -> vector<64x1xf32>
    %477 = vector.broadcast %476 : vector<64x1xf32> to vector<64x16xf32>
    %478 = arith.mulf %473, %477 : vector<64x16xf32>
    %479 = arith.truncf %478 : vector<64x16xf32> to vector<64x16xbf16>
    %480 = arith.truncf %446 : vector<16x32xf32> to vector<16x32xbf16>
    %cst_101 = arith.constant dense<0.000000e+00> : vector<64x32xf32>
    %481 = tpu.matmul %479, %480, %cst_101 {dimension_numbers = #tpu.dot_dimension_numbers<[1], [0], [0], [1], [0, 0, 1, 1], [], []>} : vector<64x16xbf16>, vector<16x32xbf16>, vector<64x32xf32> -> vector<64x32xf32>
    %482 = vector.extract_strided_slice %481 {offsets = [0, 0], sizes = [16, 32], strides = [1, 1]} : vector<64x32xf32> to vector<16x32xf32>
    %483 = vector.broadcast %7 : vector<1x32xf32> to vector<16x32xf32>
    %484 = arith.mulf %482, %483 : vector<16x32xf32>
    %485 = vector.extract_strided_slice %481 {offsets = [16, 0], sizes = [16, 32], strides = [1, 1]} : vector<64x32xf32> to vector<16x32xf32>
    %486 = vector.broadcast %14 : vector<1x32xf32> to vector<16x32xf32>
    %487 = arith.mulf %485, %486 : vector<16x32xf32>
    %488 = arith.addf %484, %487 : vector<16x32xf32>
    %489 = vector.extract_strided_slice %481 {offsets = [32, 0], sizes = [16, 32], strides = [1, 1]} : vector<64x32xf32> to vector<16x32xf32>
    %490 = vector.broadcast %21 : vector<1x32xf32> to vector<16x32xf32>
    %491 = arith.mulf %489, %490 : vector<16x32xf32>
    %492 = arith.addf %488, %491 : vector<16x32xf32>
    %493 = vector.extract_strided_slice %481 {offsets = [48, 0], sizes = [16, 32], strides = [1, 1]} : vector<64x32xf32> to vector<16x32xf32>
    %494 = vector.broadcast %28 : vector<1x32xf32> to vector<16x32xf32>
    %495 = arith.mulf %493, %494 : vector<16x32xf32>
    %496 = arith.addf %492, %495 : vector<16x32xf32>
    %c416 = arith.constant 416 : index
    %c0_102 = arith.constant 0 : index
    %497 = vector.load %arg2[%c416, %c0_102] : memref<832x128xbf16, #tpu.memory_space<vmem>>, vector<32x32xbf16>
    %498 = arith.truncf %496 : vector<16x32xf32> to vector<16x32xbf16>
    %cst_103 = arith.constant dense<0.000000e+00> : vector<16x32xf32>
    %499 = tpu.matmul %498, %497, %cst_103 {dimension_numbers = #tpu.dot_dimension_numbers<[1], [0], [0], [1], [0, 0, 1, 1], [], []>} : vector<16x32xbf16>, vector<32x32xbf16>, vector<16x32xf32> -> vector<16x32xf32>
    %500 = vector.extract_strided_slice %347 {offsets = [5, 0], sizes = [1, 32], strides = [1, 1]} : vector<16x128xf32> to vector<1x32xf32>
    %501 = vector.broadcast %500 : vector<1x32xf32> to vector<16x32xf32>
    %502 = arith.addf %499, %501 : vector<16x32xf32>
    %503 = arith.addf %437, %502 : vector<16x32xf32>
    %504 = vector.extract_strided_slice %347 {offsets = [6, 0], sizes = [1, 32], strides = [1, 1]} : vector<16x128xf32> to vector<1x32xf32>
    %505 = vector.extract_strided_slice %347 {offsets = [7, 0], sizes = [1, 32], strides = [1, 1]} : vector<16x128xf32> to vector<1x32xf32>
    %cst_104 = arith.constant dense<0.000000e+00> : vector<16xf32>
    %506 = vector.multi_reduction <add>, %503, %cst_104 [1] : vector<16x32xf32> to vector<16xf32>
    %507 = vector.shape_cast %506 : vector<16xf32> to vector<16x1xf32>
    %cst_105 = arith.constant 3.200000e+01 : f32
    %508 = vector.broadcast %cst_105 : f32 to vector<16x1xf32>
    %509 = arith.divf %507, %508 : vector<16x1xf32>
    %510 = vector.broadcast %509 : vector<16x1xf32> to vector<16x32xf32>
    %511 = arith.subf %503, %510 : vector<16x32xf32>
    %512 = arith.mulf %511, %511 : vector<16x32xf32>
    %cst_106 = arith.constant dense<0.000000e+00> : vector<16xf32>
    %513 = vector.multi_reduction <add>, %512, %cst_106 [1] : vector<16x32xf32> to vector<16xf32>
    %514 = vector.shape_cast %513 : vector<16xf32> to vector<16x1xf32>
    %cst_107 = arith.constant 3.200000e+01 : f32
    %515 = vector.broadcast %cst_107 : f32 to vector<16x1xf32>
    %516 = arith.divf %514, %515 : vector<16x1xf32>
    %517 = vector.broadcast %509 : vector<16x1xf32> to vector<16x32xf32>
    %518 = arith.subf %503, %517 : vector<16x32xf32>
    %cst_108 = arith.constant 9.99999974E-6 : f32
    %519 = vector.broadcast %cst_108 : f32 to vector<16x1xf32>
    %520 = arith.addf %516, %519 : vector<16x1xf32>
    %521 = math.rsqrt %520 : vector<16x1xf32>
    %522 = vector.broadcast %521 : vector<16x1xf32> to vector<16x32xf32>
    %523 = arith.mulf %518, %522 : vector<16x32xf32>
    %524 = vector.broadcast %504 : vector<1x32xf32> to vector<16x32xf32>
    %525 = arith.mulf %523, %524 : vector<16x32xf32>
    %526 = vector.broadcast %505 : vector<1x32xf32> to vector<16x32xf32>
    %527 = arith.addf %525, %526 : vector<16x32xf32>
    %c448 = arith.constant 448 : index
    %c0_109 = arith.constant 0 : index
    %528 = vector.load %arg2[%c448, %c0_109] : memref<832x128xbf16, #tpu.memory_space<vmem>>, vector<32x64xbf16>
    %529 = arith.truncf %527 : vector<16x32xf32> to vector<16x32xbf16>
    %cst_110 = arith.constant dense<0.000000e+00> : vector<16x64xf32>
    %530 = tpu.matmul %529, %528, %cst_110 {dimension_numbers = #tpu.dot_dimension_numbers<[1], [0], [0], [1], [0, 0, 1, 1], [], []>} : vector<16x32xbf16>, vector<32x64xbf16>, vector<16x64xf32> -> vector<16x64xf32>
    %531 = vector.extract_strided_slice %347 {offsets = [8, 0], sizes = [1, 64], strides = [1, 1]} : vector<16x128xf32> to vector<1x64xf32>
    %532 = vector.broadcast %531 : vector<1x64xf32> to vector<16x64xf32>
    %533 = arith.addf %530, %532 : vector<16x64xf32>
    %cst_111 = arith.constant 0.000000e+00 : f32
    %534 = vector.broadcast %cst_111 : f32 to vector<16x64xf32>
    %535 = arith.maximumf %533, %534 : vector<16x64xf32>
    %c480 = arith.constant 480 : index
    %c0_112 = arith.constant 0 : index
    %536 = vector.load %arg2[%c480, %c0_112] : memref<832x128xbf16, #tpu.memory_space<vmem>>, vector<64x32xbf16>
    %537 = arith.truncf %535 : vector<16x64xf32> to vector<16x64xbf16>
    %cst_113 = arith.constant dense<0.000000e+00> : vector<16x32xf32>
    %538 = tpu.matmul %537, %536, %cst_113 {dimension_numbers = #tpu.dot_dimension_numbers<[1], [0], [0], [1], [0, 0, 1, 1], [], []>} : vector<16x64xbf16>, vector<64x32xbf16>, vector<16x32xf32> -> vector<16x32xf32>
    %539 = vector.extract_strided_slice %347 {offsets = [9, 0], sizes = [1, 32], strides = [1, 1]} : vector<16x128xf32> to vector<1x32xf32>
    %540 = vector.broadcast %539 : vector<1x32xf32> to vector<16x32xf32>
    %541 = arith.addf %538, %540 : vector<16x32xf32>
    %542 = arith.addf %527, %541 : vector<16x32xf32>
    %543 = vector.extract_strided_slice %347 {offsets = [10, 0], sizes = [1, 32], strides = [1, 1]} : vector<16x128xf32> to vector<1x32xf32>
    %544 = vector.extract_strided_slice %347 {offsets = [11, 0], sizes = [1, 32], strides = [1, 1]} : vector<16x128xf32> to vector<1x32xf32>
    %cst_114 = arith.constant dense<0.000000e+00> : vector<16xf32>
    %545 = vector.multi_reduction <add>, %542, %cst_114 [1] : vector<16x32xf32> to vector<16xf32>
    %546 = vector.shape_cast %545 : vector<16xf32> to vector<16x1xf32>
    %cst_115 = arith.constant 3.200000e+01 : f32
    %547 = vector.broadcast %cst_115 : f32 to vector<16x1xf32>
    %548 = arith.divf %546, %547 : vector<16x1xf32>
    %549 = vector.broadcast %548 : vector<16x1xf32> to vector<16x32xf32>
    %550 = arith.subf %542, %549 : vector<16x32xf32>
    %551 = arith.mulf %550, %550 : vector<16x32xf32>
    %cst_116 = arith.constant dense<0.000000e+00> : vector<16xf32>
    %552 = vector.multi_reduction <add>, %551, %cst_116 [1] : vector<16x32xf32> to vector<16xf32>
    %553 = vector.shape_cast %552 : vector<16xf32> to vector<16x1xf32>
    %cst_117 = arith.constant 3.200000e+01 : f32
    %554 = vector.broadcast %cst_117 : f32 to vector<16x1xf32>
    %555 = arith.divf %553, %554 : vector<16x1xf32>
    %556 = vector.broadcast %548 : vector<16x1xf32> to vector<16x32xf32>
    %557 = arith.subf %542, %556 : vector<16x32xf32>
    %cst_118 = arith.constant 9.99999974E-6 : f32
    %558 = vector.broadcast %cst_118 : f32 to vector<16x1xf32>
    %559 = arith.addf %555, %558 : vector<16x1xf32>
    %560 = math.rsqrt %559 : vector<16x1xf32>
    %561 = vector.broadcast %560 : vector<16x1xf32> to vector<16x32xf32>
    %562 = arith.mulf %557, %561 : vector<16x32xf32>
    %563 = vector.broadcast %543 : vector<1x32xf32> to vector<16x32xf32>
    %564 = arith.mulf %562, %563 : vector<16x32xf32>
    %565 = vector.broadcast %544 : vector<1x32xf32> to vector<16x32xf32>
    %566 = arith.addf %564, %565 : vector<16x32xf32>
    %c120 = arith.constant 120 : index
    %c0_119 = arith.constant 0 : index
    %567 = vector.load %arg3[%c120, %c0_119] : memref<136x128xf32, #tpu.memory_space<vmem>>, vector<16x128xf32>
    %c544 = arith.constant 544 : index
    %c0_120 = arith.constant 0 : index
    %568 = vector.load %arg2[%c544, %c0_120] : memref<832x128xbf16, #tpu.memory_space<vmem>>, vector<32x96xbf16>
    %569 = arith.truncf %566 : vector<16x32xf32> to vector<16x32xbf16>
    %cst_121 = arith.constant dense<0.000000e+00> : vector<16x96xf32>
    %570 = tpu.matmul %569, %568, %cst_121 {dimension_numbers = #tpu.dot_dimension_numbers<[1], [0], [0], [1], [0, 0, 1, 1], [], []>} : vector<16x32xbf16>, vector<32x96xbf16>, vector<16x96xf32> -> vector<16x96xf32>
    %571 = vector.extract_strided_slice %567 {offsets = [0, 0], sizes = [1, 96], strides = [1, 1]} : vector<16x128xf32> to vector<1x96xf32>
    %572 = vector.broadcast %571 : vector<1x96xf32> to vector<16x96xf32>
    %573 = arith.addf %570, %572 : vector<16x96xf32>
    %574 = vector.extract_strided_slice %573 {offsets = [0, 0], sizes = [16, 32], strides = [1, 1]} : vector<16x96xf32> to vector<16x32xf32>
    %575 = vector.extract_strided_slice %573 {offsets = [0, 32], sizes = [16, 32], strides = [1, 1]} : vector<16x96xf32> to vector<16x32xf32>
    %576 = vector.extract_strided_slice %573 {offsets = [0, 64], sizes = [16, 32], strides = [1, 1]} : vector<16x96xf32> to vector<16x32xf32>
    %577 = arith.truncf %575 : vector<16x32xf32> to vector<16x32xbf16>
    %578 = vector.broadcast %7 : vector<1x32xf32> to vector<16x32xf32>
    %579 = arith.mulf %574, %578 : vector<16x32xf32>
    %580 = arith.truncf %579 : vector<16x32xf32> to vector<16x32xbf16>
    %cst_122 = arith.constant dense<0.000000e+00> : vector<16x16xf32>
    %581 = tpu.matmul %580, %577, %cst_122 {dimension_numbers = #tpu.dot_dimension_numbers<[1], [1], [0], [0], [0, 0, 1, 0], [], []>} : vector<16x32xbf16>, vector<16x32xbf16>, vector<16x16xf32> -> vector<16x16xf32>
    %582 = arith.addf %581, %78 : vector<16x16xf32>
    %583 = vector.broadcast %14 : vector<1x32xf32> to vector<16x32xf32>
    %584 = arith.mulf %574, %583 : vector<16x32xf32>
    %585 = arith.truncf %584 : vector<16x32xf32> to vector<16x32xbf16>
    %cst_123 = arith.constant dense<0.000000e+00> : vector<16x16xf32>
    %586 = tpu.matmul %585, %577, %cst_123 {dimension_numbers = #tpu.dot_dimension_numbers<[1], [1], [0], [0], [0, 0, 1, 0], [], []>} : vector<16x32xbf16>, vector<16x32xbf16>, vector<16x16xf32> -> vector<16x16xf32>
    %587 = arith.addf %586, %78 : vector<16x16xf32>
    %588 = vector.broadcast %21 : vector<1x32xf32> to vector<16x32xf32>
    %589 = arith.mulf %574, %588 : vector<16x32xf32>
    %590 = arith.truncf %589 : vector<16x32xf32> to vector<16x32xbf16>
    %cst_124 = arith.constant dense<0.000000e+00> : vector<16x16xf32>
    %591 = tpu.matmul %590, %577, %cst_124 {dimension_numbers = #tpu.dot_dimension_numbers<[1], [1], [0], [0], [0, 0, 1, 0], [], []>} : vector<16x32xbf16>, vector<16x32xbf16>, vector<16x16xf32> -> vector<16x16xf32>
    %592 = arith.addf %591, %78 : vector<16x16xf32>
    %593 = vector.broadcast %28 : vector<1x32xf32> to vector<16x32xf32>
    %594 = arith.mulf %574, %593 : vector<16x32xf32>
    %595 = arith.truncf %594 : vector<16x32xf32> to vector<16x32xbf16>
    %cst_125 = arith.constant dense<0.000000e+00> : vector<16x16xf32>
    %596 = tpu.matmul %595, %577, %cst_125 {dimension_numbers = #tpu.dot_dimension_numbers<[1], [1], [0], [0], [0, 0, 1, 0], [], []>} : vector<16x32xbf16>, vector<16x32xbf16>, vector<16x16xf32> -> vector<16x16xf32>
    %597 = arith.addf %596, %78 : vector<16x16xf32>
    %598 = tpu.concatenate %582, %587, %592, %597 in 0 : vector<16x16xf32>, vector<16x16xf32>, vector<16x16xf32>, vector<16x16xf32> -> vector<64x16xf32>
    %cst_126 = arith.constant dense<0xFF800000> : vector<64xf32>
    %599 = vector.multi_reduction <maximumf>, %598, %cst_126 [1] : vector<64x16xf32> to vector<64xf32>
    %600 = vector.shape_cast %599 : vector<64xf32> to vector<64x1xf32>
    %601 = vector.broadcast %600 : vector<64x1xf32> to vector<64x16xf32>
    %602 = arith.subf %598, %601 : vector<64x16xf32>
    %603 = math.exp %602 : vector<64x16xf32>
    %cst_127 = arith.constant dense<0.000000e+00> : vector<64xf32>
    %604 = vector.multi_reduction <add>, %603, %cst_127 [1] : vector<64x16xf32> to vector<64xf32>
    %605 = vector.shape_cast %604 : vector<64xf32> to vector<64x1xf32>
    %606 = tpu.reciprocal %605 {approx = true} : vector<64x1xf32> -> vector<64x1xf32>
    %607 = vector.broadcast %606 : vector<64x1xf32> to vector<64x16xf32>
    %608 = arith.mulf %603, %607 : vector<64x16xf32>
    %609 = arith.truncf %608 : vector<64x16xf32> to vector<64x16xbf16>
    %610 = arith.truncf %576 : vector<16x32xf32> to vector<16x32xbf16>
    %cst_128 = arith.constant dense<0.000000e+00> : vector<64x32xf32>
    %611 = tpu.matmul %609, %610, %cst_128 {dimension_numbers = #tpu.dot_dimension_numbers<[1], [0], [0], [1], [0, 0, 1, 1], [], []>} : vector<64x16xbf16>, vector<16x32xbf16>, vector<64x32xf32> -> vector<64x32xf32>
    %612 = vector.extract_strided_slice %611 {offsets = [0, 0], sizes = [16, 32], strides = [1, 1]} : vector<64x32xf32> to vector<16x32xf32>
    %613 = vector.broadcast %7 : vector<1x32xf32> to vector<16x32xf32>
    %614 = arith.mulf %612, %613 : vector<16x32xf32>
    %615 = vector.extract_strided_slice %611 {offsets = [16, 0], sizes = [16, 32], strides = [1, 1]} : vector<64x32xf32> to vector<16x32xf32>
    %616 = vector.broadcast %14 : vector<1x32xf32> to vector<16x32xf32>
    %617 = arith.mulf %615, %616 : vector<16x32xf32>
    %618 = arith.addf %614, %617 : vector<16x32xf32>
    %619 = vector.extract_strided_slice %611 {offsets = [32, 0], sizes = [16, 32], strides = [1, 1]} : vector<64x32xf32> to vector<16x32xf32>
    %620 = vector.broadcast %21 : vector<1x32xf32> to vector<16x32xf32>
    %621 = arith.mulf %619, %620 : vector<16x32xf32>
    %622 = arith.addf %618, %621 : vector<16x32xf32>
    %623 = vector.extract_strided_slice %611 {offsets = [48, 0], sizes = [16, 32], strides = [1, 1]} : vector<64x32xf32> to vector<16x32xf32>
    %624 = vector.broadcast %28 : vector<1x32xf32> to vector<16x32xf32>
    %625 = arith.mulf %623, %624 : vector<16x32xf32>
    %626 = arith.addf %622, %625 : vector<16x32xf32>
    %c576 = arith.constant 576 : index
    %c0_129 = arith.constant 0 : index
    %627 = vector.load %arg2[%c576, %c0_129] : memref<832x128xbf16, #tpu.memory_space<vmem>>, vector<32x32xbf16>
    %628 = arith.truncf %626 : vector<16x32xf32> to vector<16x32xbf16>
    %cst_130 = arith.constant dense<0.000000e+00> : vector<16x32xf32>
    %629 = tpu.matmul %628, %627, %cst_130 {dimension_numbers = #tpu.dot_dimension_numbers<[1], [0], [0], [1], [0, 0, 1, 1], [], []>} : vector<16x32xbf16>, vector<32x32xbf16>, vector<16x32xf32> -> vector<16x32xf32>
    %630 = vector.extract_strided_slice %567 {offsets = [1, 0], sizes = [1, 32], strides = [1, 1]} : vector<16x128xf32> to vector<1x32xf32>
    %631 = vector.broadcast %630 : vector<1x32xf32> to vector<16x32xf32>
    %632 = arith.addf %629, %631 : vector<16x32xf32>
    %633 = arith.addf %566, %632 : vector<16x32xf32>
    %634 = vector.extract_strided_slice %567 {offsets = [2, 0], sizes = [1, 32], strides = [1, 1]} : vector<16x128xf32> to vector<1x32xf32>
    %635 = vector.extract_strided_slice %567 {offsets = [3, 0], sizes = [1, 32], strides = [1, 1]} : vector<16x128xf32> to vector<1x32xf32>
    %cst_131 = arith.constant dense<0.000000e+00> : vector<16xf32>
    %636 = vector.multi_reduction <add>, %633, %cst_131 [1] : vector<16x32xf32> to vector<16xf32>
    %637 = vector.shape_cast %636 : vector<16xf32> to vector<16x1xf32>
    %cst_132 = arith.constant 3.200000e+01 : f32
    %638 = vector.broadcast %cst_132 : f32 to vector<16x1xf32>
    %639 = arith.divf %637, %638 : vector<16x1xf32>
    %640 = vector.broadcast %639 : vector<16x1xf32> to vector<16x32xf32>
    %641 = arith.subf %633, %640 : vector<16x32xf32>
    %642 = arith.mulf %641, %641 : vector<16x32xf32>
    %cst_133 = arith.constant dense<0.000000e+00> : vector<16xf32>
    %643 = vector.multi_reduction <add>, %642, %cst_133 [1] : vector<16x32xf32> to vector<16xf32>
    %644 = vector.shape_cast %643 : vector<16xf32> to vector<16x1xf32>
    %cst_134 = arith.constant 3.200000e+01 : f32
    %645 = vector.broadcast %cst_134 : f32 to vector<16x1xf32>
    %646 = arith.divf %644, %645 : vector<16x1xf32>
    %647 = vector.broadcast %639 : vector<16x1xf32> to vector<16x32xf32>
    %648 = arith.subf %633, %647 : vector<16x32xf32>
    %cst_135 = arith.constant 9.99999974E-6 : f32
    %649 = vector.broadcast %cst_135 : f32 to vector<16x1xf32>
    %650 = arith.addf %646, %649 : vector<16x1xf32>
    %651 = math.rsqrt %650 : vector<16x1xf32>
    %652 = vector.broadcast %651 : vector<16x1xf32> to vector<16x32xf32>
    %653 = arith.mulf %648, %652 : vector<16x32xf32>
    %654 = vector.broadcast %634 : vector<1x32xf32> to vector<16x32xf32>
    %655 = arith.mulf %653, %654 : vector<16x32xf32>
    %656 = vector.broadcast %635 : vector<1x32xf32> to vector<16x32xf32>
    %657 = arith.addf %655, %656 : vector<16x32xf32>
    %c608 = arith.constant 608 : index
    %c0_136 = arith.constant 0 : index
    %658 = vector.load %arg2[%c608, %c0_136] : memref<832x128xbf16, #tpu.memory_space<vmem>>, vector<32x32xbf16>
    %659 = arith.truncf %657 : vector<16x32xf32> to vector<16x32xbf16>
    %cst_137 = arith.constant dense<0.000000e+00> : vector<16x32xf32>
    %660 = tpu.matmul %659, %658, %cst_137 {dimension_numbers = #tpu.dot_dimension_numbers<[1], [0], [0], [1], [0, 0, 1, 1], [], []>} : vector<16x32xbf16>, vector<32x32xbf16>, vector<16x32xf32> -> vector<16x32xf32>
    %661 = vector.extract_strided_slice %567 {offsets = [4, 0], sizes = [1, 32], strides = [1, 1]} : vector<16x128xf32> to vector<1x32xf32>
    %662 = vector.broadcast %661 : vector<1x32xf32> to vector<16x32xf32>
    %663 = arith.addf %660, %662 : vector<16x32xf32>
    %664 = vector.extract_strided_slice %346 {offsets = [0, 64], sizes = [16, 64], strides = [1, 1]} : vector<16x128xf32> to vector<16x64xf32>
    %665 = vector.extract_strided_slice %664 {offsets = [0, 0], sizes = [16, 32], strides = [1, 1]} : vector<16x64xf32> to vector<16x32xf32>
    %666 = vector.extract_strided_slice %664 {offsets = [0, 32], sizes = [16, 32], strides = [1, 1]} : vector<16x64xf32> to vector<16x32xf32>
    %667 = arith.truncf %665 : vector<16x32xf32> to vector<16x32xbf16>
    %668 = vector.broadcast %7 : vector<1x32xf32> to vector<16x32xf32>
    %669 = arith.mulf %663, %668 : vector<16x32xf32>
    %670 = arith.truncf %669 : vector<16x32xf32> to vector<16x32xbf16>
    %cst_138 = arith.constant dense<0.000000e+00> : vector<16x16xf32>
    %671 = tpu.matmul %670, %667, %cst_138 {dimension_numbers = #tpu.dot_dimension_numbers<[1], [1], [0], [0], [0, 0, 1, 0], [], []>} : vector<16x32xbf16>, vector<16x32xbf16>, vector<16x16xf32> -> vector<16x16xf32>
    %672 = arith.addf %671, %80 : vector<16x16xf32>
    %673 = vector.broadcast %14 : vector<1x32xf32> to vector<16x32xf32>
    %674 = arith.mulf %663, %673 : vector<16x32xf32>
    %675 = arith.truncf %674 : vector<16x32xf32> to vector<16x32xbf16>
    %cst_139 = arith.constant dense<0.000000e+00> : vector<16x16xf32>
    %676 = tpu.matmul %675, %667, %cst_139 {dimension_numbers = #tpu.dot_dimension_numbers<[1], [1], [0], [0], [0, 0, 1, 0], [], []>} : vector<16x32xbf16>, vector<16x32xbf16>, vector<16x16xf32> -> vector<16x16xf32>
    %677 = arith.addf %676, %80 : vector<16x16xf32>
    %678 = vector.broadcast %21 : vector<1x32xf32> to vector<16x32xf32>
    %679 = arith.mulf %663, %678 : vector<16x32xf32>
    %680 = arith.truncf %679 : vector<16x32xf32> to vector<16x32xbf16>
    %cst_140 = arith.constant dense<0.000000e+00> : vector<16x16xf32>
    %681 = tpu.matmul %680, %667, %cst_140 {dimension_numbers = #tpu.dot_dimension_numbers<[1], [1], [0], [0], [0, 0, 1, 0], [], []>} : vector<16x32xbf16>, vector<16x32xbf16>, vector<16x16xf32> -> vector<16x16xf32>
    %682 = arith.addf %681, %80 : vector<16x16xf32>
    %683 = vector.broadcast %28 : vector<1x32xf32> to vector<16x32xf32>
    %684 = arith.mulf %663, %683 : vector<16x32xf32>
    %685 = arith.truncf %684 : vector<16x32xf32> to vector<16x32xbf16>
    %cst_141 = arith.constant dense<0.000000e+00> : vector<16x16xf32>
    %686 = tpu.matmul %685, %667, %cst_141 {dimension_numbers = #tpu.dot_dimension_numbers<[1], [1], [0], [0], [0, 0, 1, 0], [], []>} : vector<16x32xbf16>, vector<16x32xbf16>, vector<16x16xf32> -> vector<16x16xf32>
    %687 = arith.addf %686, %80 : vector<16x16xf32>
    %688 = tpu.concatenate %672, %677, %682, %687 in 0 : vector<16x16xf32>, vector<16x16xf32>, vector<16x16xf32>, vector<16x16xf32> -> vector<64x16xf32>
    %cst_142 = arith.constant dense<0xFF800000> : vector<64xf32>
    %689 = vector.multi_reduction <maximumf>, %688, %cst_142 [1] : vector<64x16xf32> to vector<64xf32>
    %690 = vector.shape_cast %689 : vector<64xf32> to vector<64x1xf32>
    %691 = vector.broadcast %690 : vector<64x1xf32> to vector<64x16xf32>
    %692 = arith.subf %688, %691 : vector<64x16xf32>
    %693 = math.exp %692 : vector<64x16xf32>
    %cst_143 = arith.constant dense<0.000000e+00> : vector<64xf32>
    %694 = vector.multi_reduction <add>, %693, %cst_143 [1] : vector<64x16xf32> to vector<64xf32>
    %695 = vector.shape_cast %694 : vector<64xf32> to vector<64x1xf32>
    %696 = tpu.reciprocal %695 {approx = true} : vector<64x1xf32> -> vector<64x1xf32>
    %697 = vector.broadcast %696 : vector<64x1xf32> to vector<64x16xf32>
    %698 = arith.mulf %693, %697 : vector<64x16xf32>
    %699 = arith.truncf %698 : vector<64x16xf32> to vector<64x16xbf16>
    %700 = arith.truncf %666 : vector<16x32xf32> to vector<16x32xbf16>
    %cst_144 = arith.constant dense<0.000000e+00> : vector<64x32xf32>
    %701 = tpu.matmul %699, %700, %cst_144 {dimension_numbers = #tpu.dot_dimension_numbers<[1], [0], [0], [1], [0, 0, 1, 1], [], []>} : vector<64x16xbf16>, vector<16x32xbf16>, vector<64x32xf32> -> vector<64x32xf32>
    %702 = vector.extract_strided_slice %701 {offsets = [0, 0], sizes = [16, 32], strides = [1, 1]} : vector<64x32xf32> to vector<16x32xf32>
    %703 = vector.broadcast %7 : vector<1x32xf32> to vector<16x32xf32>
    %704 = arith.mulf %702, %703 : vector<16x32xf32>
    %705 = vector.extract_strided_slice %701 {offsets = [16, 0], sizes = [16, 32], strides = [1, 1]} : vector<64x32xf32> to vector<16x32xf32>
    %706 = vector.broadcast %14 : vector<1x32xf32> to vector<16x32xf32>
    %707 = arith.mulf %705, %706 : vector<16x32xf32>
    %708 = arith.addf %704, %707 : vector<16x32xf32>
    %709 = vector.extract_strided_slice %701 {offsets = [32, 0], sizes = [16, 32], strides = [1, 1]} : vector<64x32xf32> to vector<16x32xf32>
    %710 = vector.broadcast %21 : vector<1x32xf32> to vector<16x32xf32>
    %711 = arith.mulf %709, %710 : vector<16x32xf32>
    %712 = arith.addf %708, %711 : vector<16x32xf32>
    %713 = vector.extract_strided_slice %701 {offsets = [48, 0], sizes = [16, 32], strides = [1, 1]} : vector<64x32xf32> to vector<16x32xf32>
    %714 = vector.broadcast %28 : vector<1x32xf32> to vector<16x32xf32>
    %715 = arith.mulf %713, %714 : vector<16x32xf32>
    %716 = arith.addf %712, %715 : vector<16x32xf32>
    %c640 = arith.constant 640 : index
    %c0_145 = arith.constant 0 : index
    %717 = vector.load %arg2[%c640, %c0_145] : memref<832x128xbf16, #tpu.memory_space<vmem>>, vector<32x32xbf16>
    %718 = arith.truncf %716 : vector<16x32xf32> to vector<16x32xbf16>
    %cst_146 = arith.constant dense<0.000000e+00> : vector<16x32xf32>
    %719 = tpu.matmul %718, %717, %cst_146 {dimension_numbers = #tpu.dot_dimension_numbers<[1], [0], [0], [1], [0, 0, 1, 1], [], []>} : vector<16x32xbf16>, vector<32x32xbf16>, vector<16x32xf32> -> vector<16x32xf32>
    %720 = vector.extract_strided_slice %567 {offsets = [5, 0], sizes = [1, 32], strides = [1, 1]} : vector<16x128xf32> to vector<1x32xf32>
    %721 = vector.broadcast %720 : vector<1x32xf32> to vector<16x32xf32>
    %722 = arith.addf %719, %721 : vector<16x32xf32>
    %723 = arith.addf %657, %722 : vector<16x32xf32>
    %724 = vector.extract_strided_slice %567 {offsets = [6, 0], sizes = [1, 32], strides = [1, 1]} : vector<16x128xf32> to vector<1x32xf32>
    %725 = vector.extract_strided_slice %567 {offsets = [7, 0], sizes = [1, 32], strides = [1, 1]} : vector<16x128xf32> to vector<1x32xf32>
    %cst_147 = arith.constant dense<0.000000e+00> : vector<16xf32>
    %726 = vector.multi_reduction <add>, %723, %cst_147 [1] : vector<16x32xf32> to vector<16xf32>
    %727 = vector.shape_cast %726 : vector<16xf32> to vector<16x1xf32>
    %cst_148 = arith.constant 3.200000e+01 : f32
    %728 = vector.broadcast %cst_148 : f32 to vector<16x1xf32>
    %729 = arith.divf %727, %728 : vector<16x1xf32>
    %730 = vector.broadcast %729 : vector<16x1xf32> to vector<16x32xf32>
    %731 = arith.subf %723, %730 : vector<16x32xf32>
    %732 = arith.mulf %731, %731 : vector<16x32xf32>
    %cst_149 = arith.constant dense<0.000000e+00> : vector<16xf32>
    %733 = vector.multi_reduction <add>, %732, %cst_149 [1] : vector<16x32xf32> to vector<16xf32>
    %734 = vector.shape_cast %733 : vector<16xf32> to vector<16x1xf32>
    %cst_150 = arith.constant 3.200000e+01 : f32
    %735 = vector.broadcast %cst_150 : f32 to vector<16x1xf32>
    %736 = arith.divf %734, %735 : vector<16x1xf32>
    %737 = vector.broadcast %729 : vector<16x1xf32> to vector<16x32xf32>
    %738 = arith.subf %723, %737 : vector<16x32xf32>
    %cst_151 = arith.constant 9.99999974E-6 : f32
    %739 = vector.broadcast %cst_151 : f32 to vector<16x1xf32>
    %740 = arith.addf %736, %739 : vector<16x1xf32>
    %741 = math.rsqrt %740 : vector<16x1xf32>
    %742 = vector.broadcast %741 : vector<16x1xf32> to vector<16x32xf32>
    %743 = arith.mulf %738, %742 : vector<16x32xf32>
    %744 = vector.broadcast %724 : vector<1x32xf32> to vector<16x32xf32>
    %745 = arith.mulf %743, %744 : vector<16x32xf32>
    %746 = vector.broadcast %725 : vector<1x32xf32> to vector<16x32xf32>
    %747 = arith.addf %745, %746 : vector<16x32xf32>
    %c672 = arith.constant 672 : index
    %c0_152 = arith.constant 0 : index
    %748 = vector.load %arg2[%c672, %c0_152] : memref<832x128xbf16, #tpu.memory_space<vmem>>, vector<32x64xbf16>
    %749 = arith.truncf %747 : vector<16x32xf32> to vector<16x32xbf16>
    %cst_153 = arith.constant dense<0.000000e+00> : vector<16x64xf32>
    %750 = tpu.matmul %749, %748, %cst_153 {dimension_numbers = #tpu.dot_dimension_numbers<[1], [0], [0], [1], [0, 0, 1, 1], [], []>} : vector<16x32xbf16>, vector<32x64xbf16>, vector<16x64xf32> -> vector<16x64xf32>
    %751 = vector.extract_strided_slice %567 {offsets = [8, 0], sizes = [1, 64], strides = [1, 1]} : vector<16x128xf32> to vector<1x64xf32>
    %752 = vector.broadcast %751 : vector<1x64xf32> to vector<16x64xf32>
    %753 = arith.addf %750, %752 : vector<16x64xf32>
    %cst_154 = arith.constant 0.000000e+00 : f32
    %754 = vector.broadcast %cst_154 : f32 to vector<16x64xf32>
    %755 = arith.maximumf %753, %754 : vector<16x64xf32>
    %c704 = arith.constant 704 : index
    %c0_155 = arith.constant 0 : index
    %756 = vector.load %arg2[%c704, %c0_155] : memref<832x128xbf16, #tpu.memory_space<vmem>>, vector<64x32xbf16>
    %757 = arith.truncf %755 : vector<16x64xf32> to vector<16x64xbf16>
    %cst_156 = arith.constant dense<0.000000e+00> : vector<16x32xf32>
    %758 = tpu.matmul %757, %756, %cst_156 {dimension_numbers = #tpu.dot_dimension_numbers<[1], [0], [0], [1], [0, 0, 1, 1], [], []>} : vector<16x64xbf16>, vector<64x32xbf16>, vector<16x32xf32> -> vector<16x32xf32>
    %759 = vector.extract_strided_slice %567 {offsets = [9, 0], sizes = [1, 32], strides = [1, 1]} : vector<16x128xf32> to vector<1x32xf32>
    %760 = vector.broadcast %759 : vector<1x32xf32> to vector<16x32xf32>
    %761 = arith.addf %758, %760 : vector<16x32xf32>
    %762 = arith.addf %747, %761 : vector<16x32xf32>
    %763 = vector.extract_strided_slice %567 {offsets = [10, 0], sizes = [1, 32], strides = [1, 1]} : vector<16x128xf32> to vector<1x32xf32>
    %764 = vector.extract_strided_slice %567 {offsets = [11, 0], sizes = [1, 32], strides = [1, 1]} : vector<16x128xf32> to vector<1x32xf32>
    %cst_157 = arith.constant dense<0.000000e+00> : vector<16xf32>
    %765 = vector.multi_reduction <add>, %762, %cst_157 [1] : vector<16x32xf32> to vector<16xf32>
    %766 = vector.shape_cast %765 : vector<16xf32> to vector<16x1xf32>
    %cst_158 = arith.constant 3.200000e+01 : f32
    %767 = vector.broadcast %cst_158 : f32 to vector<16x1xf32>
    %768 = arith.divf %766, %767 : vector<16x1xf32>
    %769 = vector.broadcast %768 : vector<16x1xf32> to vector<16x32xf32>
    %770 = arith.subf %762, %769 : vector<16x32xf32>
    %771 = arith.mulf %770, %770 : vector<16x32xf32>
    %cst_159 = arith.constant dense<0.000000e+00> : vector<16xf32>
    %772 = vector.multi_reduction <add>, %771, %cst_159 [1] : vector<16x32xf32> to vector<16xf32>
    %773 = vector.shape_cast %772 : vector<16xf32> to vector<16x1xf32>
    %cst_160 = arith.constant 3.200000e+01 : f32
    %774 = vector.broadcast %cst_160 : f32 to vector<16x1xf32>
    %775 = arith.divf %773, %774 : vector<16x1xf32>
    %776 = vector.broadcast %768 : vector<16x1xf32> to vector<16x32xf32>
    %777 = arith.subf %762, %776 : vector<16x32xf32>
    %cst_161 = arith.constant 9.99999974E-6 : f32
    %778 = vector.broadcast %cst_161 : f32 to vector<16x1xf32>
    %779 = arith.addf %775, %778 : vector<16x1xf32>
    %780 = math.rsqrt %779 : vector<16x1xf32>
    %781 = vector.broadcast %780 : vector<16x1xf32> to vector<16x32xf32>
    %782 = arith.mulf %777, %781 : vector<16x32xf32>
    %783 = vector.broadcast %763 : vector<1x32xf32> to vector<16x32xf32>
    %784 = arith.mulf %782, %783 : vector<16x32xf32>
    %785 = vector.broadcast %764 : vector<1x32xf32> to vector<16x32xf32>
    %786 = arith.addf %784, %785 : vector<16x32xf32>
    %c800 = arith.constant 800 : index
    %c0_162 = arith.constant 0 : index
    %787 = vector.load %arg2[%c800, %c0_162] : memref<832x128xbf16, #tpu.memory_space<vmem>>, vector<32x128xbf16>
    %788 = arith.truncf %786 : vector<16x32xf32> to vector<16x32xbf16>
    %cst_163 = arith.constant dense<0.000000e+00> : vector<16x128xf32>
    %789 = tpu.matmul %788, %787, %cst_163 {dimension_numbers = #tpu.dot_dimension_numbers<[1], [0], [0], [1], [0, 0, 1, 1], [], []>} : vector<16x32xbf16>, vector<32x128xbf16>, vector<16x128xf32> -> vector<16x128xf32>
    %790 = vector.extract_strided_slice %30 {offsets = [2, 0], sizes = [1, 128], strides = [1, 1]} : vector<8x128xf32> to vector<1x128xf32>
    %791 = vector.broadcast %790 : vector<1x128xf32> to vector<16x128xf32>
    %792 = arith.addf %789, %791 : vector<16x128xf32>
    %c0_164 = arith.constant 0 : index
    %c0_165 = arith.constant 0 : index
    %793 = vector.load %arg4[%c0_164, %c0_165] : memref<16x128xf32, #tpu.memory_space<vmem>>, vector<16x128xf32>
    tpu.vector_store %arg4[%c0_164, %c0_165], %792 {strides = array<i32>} : memref<16x128xf32, #tpu.memory_space<vmem>>, vector<16x128xf32>,
    return
  }
}

</mosaic_0001>

<bundles_post_ra>
// kernel: tile.14
= control target key start
LH: loop header
LB: loop body
LE: loop exit
PB: predicated region body
PF: predicated region fallthrough
CT: control target
= control target key end

     0   :  { %vm7_vm0 = vcmask 64512   ;;  %vm13_vm1 = vcmask 130112   ;;  %s39_s0 = inlined_call_operand.vmem [shape: s32[2,8], index: 0, kind: input, shape index: {}]   ;;  %s40_s1 = inlined_call_operand.vmem [shape: s32[16], index: 1, kind: output, shape index: {}]  }
   0x1   :  { %v4_v0 = vld [vmem:[%s39_s0] sm:$0x3]  ;;  %s22_s0 = smov 8  }
   0x2   :  { %5 = vst [vmem:[#allocation1] sm:$0x3] %v4_v0 }
   0x9   :  { %v10_v1 = vld [vmem:[#allocation1 + $0x1] sm:$0x1]   ;;  %v6_v2 = vld [vmem:[#allocation1] sm:$0x1]  }
   0xa   :  { %11 = vrot.lane.b32.xlu0 %v10_v1, %s22_s0  ;;  %8 = vst.msk [vmem:[#allocation0] sm:$0x1] %vm7_vm0, %v6_v2  }
  0x7c   :  { %v12_v3 = vpop.permute.xlu0 %11  }
  0x7d   :  { %14 = vst.msk [vmem:[#allocation0] sm:$0x1] %vm13_vm1, %v12_v3  }
  0x84   :  { %v18_v4 = vld [vmem:[#allocation0] sm:$0x1] }
  0x85   :  { %20 = vst [vmem:[%s40_s1] sm:$0x1] %v18_v4 }

// kernel: full_transformer_forward.1
= control target key start
LH: loop header
LB: loop body
LE: loop exit
PB: predicated region body
PF: predicated region fallthrough
CT: control target
= control target key end

     0   :  { %9 = vsyncpa [#allocation3], 0  ;;  %s5689_s15 = smov [#allocation2]   ;;  %s6746_s0 = inlined_call_operand.vmem [shape: s32[32,2], index: 0, kind: input, shape index: {}]   ;;  %s6747_s1 = inlined_call_operand.vmem [shape: f32[3,16,16], index: 1, kind: input, shape index: {}]   ;;  %s6748_s2 = inlined_call_operand.vmem [shape: bf16[832,128], index: 2, kind: input, shape index: {}]   ;;  %s6749_s3 = inlined_call_operand.hbm [shape: f32[136,128], index: 3, kind: input, shape index: {}]   ;;  %s6750_s4 = inlined_call_operand.vmem [shape: f32[16,128], index: 4, kind: output, shape index: {}]  }
   0x1   :  { %s21_s16 = sshll.u32 %s5689_s15, 4  ;;  %s5665_s19 = scalar_lea.hbm %s6749_s3, 2176  ;;  %s22_s16 = int_to_ptr.vmem [resolvable:$true] %s21_s16 }
   0x2   :  { %p5666_p0 = scmp.ne.s32.totalorder %s6749_s3, %s5665_s19  ;;  %p5669_p1 = scmp.lt.u32.totalorder %s5665_s19, %s6749_s3 }
   0x4   :  { %p5671_p2 = pnand %p5669_p1, %p5666_p0 }
   0x6   :  { %5674 = shalt.err (!%p5671_p2)
}
   0x7   :  { %s5675_s24 = scalar_lea.vmem %s22_s16, 2176  ;;  %p5680_p4 = scmp.lt.s32.totalorder %s22_s16, %s22_s16 }
   0x8   :  { %p5676_p3 = scmp.ne.s32.totalorder %s22_s16, %s5675_s24  ;;  %p5681_p5 = scmp.lt.s32.totalorder %s5675_s24, %s5675_s24 }
   0xa   :  { %p5682_p6 = por %p5681_p5, %p5680_p4 }
   0xc   :  { %p5683_p7 = pnand %p5682_p6, %p5676_p3 }
   0xe   :  { %5686 = shalt.err (!%p5683_p7)
}
   0xf   :  { %s5690_s25 = smov 128   ;;  %s5691_s26 = smov 8  }
  0x10   :  { %27 = dma.hbm_to_vmem [thread:$0]  %s6749_s3, 2176, %s22_s16, [#allocation3], %s5690_s25, %s5690_s25, %s5691_s26  }
  0x11   :  { %5687 = dma.done.wait [#allocation3], 2176  }
  0x12   :  { %5688 = vsyncadd [#allocation3], 4294965120  ;;  %v5692_v0 = vmov 1   ;;  %v54_v1 = vld [vmem:[%s6746_s0] sm:$0xff]  ;;  %v5742_v2 = vld [vmem:[%s6746_s0 + $0x10] sm:$0xff]  ;;  %v5693_v8 = vmov 0.0   ;;  %v32_v13 = vlaneseq }
  0x13   :  { %5360 = vset.pattern.permute.xlu0 %v5692_v0  ;;  %5361 = vset.pattern.permute.xlu1 %v5692_v0  ;;  %v55_v3 = vld [vmem:[%s6746_s0 + $0x8] sm:$0xff]  ;;  %v115_v4 = vld [vmem:[#allocation2 + $0x40] sm:$0xff]  ;;  %v5751_v6 = vld [vmem:[%s6746_s0 + $0x18] sm:$0xff]  ;;  %v5694_v12 = vmov 0   ;;  %vm117_vm0 = vcmask 130048   ;;  %vm215_vm5 = vcmask 523264  }
  0x14   :  { %92 = vperm.xlu0 %5360, %v54_v1   ;;  %98 = vperm.xlu1 %5361, %v5742_v2   ;;  %v116_v5 = vld [vmem:[#allocation2 + $0x48] sm:$0xff]  ;;  %v83_v9 = vld [vmem:[#allocation2] sm:$0xff]  ;;  %v5756_v14 = vand.u32 127, %v32_v13  ;;  %v85_v18 = vld [vmem:[#allocation2 + $0x10] sm:$0xff]  ;;  %vm313_vm8 = vcmask 261120   ;;  %vm5695_vm9 = vmmov 0  }
  0x15   :  { %v5326_v7 = vpack.c.bf16 %v116_v5, %v115_v4  ;;  %4930 = vmatprep.subr.bf16.mxu1 %v5693_v8  ;;  %v84_v10 = vld [vmem:[#allocation2 + $0x8] sm:$0xff]  ;;  %v86_v19 = vld [vmem:[#allocation2 + $0x18] sm:$0xff]  ;;  %v87_v25 = vld [vmem:[#allocation2 + $0x20] sm:$0xff]  ;;  %4934 = vmatprep.mubr.msk.bf16.mxu1 %vm5695_vm9, %v5693_v8  ;;  %v5796_v60 = vshrl.u32 %v32_v13, 7  ;;  %s5696_s13 = smov 96   ;;  %s5697_s18 = smov 64  }
  0x16   :  { %v5330_v11 = vpack.c.bf16 %v84_v10, %v83_v9  ;;  %v5334_v23 = vpack.c.bf16 %v86_v19, %v85_v18  ;;  %v88_v26 = vld [vmem:[#allocation2 + $0x28] sm:$0xff]  ;;  %v89_v30 = vld [vmem:[#allocation2 + $0x30] sm:$0xff]  ;;  %v90_v31 = vld [vmem:[#allocation2 + $0x38] sm:$0xff]  ;;  %vm39_vm12 = vcmp.ge.s32.totalorder %v5756_v14, 8  ;;  %vm40_vm13 = vcmp.lt.s32.totalorder %v5756_v14, 16 }
  0x17   :  { %5327 = vmatprep.subr.bf16.mxu0 %v5326_v7  ;;  %v5338_v28 = vpack.c.bf16 %v88_v26, %v87_v25  ;;  %v5342_v33 = vpack.c.bf16 %v90_v31, %v89_v30  ;;  %v5365_v50 = vld [vmem:[%s6748_s2] sm:$0xff]   ;;  %v5366_v51 = vld [vmem:[%s6748_s2 + $0x8] sm:$0xff]   ;;  %v5802_v63 = vsub.s32 0, %v5796_v60  ;;  %vm44_vm14 = vcmp.ge.s32.totalorder %v5756_v14, 16 }
  0x18   :  { %95 = vperm.xlu0 %5360, %v55_v3   ;;  %101 = vperm.xlu1 %5361, %v5751_v6   ;;  %vm45_vm15 = vcmp.lt.s32.totalorder %v5756_v14, 24 }
  0x19   :  { %5329 = vmatpush3.bf16.msra.mxu0 %v5326_v7  ;;  %4931 = vmatpush3.bf16.msra.mxu1 %v5365_v50 }
  0x1a   :  { %5331 = vmatprep.subr.bf16.mxu0 %v5330_v11  ;;  %4932 = vmatprep.subr.bf16.mxu1 %v5693_v8 }
  0x1c   :  { %5362 = vset.pattern.permute.xlu0 %v5694_v12  ;;  %5363 = vset.pattern.permute.xlu1 %v5694_v12 }
  0x1d   :  { %60 = vperm.xlu0 %5362, %v54_v1   ;;  %63 = vperm.xlu1 %5363, %v55_v3   ;;  %v5806_v1 = vsub.s32 1, %v5796_v60 }
  0x1e   :  { %4933 = vmatpush3.bf16.msra.mxu1 %v5366_v51 }
  0x1f   :  { %4938 = vmatprep.subr.bf16.mxu1 %v5693_v8 }
  0x21   :  { %5364 = vset.pattern.permute.xlu0 %v5692_v0  ;;  %v58_v0 = vld [vmem:[#allocation2 + $0x50] sm:$0xff] }
  0x93   :  { %v93_v15 = vpop.permute.xlu0 %92  ;;  %v99_v16 = vpop.permute.xlu1 %98 }
  0x94   :  { %vm103_vm1 = vcmp.eq.s32.totalorder %v93_v15, %v5756_v14  ;;  %vm105_vm2 = vcmp.eq.s32.totalorder %v99_v16, %v5756_v14 }
  0x95   :  { %v4594_v17 = vsel %vm103_vm1, 1.0, %v5693_v8  ;;  %v4596_v22 = vsel %vm105_vm2, 1.0, %v5693_v8  ;;  %vm49_vm1 = vcmp.ge.s32.totalorder %v5756_v14, 24  ;;  %vm50_vm2 = vcmp.lt.s32.totalorder %v5756_v14, 32 }
  0x96   :  { %4902 = vmatprep.mubr.msk.f32.mxu0 %vm117_vm0, %v4594_v17  ;;  %v5835_v17 = vld [vmem:[#allocation2 + $0x58] sm:$0xff] }
  0x97   :  { %v96_v20 = vpop.permute.xlu0 %95  ;;  %v102_v21 = vpop.permute.xlu1 %101  ;;  %v398_v18 = vrot.slane %v5835_v17, %v5802_v63 }
  0x98   :  { %vm104_vm3 = vcmp.eq.s32.totalorder %v96_v20, %v5756_v14  ;;  %vm106_vm4 = vcmp.eq.s32.totalorder %v102_v21, %v5756_v14 }
  0x99   :  { %v4595_v24 = vsel %vm104_vm3, 1.0, %v5693_v8  ;;  %v4597_v27 = vsel %vm106_vm4, 1.0, %v5693_v8  ;;  %vm41_vm3 = vmand %vm39_vm12, %vm40_vm13 }
  0x9a   :  { %4903 = vmatmul.mubr.msk.f32.vlgmr.msra.gmra.mrb[0].mxu0 %vm117_vm0, %v4595_v24  ;;  %vm46_vm4 = vmand %vm44_vm14, %vm45_vm15 }
  0x9b   :  { %5333 = vmatpush3.bf16.msra.mxu0 %v5330_v11  ;;  %4905 = vmatprep.mubr.msk.f32.mxu0 %vm117_vm0, %v4596_v22  ;;  %v5851_v24 = vsel %vm46_vm4, 1.0, %v5693_v8 }
  0x9c   :  { %5335 = vmatprep.subr.bf16.mxu0 %v5334_v23  ;;  %v61_v29 = vpop.permute.xlu0 %60  ;;  %v64_v34 = vpop.permute.xlu1 %63 }
  0x9d   :  { %vm71_vm6 = vcmp.eq.s32.totalorder %v61_v29, %v5756_v14  ;;  %vm72_vm7 = vcmp.eq.s32.totalorder %v64_v34, %v5756_v14 }
  0x9e   :  { %4906 = vmatmul.mubr.msk.f32.gmra.mrb[2].mxu0 %vm117_vm0, %v4597_v27  ;;  %v4590_v32 = vsel %vm71_vm6, 1.0, %v5693_v8  ;;  %v4591_v35 = vsel %vm72_vm7, 1.0, %v5693_v8  ;;  %vm35_vm6 = vcmp.lt.s32.totalorder %v5756_v14, 8  ;;  %vm51_vm7 = vmand %vm49_vm1, %vm50_vm2 }
  0x9f   :  { %5337 = vmatpush3.bf16.msra.mxu0 %v5334_v23  ;;  %4924 = vmatprep.mubr.msk.f32.mxu0 %vm215_vm5, %v4590_v32  ;;  %v5845_v22 = vsel %vm35_vm6, 1.0, %v5693_v8  ;;  %v5848_v23 = vsel %vm41_vm3, 1.0, %v5693_v8  ;;  %v5854_v25 = vsel %vm51_vm7, 1.0, %v5693_v8 }
  0xa0   :  { %5339 = vmatprep.subr.bf16.mxu0 %v5338_v28 }
  0xa3   :  { %5341 = vmatpush3.bf16.msra.mxu0 %v5338_v28 }
  0xa4   :  { %5343 = vmatprep.subr.bf16.mxu0 %v5342_v33 }
  0xa7   :  { %5345 = vmatpush3.bf16.msra.mxu0 %v5342_v33 }
  0xa8   :  { %4950 = vmatprep.subr.bf16.mxu0 %v5693_v8 }
  0xaa   :  { %4925 = vmatmul.mubr.msk.f32.vlgmr.msra.gmra.mrb[0].mxu0 %vm215_vm5, %v4591_v35 }
 0x17d   :  { %v4926_v36 = vpop.f32.mrb[0].mxu0 }
 0x17e   :  { %v294_v37 = vpop.f32.mrb[1].mxu0  ;;  %v317_v38 = vsel %vm313_vm8, %v4926_v36, 0.0 }
 0x17f   :  { %318 = vadd.xlane.f32.xlu0 %v317_v38  ;;  %v314_v39 = vsel %vm313_vm8, %v294_v37, 0.0 }
 0x180   :  { %315 = vadd.xlane.f32.xlu1 %v314_v39 }
 0x20c   :  { %v319_v40 = vpop.xlane.xlu0 %318 }
 0x20d   :  { %v328_v41 = vmul.f32 0.03125, %v319_v40  ;;  %v316_v42 = vpop.xlane.xlu1 %315 }
 0x20e   :  { %v327_v43 = vmul.f32 0.03125, %v316_v42 }
 0x20f   :  { %v332_v44 = vsub.f32 %v4926_v36, %v328_v41 }
 0x210   :  { %v331_v45 = vsub.f32 %v294_v37, %v327_v43  ;;  %v5885_v43 = vld [vmem:[%s6747_s1] sm:$0xff] }
 0x211   :  { %v336_v46 = vmul.f32 %v332_v44, %v332_v44 }
 0x212   :  { %v335_v47 = vmul.f32 %v331_v45, %v331_v45 }
 0x213   :  { %v342_v48 = vsel %vm313_vm8, %v336_v46, 0.0  ;;  %v5890_v46 = vld [vmem:[%s6747_s1 + $0x8] sm:$0xff] }
 0x214   :  { %343 = vadd.xlane.f32.xlu1 %v342_v48  ;;  %v339_v49 = vsel %vm313_vm8, %v335_v47, 0.0 }
 0x215   :  { %340 = vadd.xlane.f32.xlu0 %v339_v49 }
 0x225   :  { %66 = vperm.xlu1 %5363, %v5742_v2   ;;  %v5811_v2 = vrot.slane %v58_v0, %v5802_v63 }
 0x229   :  { %69 = vperm.xlu1 %5363, %v5751_v6   ;;  %v5814_v6 = vrot.slane %v58_v0, %v5806_v1 }
 0x2a1   :  { %v344_v52 = vpop.xlane.xlu1 %343 }
 0x2a2   :  { %v352_v53 = vmul.f32 0.03125, %v344_v52  ;;  %v341_v54 = vpop.xlane.xlu0 %340 }
 0x2a3   :  { %v351_v55 = vmul.f32 0.03125, %v341_v54 }
 0x2a4   :  { %v356_v56 = vadd.f32 1e-05, %v352_v53 }
 0x2a5   :  { %v355_v57 = vadd.f32 1e-05, %v351_v55  ;;  %v67_v58 = vpop.permute.xlu1 %66 }
 0x2a6   :  { %5417 = vrsqrt.f32 %v356_v56  ;;  %vm73_vm10 = vcmp.eq.s32.totalorder %v67_v58, %v5756_v14 }
 0x2a7   :  { %5419 = vrsqrt.f32 %v355_v57  ;;  %v4592_v59 = vsel %vm73_vm10, 1.0, %v5693_v8 }
 0x2a8   :  { %4927 = vmatprep.mubr.msk.f32.mxu0 %vm215_vm5, %v4592_v59 }
 0x2a9   :  { %v70_v61 = vpop.permute.xlu1 %69 }
 0x2aa   :  { %vm74_vm11 = vcmp.eq.s32.totalorder %v70_v61, %v5756_v14 }
 0x2ab   :  { %v4593_v62 = vsel %vm74_vm11, 1.0, %v5693_v8 }
 0x2ac   :  { %4928 = vmatmul.mubr.msk.f32.gmra.mrb[2].mxu0 %vm215_vm5, %v4593_v62 }
 0x2ad   :  { %4952 = vmatprep.mubr.msk.bf16.mxu0 %vm5695_vm9, %v5693_v8 }
 0x2b0   :  { %v5418_v3 = vpop.eup %5417 }
 0x2b1   :  { %v5420_v4 = vpop.eup %5419  ;;  %v364_v5 = vmul.f32 %v5418_v3, %v332_v44 }
 0x2b2   :  { %v363_v7 = vmul.f32 %v5420_v4, %v331_v45 }
 0x2b3   :  { %v372_v9 = vmul.f32 %v5811_v2, %v364_v5 }
 0x2b4   :  { %v371_v10 = vmul.f32 %v5811_v2, %v363_v7 }
 0x2b5   :  { %v5819_v11 = vadd.f32 %v5814_v6, %v372_v9 }
 0x2b6   :  { %v5822_v12 = vadd.f32 %v5814_v6, %v371_v10 }
 0x2b8   :  { %v394_v13 = vpack.c.bf16 %v5819_v11, %v5822_v12 }
 0x2ba   :  { %4935 = vmatmul.mubr.msk.bf16.vlgmr.msra.gmra.mrb[0].mxu1 %vm313_vm8, %v394_v13 }
 0x2bb   :  { %4940 = vmatprep.mubr.msk.bf16.mxu1 %vm5695_vm9, %v5693_v8 }
 0x37f   :  { %v5829_v15 = vpop.f32.mrb[2].mxu0 }
 0x380   :  { %v5831_v16 = vpop.f32.mrb[3].mxu0 }
 0x38d   :  { %v448_v19 = vpop.f32.mrb[0].mxu1 }
 0x38e   :  { %v449_v20 = vadd.f32 %v448_v19, %v398_v18  ;;  %v4936_v21 = vpop.f32.mrb[1].mxu1 }
 0x38f   :  { %v451_v26 = vpop.f32.mrb[2].mxu1 }
 0x390   :  { %v4937_v27 = vpop.f32.mrb[3].mxu1  ;;  %v452_v28 = vadd.f32 %v451_v26, %v398_v18  ;;  %v456_v14 = vmul.f32 %v5845_v22, %v449_v20  ;;  %v509_v29 = vmul.f32 %v5848_v23, %v449_v20  ;;  %v556_v30 = vmul.f32 %v5851_v24, %v449_v20 }
 0x391   :  { %v603_v31 = vmul.f32 %v5854_v25, %v449_v20 }
 0x392   :  { %v457_v32 = vmul.f32 %v5845_v22, %v452_v28  ;;  %v510_v33 = vmul.f32 %v5848_v23, %v452_v28  ;;  %v557_v34 = vmul.f32 %v5851_v24, %v452_v28  ;;  %v604_v35 = vmul.f32 %v5854_v25, %v452_v28 }
 0x393   :  { %v5864_v36 = vpack.c.bf16 %v452_v28, %v449_v20 }
 0x394   :  { %v558_v37 = vpack.c.bf16 %v557_v34, %v556_v30  ;;  %v458_v38 = vpack.c.bf16 %v457_v32, %v456_v14  ;;  %v511_v39 = vpack.c.bf16 %v510_v33, %v509_v29  ;;  %v605_v40 = vpack.c.bf16 %v604_v35, %v603_v31 }
 0x395   :  { %460 = vrot.lane.b32.xlu0 %v5864_v36, %s5696_s13 }
 0x407   :  { %v461_v41 = vpop.permute.xlu0 %460 }
 0x408   :  { %v466_v42 = vsel %vm313_vm8, %v461_v41, 0 }
 0x409   :  { %4939 = vmatpush3.bf16.xpose.msra.mxu1 %v466_v42  ;;  %4951 = vmatpush3.bf16.xpose.msra.mxu0 %v466_v42 }
 0x40a   :  { %4944 = vmatprep.subr.bf16.mxu1 %v5693_v8 }
 0x410   :  { %4941 = vmatmul.mubr.msk.bf16.vlgmr.msra.gmra.mrb[4].mxu1 %vm313_vm8, %v458_v38  ;;  %4953 = vmatmul.mubr.msk.bf16.vlgmr.msra.gmra.mrb[4].mxu0 %vm313_vm8, %v558_v37 }
 0x411   :  { %4945 = vmatpush3.bf16.xpose.msra.mxu1 %v466_v42  ;;  %4946 = vmatprep.mubr.msk.bf16.mxu1 %vm5695_vm9, %v5693_v8 }
 0x412   :  { %4956 = vmatprep.subr.bf16.mxu1 %v5693_v8 }
 0x418   :  { %4947 = vmatmul.mubr.msk.bf16.vlgmr.msra.gmra.mrb[8].mxu1 %vm313_vm8, %v511_v39 }
 0x419   :  { %4957 = vmatpush3.bf16.xpose.msra.mxu1 %v466_v42  ;;  %4958 = vmatprep.mubr.msk.bf16.mxu1 %vm5695_vm9, %v5693_v8 }
 0x41a   :  { %4972 = vmatprep.subr.bf16.mxu1 %v5693_v8 }
 0x420   :  { %4959 = vmatmul.mubr.msk.bf16.vlgmr.msra.gmra.mrb[12].mxu1 %vm313_vm8, %v605_v40 }
 0x421   :  { %4976 = vmatprep.mubr.msk.bf16.mxu1 %vm5695_vm9, %v5693_v8 }
 0x4e3   :  { %v502_v44 = vpop.f32.mrb[4].mxu1  ;;  %v596_v45 = vpop.f32.mrb[4].mxu0 }
 0x4e4   :  { %v503_v47 = vadd.f32 %v502_v44, %v5885_v43  ;;  %v4942_v48 = vpop.f32.mrb[5].mxu1  ;;  %v4954_v49 = vpop.f32.mrb[5].mxu0  ;;  %v597_v56 = vadd.f32 %v596_v45, %v5885_v43 }
 0x4e5   :  { %v505_v50 = vpop.f32.mrb[6].mxu1  ;;  %v599_v51 = vpop.f32.mrb[6].mxu0 }
 0x4e6   :  { %v506_v52 = vadd.f32 %v505_v50, %v5890_v46  ;;  %v4943_v53 = vpop.f32.mrb[7].mxu1  ;;  %v4955_v54 = vpop.f32.mrb[7].mxu0  ;;  %v650_v55 = vsel %vm117_vm0, %v503_v47, -inf  ;;  %v662_v62 = vsel %vm117_vm0, %v597_v56, -inf  ;;  %v600_v7 = vadd.f32 %v599_v51, %v5890_v46 }
 0x4e7   :  { %651 = vmax.xlane.f32.xlu0 %v650_v55 }
 0x4e8   :  { %v653_v57 = vsel %vm117_vm0, %v506_v52, -inf  ;;  %v665_v27 = vsel %vm117_vm0, %v600_v7, -inf }
 0x4e9   :  { %654 = vmax.xlane.f32.xlu1 %v653_v57 }
 0x4eb   :  { %v549_v58 = vpop.f32.mrb[8].mxu1 }
 0x4ec   :  { %v550_v59 = vadd.f32 %v549_v58, %v5885_v43  ;;  %v4948_v61 = vpop.f32.mrb[9].mxu1 }
 0x4ed   :  { %v552_v0 = vpop.f32.mrb[10].mxu1  ;;  %663 = vmax.xlane.f32.xlu1 %v662_v62 }
 0x4ee   :  { %v553_v3 = vadd.f32 %v552_v0, %v5890_v46  ;;  %v4949_v4 = vpop.f32.mrb[11].mxu1  ;;  %v656_v5 = vsel %vm117_vm0, %v550_v59, -inf }
 0x4ef   :  { %657 = vmax.xlane.f32.xlu0 %v656_v5 }
 0x4f0   :  { %v659_v9 = vsel %vm117_vm0, %v553_v3, -inf }
 0x4f3   :  { %660 = vmax.xlane.f32.xlu0 %v659_v9  ;;  %v643_v10 = vpop.f32.mrb[12].mxu1 }
 0x4f4   :  { %v644_v13 = vadd.f32 %v643_v10, %v5885_v43  ;;  %v4960_v18 = vpop.f32.mrb[13].mxu1 }
 0x4f5   :  { %v646_v19 = vpop.f32.mrb[14].mxu1 }
 0x4f6   :  { %v647_v20 = vadd.f32 %v646_v19, %v5890_v46  ;;  %v4961_v21 = vpop.f32.mrb[15].mxu1  ;;  %v668_v26 = vsel %vm117_vm0, %v644_v13, -inf }
 0x4f7   :  { %669 = vmax.xlane.f32.xlu1 %v668_v26  ;;  %666 = vmax.xlane.f32.xlu0 %v665_v27 }
 0x4f8   :  { %v671_v28 = vsel %vm117_vm0, %v647_v20, -inf }
 0x4fb   :  { %672 = vmax.xlane.f32.xlu0 %v671_v28 }
 0x574   :  { %v652_v14 = vpop.xlane.xlu0 %651 }
 0x575   :  { %v674_v29 = vsub.f32 %v503_v47, %v652_v14 }
 0x576   :  { %v655_v30 = vpop.xlane.xlu1 %654 }
 0x577   :  { %v682_v31 = vmul.f32 1.442695, %v674_v29  ;;  %v675_v32 = vsub.f32 %v506_v52, %v655_v30 }
 0x579   :  { %5421 = vpow2.f32 %v682_v31  ;;  %v684_v33 = vmul.f32 1.442695, %v675_v32 }
 0x57a   :  { %v664_v34 = vpop.xlane.xlu1 %663 }
 0x57b   :  { %5423 = vpow2.f32 %v684_v33  ;;  %v678_v35 = vsub.f32 %v597_v56, %v664_v34 }
 0x57c   :  { %v658_v37 = vpop.xlane.xlu0 %657 }
 0x57d   :  { %v690_v38 = vmul.f32 1.442695, %v678_v35  ;;  %v676_v39 = vsub.f32 %v550_v59, %v658_v37 }
 0x57f   :  { %5425 = vpow2.f32 %v690_v38  ;;  %v686_v40 = vmul.f32 1.442695, %v676_v39 }
 0x580   :  { %v661_v41 = vpop.xlane.xlu0 %660 }
 0x581   :  { %5427 = vpow2.f32 %v686_v40  ;;  %v677_v42 = vsub.f32 %v553_v3, %v661_v41 }
 0x583   :  { %v5422_v44 = vpop.eup %5421  ;;  %v688_v45 = vmul.f32 1.442695, %v677_v42 }
 0x584   :  { %v667_v48 = vpop.xlane.xlu0 %666  ;;  %v670_v47 = vpop.xlane.xlu1 %669  ;;  %v698_v49 = vsel %vm117_vm0, %v5422_v44, 0.0 }
 0x585   :  { %v5424_v50 = vpop.eup %5423  ;;  %5429 = vpow2.f32 %v688_v45  ;;  %v679_v51 = vsub.f32 %v600_v7, %v667_v48  ;;  %v680_v52 = vsub.f32 %v644_v13, %v670_v47  ;;  %699 = vadd.xlane.f32.xlu1 %v698_v49 }
 0x586   :  { %v701_v53 = vsel %vm117_vm0, %v5424_v50, 0.0 }
 0x587   :  { %v692_v54 = vmul.f32 1.442695, %v679_v51  ;;  %v694_v55 = vmul.f32 1.442695, %v680_v52  ;;  %702 = vadd.xlane.f32.xlu0 %v701_v53  ;;  %v5367_v53 = vld [vmem:[%s6748_s2 + $0x10] sm:$0xff]  }
 0x588   :  { %v673_v56 = vpop.xlane.xlu0 %672  ;;  %4973 = vmatpush3.bf16.msra.mxu1 %v5367_v53  ;;  %v5372_v53 = vld [vmem:[%s6748_s2 + $0x38] sm:$0xff]  }
 0x589   :  { %v5426_v57 = vpop.eup %5425  ;;  %5431 = vpow2.f32 %v692_v54  ;;  %v681_v58 = vsub.f32 %v647_v20, %v673_v56  ;;  %4974 = vmatprep.subr.bf16.mxu1 %v5693_v8  ;;  %v5368_v54 = vld [vmem:[%s6748_s2 + $0x18] sm:$0xff]  }
 0x58a   :  { %5433 = vpow2.f32 %v694_v55  ;;  %v710_v59 = vsel %vm117_vm0, %v5426_v57, 0.0 }
 0x58b   :  { %v5428_v61 = vpop.eup %5427  ;;  %v696_v62 = vmul.f32 1.442695, %v681_v58  ;;  %711 = vadd.xlane.f32.xlu1 %v710_v59 }
 0x58c   :  { %v704_v0 = vsel %vm117_vm0, %v5428_v61, 0.0  ;;  %4975 = vmatpush3.bf16.msra.mxu1 %v5368_v54 }
 0x58d   :  { %5435 = vpow2.f32 %v696_v62  ;;  %4980 = vmatprep.subr.bf16.mxu1 %v5693_v8 }
 0x58f   :  { %v5430_v3 = vpop.eup %5429  ;;  %705 = vadd.xlane.f32.xlu1 %v704_v0 }
 0x590   :  { %v707_v4 = vsel %vm117_vm0, %v5430_v3, 0.0 }
 0x591   :  { %708 = vadd.xlane.f32.xlu0 %v707_v4 }
 0x593   :  { %v5432_v5 = vpop.eup %5431 }
 0x594   :  { %v5434_v7 = vpop.eup %5433  ;;  %v713_v9 = vsel %vm117_vm0, %v5432_v5, 0.0 }
 0x595   :  { %714 = vadd.xlane.f32.xlu0 %v713_v9  ;;  %v716_v10 = vsel %vm117_vm0, %v5434_v7, 0.0 }
 0x596   :  { %717 = vadd.xlane.f32.xlu1 %v716_v10 }
 0x597   :  { %v5436_v13 = vpop.eup %5435 }
 0x598   :  { %v719_v18 = vsel %vm117_vm0, %v5436_v13, 0.0 }
 0x599   :  { %720 = vadd.xlane.f32.xlu0 %v719_v18 }
 0x5a7   :  { %742 = vrot.lane.b32.xlu1 %v5864_v36, %s5697_s18 }
 0x612   :  { %v700_v19 = vpop.xlane.xlu1 %699 }
 0x613   :  { %5437 = vrcp.f32 %v700_v19 }
 0x614   :  { %v703_v20 = vpop.xlane.xlu0 %702 }
 0x615   :  { %5439 = vrcp.f32 %v703_v20 }
 0x618   :  { %v712_v21 = vpop.xlane.xlu1 %711 }
 0x61c   :  { %v706_v26 = vpop.xlane.xlu1 %705 }
 0x61d   :  { %v5438_v27 = vpop.eup %5437  ;;  %5441 = vrcp.f32 %v706_v26 }
 0x61e   :  { %v709_v28 = vpop.xlane.xlu0 %708  ;;  %v730_v29 = vmul.f32 %v5438_v27, %v5422_v44 }
 0x61f   :  { %v5440_v14 = vpop.eup %5439  ;;  %5443 = vrcp.f32 %v709_v28 }
 0x620   :  { %v731_v30 = vmul.f32 %v5440_v14, %v5424_v50  ;;  %5445 = vrcp.f32 %v712_v21 }
 0x622   :  { %v715_v31 = vpop.xlane.xlu0 %714  ;;  %v738_v32 = vpack.c.bf16 %v731_v30, %v730_v29  ;;  %v844_v29 = vrot.slane %v5835_v17, %v5806_v1 }
 0x623   :  { %5447 = vrcp.f32 %v715_v31  ;;  %v718_v33 = vpop.xlane.xlu1 %717 }
 0x624   :  { %4964 = vmatprep.mubr.msk.bf16.mxu0 %vm117_vm0, %v738_v32  ;;  %5449 = vrcp.f32 %v718_v33 }
 0x626   :  { %v721_v36 = vpop.xlane.xlu0 %720 }
 0x627   :  { %v5442_v34 = vpop.eup %5441  ;;  %5451 = vrcp.f32 %v721_v36  ;;  %v743_v35 = vpop.permute.xlu1 %742 }
 0x628   :  { %4962 = vmatprep.subr.bf16.mxu0 %v743_v35  ;;  %v732_v38 = vmul.f32 %v5442_v34, %v5428_v61 }
 0x629   :  { %v5444_v37 = vpop.eup %5443  ;;  %4963 = vmatpush3.bf16.msra.mxu0 %v743_v35 }
 0x62a   :  { %v733_v39 = vmul.f32 %v5444_v37, %v5430_v3  ;;  %4988 = vmatprep.subr.bf16.mxu0 %v5693_v8  ;;  %v5446_v40 = vpop.eup %5445 }
 0x62b   :  { %v734_v44 = vmul.f32 %v5446_v40, %v5426_v57 }
 0x62c   :  { %v739_v41 = vpack.c.bf16 %v733_v39, %v732_v38 }
 0x62d   :  { %v5448_v42 = vpop.eup %5447 }
 0x62e   :  { %4965 = vmatmul.mubr.msk.bf16.vlgmr.msra.gmra.mrb[8].mxu0 %vm117_vm0, %v739_v41  ;;  %v735_v45 = vmul.f32 %v5448_v42, %v5432_v5  ;;  %v5450_v48 = vpop.eup %5449 }
 0x62f   :  { %v736_v50 = vmul.f32 %v5450_v48, %v5434_v7 }
 0x630   :  { %v740_v47 = vpack.c.bf16 %v735_v45, %v734_v44 }
 0x631   :  { %v5452_v49 = vpop.eup %5451 }
 0x632   :  { %4968 = vmatprep.mubr.msk.bf16.mxu0 %vm117_vm0, %v740_v47  ;;  %v737_v51 = vmul.f32 %v5452_v49, %v5436_v13 }
 0x634   :  { %v741_v52 = vpack.c.bf16 %v737_v51, %v736_v50  ;;  %v5370_v51 = vld [vmem:[%s6748_s2 + $0x28] sm:$0xff]  }
 0x636   :  { %4969 = vmatmul.mubr.msk.bf16.gmra.mrb[12].mxu0 %vm117_vm0, %v741_v52  ;;  %v5371_v52 = vld [vmem:[%s6748_s2 + $0x30] sm:$0xff]  }
 0x637   :  { %4996 = vmatprep.mubr.msk.bf16.mxu0 %vm5695_vm9, %v5693_v8  ;;  %4989 = vmatpush3.bf16.msra.mxu0 %v5371_v52 }
 0x638   :  { %4990 = vmatprep.subr.bf16.mxu0 %v5693_v8 }
 0x63b   :  { %4991 = vmatpush3.bf16.msra.mxu0 %v5372_v53 }
 0x63c   :  { %4992 = vmatprep.subr.bf16.mxu0 %v5693_v8 }
 0x701   :  { %v4966_v55 = vpop.f32.mrb[8].mxu0 }
 0x702   :  { %v824_v56 = vmul.f32 %v4966_v55, %v5848_v23  ;;  %v791_v57 = vpop.f32.mrb[9].mxu0 }
 0x703   :  { %v822_v58 = vmul.f32 %v5845_v22, %v791_v57  ;;  %v4967_v59 = vpop.f32.mrb[10].mxu0 }
 0x704   :  { %v825_v61 = vmul.f32 %v4967_v59, %v5848_v23  ;;  %v794_v62 = vpop.f32.mrb[11].mxu0 }
 0x705   :  { %v826_v0 = vadd.f32 %v824_v56, %v822_v58  ;;  %v823_v3 = vmul.f32 %v5845_v22, %v794_v62 }
 0x707   :  { %v827_v4 = vadd.f32 %v825_v61, %v823_v3  ;;  %v5969_v61 = vsub.s32 2, %v5796_v60 }
 0x709   :  { %v4970_v5 = vpop.f32.mrb[12].mxu0 }
 0x70a   :  { %v807_v7 = vpop.f32.mrb[13].mxu0  ;;  %v832_v18 = vmul.f32 %v4970_v5, %v5854_v25 }
 0x70b   :  { %v828_v9 = vmul.f32 %v5851_v24, %v807_v7  ;;  %v4971_v10 = vpop.f32.mrb[14].mxu0 }
 0x70c   :  { %v810_v13 = vpop.f32.mrb[15].mxu0  ;;  %v833_v26 = vmul.f32 %v4971_v10, %v5854_v25 }
 0x70d   :  { %v830_v19 = vadd.f32 %v828_v9, %v826_v0  ;;  %v829_v20 = vmul.f32 %v5851_v24, %v810_v13  ;;  %v932_v0 = vrot.slane %v5835_v17, %v5969_v61 }
 0x70f   :  { %v834_v21 = vadd.f32 %v832_v18, %v830_v19  ;;  %v831_v27 = vadd.f32 %v829_v20, %v827_v4  ;;  %v5974_v4 = vsub.s32 3, %v5796_v60 }
 0x711   :  { %v835_v28 = vadd.f32 %v833_v26, %v831_v27  ;;  %v938_v10 = vrot.slane %v5835_v17, %v5974_v4  ;;  %v5374_v26 = vld [vmem:[%s6748_s2 + $0x48] sm:$0xff]   ;;  %v5990_v27 = vsub.s32 4, %v5796_v60 }
 0x713   :  { %v840_v14 = vpack.c.bf16 %v835_v28, %v834_v21  ;;  %v5373_v21 = vld [vmem:[%s6748_s2 + $0x40] sm:$0xff]   ;;  %v949_v28 = vrot.slane %v5835_v17, %v5990_v27 }
 0x714   :  { %4993 = vmatpush3.bf16.msra.mxu0 %v5373_v21  ;;  %v6020_v21 = vsub.s32 7, %v5796_v60 }
 0x715   :  { %4977 = vmatmul.mubr.msk.bf16.vlgmr.msra.gmra.mrb[16].mxu1 %vm313_vm8, %v840_v14  ;;  %4994 = vmatprep.subr.bf16.mxu0 %v5693_v8 }
 0x716   :  { %4984 = vmatprep.mubr.msk.bf16.mxu1 %vm5695_vm9, %v5693_v8 }
 0x718   :  { %4995 = vmatpush3.bf16.msra.mxu0 %v5374_v26 }
 0x719   :  { %5008 = vmatprep.subr.bf16.mxu0 %v5693_v8 }
 0x7e8   :  { %v894_v30 = vpop.f32.mrb[16].mxu1 }
 0x7e9   :  { %v895_v31 = vadd.f32 %v894_v30, %v844_v29  ;;  %v4978_v32 = vpop.f32.mrb[17].mxu1 }
 0x7ea   :  { %v897_v33 = vpop.f32.mrb[18].mxu1 }
 0x7eb   :  { %v898_v36 = vadd.f32 %v897_v33, %v844_v29  ;;  %v4979_v34 = vpop.f32.mrb[19].mxu1  ;;  %v901_v35 = vadd.f32 %v895_v31, %v5822_v12 }
 0x7ed   :  { %v903_v37 = vsel %vm313_vm8, %v901_v35, 0.0  ;;  %v902_v38 = vadd.f32 %v898_v36, %v5819_v11  ;;  %v5369_v11 = vld [vmem:[%s6748_s2 + $0x20] sm:$0xff]  }
 0x7ee   :  { %904 = vadd.xlane.f32.xlu0 %v903_v37  ;;  %4981 = vmatpush3.bf16.msra.mxu1 %v5369_v11  ;;  %v5998_v37 = vsub.s32 5, %v5796_v60 }
 0x7ef   :  { %v906_v39 = vsel %vm313_vm8, %v902_v38, 0.0  ;;  %4982 = vmatprep.subr.bf16.mxu1 %v5693_v8 }
 0x7f2   :  { %907 = vadd.xlane.f32.xlu0 %v906_v39  ;;  %4983 = vmatpush3.bf16.msra.mxu1 %v5370_v51 }
 0x7f3   :  { %5000 = vmatprep.subr.bf16.mxu1 %v5693_v8 }
 0x87b   :  { %v905_v40 = vpop.xlane.xlu0 %904 }
 0x87c   :  { %v909_v41 = vmul.f32 0.03125, %v905_v40 }
 0x87e   :  { %v911_v42 = vsub.f32 %v901_v35, %v909_v41 }
 0x87f   :  { %v908_v44 = vpop.xlane.xlu0 %907 }
 0x880   :  { %v910_v45 = vmul.f32 0.03125, %v908_v44  ;;  %v913_v48 = vmul.f32 %v911_v42, %v911_v42 }
 0x882   :  { %v912_v47 = vsub.f32 %v902_v38, %v910_v45  ;;  %v915_v49 = vsel %vm313_vm8, %v913_v48, 0.0  ;;  %v1020_v38 = vrot.slane %v5835_v17, %v5998_v37 }
 0x883   :  { %916 = vadd.xlane.f32.xlu0 %v915_v49 }
 0x884   :  { %v914_v50 = vmul.f32 %v912_v47, %v912_v47 }
 0x886   :  { %v918_v12 = vsel %vm313_vm8, %v914_v50, 0.0 }
 0x887   :  { %919 = vadd.xlane.f32.xlu0 %v918_v12 }
 0x910   :  { %v917_v54 = vpop.xlane.xlu0 %916 }
 0x911   :  { %v921_v55 = vmul.f32 0.03125, %v917_v54 }
 0x913   :  { %v923_v56 = vadd.f32 1e-05, %v921_v55 }
 0x914   :  { %v920_v57 = vpop.xlane.xlu0 %919 }
 0x915   :  { %5453 = vrsqrt.f32 %v923_v56  ;;  %v922_v58 = vmul.f32 0.03125, %v920_v57 }
 0x917   :  { %v924_v59 = vadd.f32 1e-05, %v922_v58 }
 0x919   :  { %5455 = vrsqrt.f32 %v924_v59  ;;  %v5375_v59 = vld [vmem:[%s6748_s2 + $0x50] sm:$0xff]  }
 0x91f   :  { %v5454_v62 = vpop.eup %5453 }
 0x920   :  { %v927_v3 = vmul.f32 %v5454_v62, %v911_v42  ;;  %v5376_v62 = vld [vmem:[%s6748_s2 + $0x58] sm:$0xff]  }
 0x922   :  { %v933_v7 = vmul.f32 %v932_v0, %v927_v3 }
 0x923   :  { %v5456_v5 = vpop.eup %5455 }
 0x924   :  { %v928_v9 = vmul.f32 %v5456_v5, %v912_v47  ;;  %v939_v18 = vadd.f32 %v938_v10, %v933_v7 }
 0x926   :  { %v934_v13 = vmul.f32 %v932_v0, %v928_v9 }
 0x928   :  { %v940_v19 = vadd.f32 %v938_v10, %v934_v13  ;;  %v6015_v13 = vsub.s32 6, %v5796_v60  ;;  %v6033_v60 = vld [vmem:[#allocation2 + $0x60] sm:$0xff] }
 0x92a   :  { %v945_v20 = vpack.c.bf16 %v940_v19, %v939_v18 }
 0x92c   :  { %4985 = vmatmul.mubr.msk.bf16.vlgmr.msra.gmra.mrb[20].mxu1 %vm313_vm8, %v945_v20 }
 0x92d   :  { %5004 = vmatprep.mubr.msk.bf16.mxu1 %vm5695_vm9, %v5693_v8  ;;  %5001 = vmatpush3.bf16.msra.mxu1 %v5375_v59 }
 0x92e   :  { %5002 = vmatprep.subr.bf16.mxu1 %v5693_v8 }
 0x931   :  { %5003 = vmatpush3.bf16.msra.mxu1 %v5376_v62 }
 0x932   :  { %5014 = vmatprep.subr.bf16.mxu1 %v5693_v8 }
 0x9ff   :  { %v999_v14 = vpop.f32.mrb[20].mxu1 }
 0xa00   :  { %v1000_v29 = vadd.f32 %v999_v14, %v949_v28  ;;  %v4986_v30 = vpop.f32.mrb[21].mxu1 }
 0xa01   :  { %v1002_v31 = vpop.f32.mrb[22].mxu1 }
 0xa02   :  { %v1003_v32 = vadd.f32 %v1002_v31, %v949_v28  ;;  %v4987_v33 = vpop.f32.mrb[23].mxu1  ;;  %v1006_v36 = vmax.f32 %v1000_v29, 0.0  ;;  %v1126_v29 = vrot.slane %v5835_v17, %v6020_v21 }
 0xa04   :  { %v1007_v34 = vmax.f32 %v1003_v32, 0.0 }
 0xa06   :  { %v1016_v35 = vpack.c.bf16 %v1007_v34, %v1006_v36  ;;  %v1138_v36 = vrot.slane %v6033_v60, %v5802_v63 }
 0xa08   :  { %4997 = vmatmul.mubr.msk.bf16.vlgmr.msra.gmra.mrb[16].mxu0 %vm215_vm5, %v1016_v35 }
 0xa09   :  { %5010 = vmatprep.mubr.msk.bf16.mxu0 %vm5695_vm9, %v5693_v8 }
 0xadb   :  { %v1082_v39 = vpop.f32.mrb[16].mxu0 }
 0xadc   :  { %v1083_v40 = vadd.f32 %v1082_v39, %v1020_v38  ;;  %v4998_v41 = vpop.f32.mrb[17].mxu0 }
 0xadd   :  { %v1085_v42 = vpop.f32.mrb[18].mxu0 }
 0xade   :  { %v1086_v44 = vadd.f32 %v1085_v42, %v1020_v38  ;;  %v4999_v45 = vpop.f32.mrb[19].mxu0  ;;  %v1089_v48 = vadd.f32 %v1083_v40, %v939_v18 }
 0xae0   :  { %v1091_v47 = vsel %vm313_vm8, %v1089_v48, 0.0  ;;  %v1090_v49 = vadd.f32 %v1086_v44, %v940_v19  ;;  %v1120_v19 = vrot.slane %v5835_v17, %v6015_v13 }
 0xae1   :  { %1092 = vadd.xlane.f32.xlu1 %v1091_v47 }
 0xae2   :  { %v1094_v50 = vsel %vm313_vm8, %v1090_v49, 0.0 }
 0xae3   :  { %1095 = vadd.xlane.f32.xlu0 %v1094_v50 }
 0xb6e   :  { %v1093_v12 = vpop.xlane.xlu1 %1092 }
 0xb6f   :  { %v1097_v11 = vmul.f32 0.03125, %v1093_v12 }
 0xb70   :  { %v1096_v51 = vpop.xlane.xlu0 %1095 }
 0xb71   :  { %v1099_v52 = vsub.f32 %v1089_v48, %v1097_v11  ;;  %v1098_v53 = vmul.f32 0.03125, %v1096_v51 }
 0xb73   :  { %v1100_v54 = vsub.f32 %v1090_v49, %v1098_v53  ;;  %v1101_v55 = vmul.f32 %v1099_v52, %v1099_v52 }
 0xb75   :  { %v1103_v56 = vsel %vm313_vm8, %v1101_v55, 0.0  ;;  %v1102_v57 = vmul.f32 %v1100_v54, %v1100_v54 }
 0xb76   :  { %1104 = vadd.xlane.f32.xlu0 %v1103_v56 }
 0xb77   :  { %v1106_v58 = vsel %vm313_vm8, %v1102_v57, 0.0 }
 0xb7a   :  { %1107 = vadd.xlane.f32.xlu0 %v1106_v58 }
 0xc03   :  { %v1105_v0 = vpop.xlane.xlu0 %1104 }
 0xc04   :  { %v1109_v3 = vmul.f32 0.03125, %v1105_v0 }
 0xc06   :  { %v1111_v5 = vadd.f32 1e-05, %v1109_v3 }
 0xc07   :  { %v1108_v7 = vpop.xlane.xlu0 %1107 }
 0xc08   :  { %5457 = vrsqrt.f32 %v1111_v5  ;;  %v1110_v9 = vmul.f32 0.03125, %v1108_v7 }
 0xc0a   :  { %v1112_v10 = vadd.f32 1e-05, %v1110_v9 }
 0xc0c   :  { %5459 = vrsqrt.f32 %v1112_v10 }
 0xc12   :  { %v5458_v18 = vpop.eup %5457 }
 0xc13   :  { %v1115_v20 = vmul.f32 %v5458_v18, %v1099_v52 }
 0xc15   :  { %v1121_v28 = vmul.f32 %v1120_v19, %v1115_v20 }
 0xc16   :  { %v5460_v26 = vpop.eup %5459 }
 0xc17   :  { %v1116_v14 = vmul.f32 %v5460_v26, %v1100_v54  ;;  %v6024_v31 = vadd.f32 %v1126_v29, %v1121_v28 }
 0xc19   :  { %v1122_v30 = vmul.f32 %v1120_v19, %v1116_v14 }
 0xc1b   :  { %v6026_v32 = vadd.f32 %v1126_v29, %v1122_v30 }
 0xc1d   :  { %v1134_v33 = vpack.c.bf16 %v6026_v32, %v6024_v31 }
 0xc1f   :  { %5005 = vmatmul.mubr.msk.bf16.vlgmr.msra.gmra.mrb[24].mxu1 %vm313_vm8, %v1134_v33 }
 0xc20   :  { %5016 = vmatprep.mubr.msk.bf16.mxu1 %vm5695_vm9, %v5693_v8 }
 0xcf2   :  { %v1188_v34 = vpop.f32.mrb[24].mxu1 }
 0xcf3   :  { %v1189_v17 = vadd.f32 %v1188_v34, %v1138_v36  ;;  %v5006_v35 = vpop.f32.mrb[25].mxu1 }
 0xcf4   :  { %v1191_v38 = vpop.f32.mrb[26].mxu1 }
 0xcf5   :  { %v5007_v39 = vpop.f32.mrb[27].mxu1  ;;  %v1192_v40 = vadd.f32 %v1191_v38, %v1138_v36  ;;  %v1196_v41 = vmul.f32 %v5845_v22, %v1189_v17  ;;  %v1249_v42 = vmul.f32 %v5848_v23, %v1189_v17  ;;  %v1296_v44 = vmul.f32 %v5851_v24, %v1189_v17 }
 0xcf6   :  { %v1343_v45 = vmul.f32 %v5854_v25, %v1189_v17 }
 0xcf7   :  { %v1197_v48 = vmul.f32 %v5845_v22, %v1192_v40  ;;  %v1250_v47 = vmul.f32 %v5848_v23, %v1192_v40  ;;  %v1297_v49 = vmul.f32 %v5851_v24, %v1192_v40  ;;  %v1344_v50 = vmul.f32 %v5854_v25, %v1192_v40 }
 0xcf8   :  { %v6045_v12 = vpack.c.bf16 %v1192_v40, %v1189_v17 }
 0xcf9   :  { %v1198_v11 = vpack.c.bf16 %v1197_v48, %v1196_v41  ;;  %v1251_v51 = vpack.c.bf16 %v1250_v47, %v1249_v42  ;;  %v1298_v52 = vpack.c.bf16 %v1297_v49, %v1296_v44  ;;  %v1345_v53 = vpack.c.bf16 %v1344_v50, %v1343_v45 }
 0xcfa   :  { %1200 = vrot.lane.b32.xlu0 %v6045_v12, %s5696_s13 }
 0xd6c   :  { %v1201_v54 = vpop.permute.xlu0 %1200 }
 0xd6d   :  { %v1206_v55 = vsel %vm313_vm8, %v1201_v54, 0 }
 0xd6e   :  { %5009 = vmatpush3.bf16.xpose.msra.mxu0 %v1206_v55  ;;  %5015 = vmatpush3.bf16.xpose.msra.mxu1 %v1206_v55 }
 0xd6f   :  { %5020 = vmatprep.subr.bf16.mxu0 %v5693_v8  ;;  %5026 = vmatprep.subr.bf16.mxu1 %v5693_v8 }
 0xd75   :  { %5011 = vmatmul.mubr.msk.bf16.vlgmr.msra.gmra.mrb[20].mxu0 %vm313_vm8, %v1198_v11  ;;  %5017 = vmatmul.mubr.msk.bf16.vlgmr.msra.gmra.mrb[28].mxu1 %vm313_vm8, %v1251_v51 }
 0xd76   :  { %5021 = vmatpush3.bf16.xpose.msra.mxu0 %v1206_v55  ;;  %5027 = vmatpush3.bf16.xpose.msra.mxu1 %v1206_v55 }
 0xd77   :  { %5022 = vmatprep.mubr.msk.bf16.mxu0 %vm5695_vm9, %v5693_v8  ;;  %5028 = vmatprep.mubr.msk.bf16.mxu1 %vm5695_vm9, %v5693_v8 }
 0xd78   :  { %5042 = vmatprep.subr.bf16.mxu1 %v5693_v8 }
 0xd7d   :  { %5023 = vmatmul.mubr.msk.bf16.vlgmr.msra.gmra.mrb[24].mxu0 %vm313_vm8, %v1298_v52  ;;  %5029 = vmatmul.mubr.msk.bf16.vlgmr.msra.gmra.mrb[32].mxu1 %vm313_vm8, %v1345_v53 }
 0xd7e   :  { %5046 = vmatprep.mubr.msk.bf16.mxu1 %vm5695_vm9, %v5693_v8 }
 0xe48   :  { %v1242_v56 = vpop.f32.mrb[20].mxu0  ;;  %v1289_v57 = vpop.f32.mrb[28].mxu1 }
 0xe49   :  { %v1243_v58 = vadd.f32 %v1242_v56, %v5885_v43  ;;  %v1290_v59 = vadd.f32 %v1289_v57, %v5885_v43  ;;  %v5012_v62 = vpop.f32.mrb[21].mxu0  ;;  %v5018_v0 = vpop.f32.mrb[29].mxu1 }
 0xe4a   :  { %v1245_v3 = vpop.f32.mrb[22].mxu0  ;;  %v1292_v5 = vpop.f32.mrb[30].mxu1 }
 0xe4b   :  { %v1246_v7 = vadd.f32 %v1245_v3, %v5890_v46  ;;  %v5013_v9 = vpop.f32.mrb[23].mxu0  ;;  %v5019_v10 = vpop.f32.mrb[31].mxu1  ;;  %v1390_v18 = vsel %vm117_vm0, %v1243_v58, -inf  ;;  %v1396_v19 = vsel %vm117_vm0, %v1290_v59, -inf  ;;  %v1293_v20 = vadd.f32 %v1292_v5, %v5890_v46 }
 0xe4c   :  { %1391 = vmax.xlane.f32.xlu0 %v1390_v18  ;;  %1397 = vmax.xlane.f32.xlu1 %v1396_v19 }
 0xe4d   :  { %v1393_v26 = vsel %vm117_vm0, %v1246_v7, -inf  ;;  %v1399_v38 = vsel %vm117_vm0, %v1293_v20, -inf }
 0xe50   :  { %v1336_v28 = vpop.f32.mrb[24].mxu0  ;;  %1394 = vmax.xlane.f32.xlu1 %v1393_v26  ;;  %v1383_v14 = vpop.f32.mrb[32].mxu1 }
 0xe51   :  { %v5024_v29 = vpop.f32.mrb[25].mxu0  ;;  %v5030_v30 = vpop.f32.mrb[33].mxu1  ;;  %v1337_v34 = vadd.f32 %v1336_v28, %v5885_v43  ;;  %v1384_v39 = vadd.f32 %v1383_v14, %v5885_v43 }
 0xe52   :  { %v1339_v33 = vpop.f32.mrb[26].mxu0  ;;  %v1386_v36 = vpop.f32.mrb[34].mxu1 }
 0xe53   :  { %v5025_v17 = vpop.f32.mrb[27].mxu0  ;;  %v5031_v35 = vpop.f32.mrb[35].mxu1  ;;  %v1402_v40 = vsel %vm117_vm0, %v1337_v34, -inf  ;;  %v1340_v41 = vadd.f32 %v1339_v33, %v5890_v46  ;;  %v1408_v42 = vsel %vm117_vm0, %v1384_v39, -inf  ;;  %v1387_v44 = vadd.f32 %v1386_v36, %v5890_v46 }
 0xe54   :  { %1400 = vmax.xlane.f32.xlu1 %v1399_v38 }
 0xe55   :  { %v1405_v45 = vsel %vm117_vm0, %v1340_v41, -inf  ;;  %v1411_v48 = vsel %vm117_vm0, %v1387_v44, -inf }
 0xe58   :  { %1403 = vmax.xlane.f32.xlu1 %v1402_v40 }
 0xe5c   :  { %1409 = vmax.xlane.f32.xlu1 %v1408_v42 }
 0xe60   :  { %1406 = vmax.xlane.f32.xlu1 %v1405_v45 }
 0xe64   :  { %1412 = vmax.xlane.f32.xlu1 %v1411_v48 }
 0xed9   :  { %v1392_v47 = vpop.xlane.xlu0 %1391  ;;  %v1398_v49 = vpop.xlane.xlu1 %1397 }
 0xeda   :  { %v1414_v50 = vsub.f32 %v1243_v58, %v1392_v47  ;;  %v1416_v43 = vsub.f32 %v1290_v59, %v1398_v49 }
 0xedc   :  { %v1422_v11 = vmul.f32 1.442695, %v1414_v50  ;;  %v1426_v51 = vmul.f32 1.442695, %v1416_v43 }
 0xedd   :  { %v1395_v52 = vpop.xlane.xlu1 %1394 }
 0xede   :  { %5461 = vpow2.f32 %v1422_v11  ;;  %v1415_v53 = vsub.f32 %v1246_v7, %v1395_v52 }
 0xedf   :  { %5463 = vpow2.f32 %v1426_v51 }
 0xee0   :  { %v1424_v54 = vmul.f32 1.442695, %v1415_v53 }
 0xee1   :  { %v1401_v55 = vpop.xlane.xlu1 %1400 }
 0xee2   :  { %5465 = vpow2.f32 %v1424_v54  ;;  %v1417_v46 = vsub.f32 %v1293_v20, %v1401_v55 }
 0xee4   :  { %v1428_v56 = vmul.f32 1.442695, %v1417_v46 }
 0xee5   :  { %v1404_v57 = vpop.xlane.xlu1 %1403 }
 0xee6   :  { %5467 = vpow2.f32 %v1428_v56  ;;  %v1418_v62 = vsub.f32 %v1337_v34, %v1404_v57 }
 0xee8   :  { %v5462_v0 = vpop.eup %5461  ;;  %v1430_v3 = vmul.f32 1.442695, %v1418_v62 }
 0xee9   :  { %v1410_v5 = vpop.xlane.xlu1 %1409  ;;  %v1438_v58 = vsel %vm117_vm0, %v5462_v0, 0.0  ;;  %v5464_v59 = vpop.eup %5463 }
 0xeea   :  { %5469 = vpow2.f32 %v1430_v3  ;;  %v1420_v9 = vsub.f32 %v1384_v39, %v1410_v5  ;;  %1439 = vadd.xlane.f32.xlu1 %v1438_v58  ;;  %v1444_v20 = vsel %vm117_vm0, %v5464_v59, 0.0 }
 0xeec   :  { %v5466_v10 = vpop.eup %5465  ;;  %v1434_v7 = vmul.f32 1.442695, %v1420_v9 }
 0xeed   :  { %v1407_v18 = vpop.xlane.xlu1 %1406  ;;  %v1441_v19 = vsel %vm117_vm0, %v5466_v10, 0.0 }
 0xeee   :  { %5471 = vpow2.f32 %v1434_v7  ;;  %v1419_v26 = vsub.f32 %v1340_v41, %v1407_v18  ;;  %1442 = vadd.xlane.f32.xlu0 %v1441_v19  ;;  %1445 = vadd.xlane.f32.xlu1 %v1444_v20 }
 0xef0   :  { %v5468_v28 = vpop.eup %5467  ;;  %v1432_v14 = vmul.f32 1.442695, %v1419_v26 }
 0xef1   :  { %v1413_v29 = vpop.xlane.xlu1 %1412  ;;  %v1447_v30 = vsel %vm117_vm0, %v5468_v28, 0.0 }
 0xef2   :  { %5473 = vpow2.f32 %v1432_v14  ;;  %v1421_v33 = vsub.f32 %v1387_v44, %v1413_v29  ;;  %1448 = vadd.xlane.f32.xlu0 %v1447_v30  ;;  %v320_v44 = vsel %vm313_vm8, %v5831_v16, 0.0  ;;  %v5378_v14 = vld [vmem:[%s6748_s2 + $0x68] sm:$0xff]  }
 0xef4   :  { %v5470_v36 = vpop.eup %5469  ;;  %v1436_v34 = vmul.f32 1.442695, %v1421_v33 }
 0xef5   :  { %v1450_v17 = vsel %vm117_vm0, %v5470_v36, 0.0 }
 0xef6   :  { %5475 = vpow2.f32 %v1436_v34  ;;  %1451 = vadd.xlane.f32.xlu1 %v1450_v17 }
 0xef8   :  { %v5472_v35 = vpop.eup %5471 }
 0xef9   :  { %v1456_v38 = vsel %vm117_vm0, %v5472_v35, 0.0 }
 0xefa   :  { %1457 = vadd.xlane.f32.xlu1 %v1456_v38 }
 0xefc   :  { %v5474_v39 = vpop.eup %5473 }
 0xefd   :  { %v1453_v40 = vsel %vm117_vm0, %v5474_v39, 0.0 }
 0xefe   :  { %1454 = vadd.xlane.f32.xlu0 %v1453_v40 }
 0xf00   :  { %v5476_v41 = vpop.eup %5475 }
 0xf01   :  { %v1459_v42 = vsel %vm117_vm0, %v5476_v41, 0.0 }
 0xf02   :  { %1460 = vadd.xlane.f32.xlu0 %v1459_v42 }
 0xf0b   :  { %1482 = vrot.lane.b32.xlu1 %v6045_v12, %s5697_s18 }
 0xf2f   :  { %321 = vadd.xlane.f32.xlu1 %v320_v44 }
 0xf77   :  { %v1440_v45 = vpop.xlane.xlu1 %1439 }
 0xf78   :  { %5477 = vrcp.f32 %v1440_v45 }
 0xf7b   :  { %v1443_v48 = vpop.xlane.xlu0 %1442  ;;  %v1446_v47 = vpop.xlane.xlu1 %1445 }
 0xf7c   :  { %5479 = vrcp.f32 %v1443_v48 }
 0xf7d   :  { %5481 = vrcp.f32 %v1446_v47 }
 0xf7f   :  { %v1449_v49 = vpop.xlane.xlu0 %1448 }
 0xf80   :  { %5483 = vrcp.f32 %v1449_v49 }
 0xf82   :  { %v5478_v43 = vpop.eup %5477 }
 0xf83   :  { %v1452_v50 = vpop.xlane.xlu1 %1451  ;;  %v1470_v52 = vmul.f32 %v5478_v43, %v5462_v0 }
 0xf84   :  { %5485 = vrcp.f32 %v1452_v50 }
 0xf86   :  { %v5480_v11 = vpop.eup %5479 }
 0xf87   :  { %v1458_v51 = vpop.xlane.xlu1 %1457  ;;  %v1471_v53 = vmul.f32 %v5480_v11, %v5466_v10  ;;  %v5482_v54 = vpop.eup %5481 }
 0xf88   :  { %v1472_v46 = vmul.f32 %v5482_v54, %v5464_v59  ;;  %v1584_v54 = vrot.slane %v6033_v60, %v5806_v1 }
 0xf89   :  { %v1478_v12 = vpack.c.bf16 %v1471_v53, %v1470_v52 }
 0xf8a   :  { %v5484_v55 = vpop.eup %5483 }
 0xf8b   :  { %v1473_v56 = vmul.f32 %v5484_v55, %v5468_v28  ;;  %v1455_v57 = vpop.xlane.xlu0 %1454  ;;  %5034 = vmatprep.mubr.msk.bf16.mxu0 %vm117_vm0, %v1478_v12  ;;  %v1483_v62 = vpop.permute.xlu1 %1482  ;;  %v5377_v28 = vld [vmem:[%s6748_s2 + $0x60] sm:$0xff]  }
 0xf8c   :  { %5487 = vrcp.f32 %v1455_v57  ;;  %5032 = vmatprep.subr.bf16.mxu0 %v1483_v62  ;;  %5043 = vmatpush3.bf16.msra.mxu1 %v5377_v28 }
 0xf8d   :  { %5033 = vmatpush3.bf16.msra.mxu0 %v1483_v62  ;;  %v1479_v3 = vpack.c.bf16 %v1473_v56, %v1472_v46  ;;  %5489 = vrcp.f32 %v1458_v51  ;;  %5044 = vmatprep.subr.bf16.mxu1 %v5693_v8 }
 0xf8e   :  { %5058 = vmatprep.subr.bf16.mxu0 %v5693_v8  ;;  %v5486_v0 = vpop.eup %5485 }
 0xf8f   :  { %v1461_v5 = vpop.xlane.xlu0 %1460  ;;  %v1474_v9 = vmul.f32 %v5486_v0, %v5470_v36 }
 0xf90   :  { %5491 = vrcp.f32 %v1461_v5  ;;  %5035 = vmatmul.mubr.msk.bf16.vlgmr.msra.gmra.mrb[28].mxu0 %vm117_vm0, %v1479_v3  ;;  %5045 = vmatpush3.bf16.msra.mxu1 %v5378_v14 }
 0xf91   :  { %5050 = vmatprep.subr.bf16.mxu1 %v5693_v8 }
 0xf96   :  { %v5488_v58 = vpop.eup %5487 }
 0xf97   :  { %v1475_v59 = vmul.f32 %v5488_v58, %v5474_v39  ;;  %v5490_v10 = vpop.eup %5489 }
 0xf98   :  { %v1476_v19 = vmul.f32 %v5490_v10, %v5472_v35 }
 0xf99   :  { %v1480_v7 = vpack.c.bf16 %v1475_v59, %v1474_v9 }
 0xf9a   :  { %v5492_v18 = vpop.eup %5491 }
 0xf9b   :  { %5038 = vmatprep.mubr.msk.bf16.mxu0 %vm117_vm0, %v1480_v7  ;;  %v1477_v20 = vmul.f32 %v5492_v18, %v5476_v41 }
 0xf9d   :  { %v1481_v26 = vpack.c.bf16 %v1477_v20, %v1476_v19 }
 0xf9f   :  { %5039 = vmatmul.mubr.msk.bf16.gmra.mrb[32].mxu0 %vm117_vm0, %v1481_v26 }
 0xfa0   :  { %5066 = vmatprep.mubr.msk.bf16.mxu0 %vm5695_vm9, %v5693_v8 }
 0xfbc   :  { %v322_v7 = vpop.xlane.xlu1 %321 }
 0xfbd   :  { %v329_v26 = vmul.f32 0.03125, %v322_v7 }
0x1063   :  { %v5036_v29 = vpop.f32.mrb[28].mxu0 }
0x1064   :  { %v1564_v30 = vmul.f32 %v5036_v29, %v5848_v23  ;;  %v1531_v33 = vpop.f32.mrb[29].mxu0  ;;  %v6125_v29 = vsub.f32 %v5831_v16, %v329_v26  ;;  %v5380_v16 = vld [vmem:[%s6748_s2 + $0x78] sm:$0xff]  }
0x1065   :  { %v1562_v36 = vmul.f32 %v5845_v22, %v1531_v33  ;;  %v5037_v34 = vpop.f32.mrb[30].mxu0 }
0x1066   :  { %v1565_v17 = vmul.f32 %v5037_v34, %v5848_v23  ;;  %v1534_v35 = vpop.f32.mrb[31].mxu0  ;;  %v337_v33 = vmul.f32 %v6125_v29, %v6125_v29  ;;  %v5379_v34 = vld [vmem:[%s6748_s2 + $0x70] sm:$0xff]  }
0x1067   :  { %v1566_v38 = vadd.f32 %v1564_v30, %v1562_v36  ;;  %v1563_v39 = vmul.f32 %v5845_v22, %v1534_v35  ;;  %v323_v30 = vsel %vm313_vm8, %v5829_v15, 0.0 }
0x1068   :  { %v345_v36 = vsel %vm313_vm8, %v337_v33, 0.0 }
0x1069   :  { %v1567_v40 = vadd.f32 %v1565_v17, %v1563_v39 }
0x1072   :  { %v5040_v41 = vpop.f32.mrb[32].mxu0 }
0x1073   :  { %v1547_v42 = vpop.f32.mrb[33].mxu0  ;;  %v1572_v47 = vmul.f32 %v5040_v41, %v5854_v25 }
0x1074   :  { %v1568_v44 = vmul.f32 %v5851_v24, %v1547_v42  ;;  %v5041_v45 = vpop.f32.mrb[34].mxu0 }
0x1075   :  { %v1550_v48 = vpop.f32.mrb[35].mxu0  ;;  %v1573_v11 = vmul.f32 %v5041_v45, %v5854_v25 }
0x1076   :  { %v1570_v49 = vadd.f32 %v1568_v44, %v1566_v38  ;;  %v1569_v50 = vmul.f32 %v5851_v24, %v1550_v48 }
0x1078   :  { %v1574_v43 = vadd.f32 %v1572_v47, %v1570_v49  ;;  %v1571_v51 = vadd.f32 %v1569_v50, %v1567_v40  ;;  %v1672_v50 = vrot.slane %v6033_v60, %v5969_v61 }
0x107a   :  { %v1575_v52 = vadd.f32 %v1573_v11, %v1571_v51 }
0x107c   :  { %v1580_v53 = vpack.c.bf16 %v1575_v52, %v1574_v43 }
0x107e   :  { %5047 = vmatmul.mubr.msk.bf16.vlgmr.msra.gmra.mrb[36].mxu1 %vm313_vm8, %v1580_v53  ;;  %v1678_v53 = vrot.slane %v6033_v60, %v5974_v4 }
0x107f   :  { %5054 = vmatprep.mubr.msk.bf16.mxu1 %vm5695_vm9, %v5693_v8  ;;  %5051 = vmatpush3.bf16.msra.mxu1 %v5379_v34  ;;  %v5385_v34 = vld [vmem:[%s6748_s2 + $0xa0] sm:$0xff]  }
0x1080   :  { %5052 = vmatprep.subr.bf16.mxu1 %v5693_v8 }
0x1083   :  { %5053 = vmatpush3.bf16.msra.mxu1 %v5380_v16 }
0x1084   :  { %5070 = vmatprep.subr.bf16.mxu1 %v5693_v8 }
0x1151   :  { %v1634_v12 = vpop.f32.mrb[36].mxu1 }
0x1152   :  { %v1635_v55 = vadd.f32 %v1634_v12, %v1584_v54  ;;  %v5048_v46 = vpop.f32.mrb[37].mxu1 }
0x1153   :  { %v1637_v56 = vpop.f32.mrb[38].mxu1  ;;  %v5381_v46 = vld [vmem:[%s6748_s2 + $0x80] sm:$0xff]  }
0x1154   :  { %v1638_v57 = vadd.f32 %v1637_v56, %v1584_v54  ;;  %v5049_v62 = vpop.f32.mrb[39].mxu1  ;;  %v1641_v3 = vadd.f32 %v1635_v55, %v6024_v31  ;;  %5059 = vmatpush3.bf16.msra.mxu0 %v5381_v46  ;;  %v5382_v56 = vld [vmem:[%s6748_s2 + $0x88] sm:$0xff]  }
0x1155   :  { %5060 = vmatprep.subr.bf16.mxu0 %v5693_v8  ;;  %v5384_v62 = vld [vmem:[%s6748_s2 + $0x98] sm:$0xff]  }
0x1156   :  { %v1643_v5 = vsel %vm313_vm8, %v1641_v3, 0.0  ;;  %v1642_v0 = vadd.f32 %v1638_v57, %v6026_v32  ;;  %v5383_v57 = vld [vmem:[%s6748_s2 + $0x90] sm:$0xff]  }
0x1157   :  { %1644 = vadd.xlane.f32.xlu0 %v1643_v5 }
0x1158   :  { %v1646_v58 = vsel %vm313_vm8, %v1642_v0, 0.0  ;;  %5061 = vmatpush3.bf16.msra.mxu0 %v5382_v56 }
0x1159   :  { %5062 = vmatprep.subr.bf16.mxu0 %v5693_v8 }
0x115b   :  { %1647 = vadd.xlane.f32.xlu0 %v1646_v58 }
0x115c   :  { %5063 = vmatpush3.bf16.msra.mxu0 %v5383_v57 }
0x115d   :  { %5064 = vmatprep.subr.bf16.mxu0 %v5693_v8 }
0x1160   :  { %5065 = vmatpush3.bf16.msra.mxu0 %v5384_v62 }
0x1161   :  { %5078 = vmatprep.subr.bf16.mxu0 %v5693_v8 }
0x11e4   :  { %v1645_v9 = vpop.xlane.xlu0 %1644 }
0x11e5   :  { %v1649_v59 = vmul.f32 0.03125, %v1645_v9 }
0x11e7   :  { %v1651_v10 = vsub.f32 %v1641_v3, %v1649_v59 }
0x11e8   :  { %v1648_v18 = vpop.xlane.xlu0 %1647 }
0x11e9   :  { %v1650_v19 = vmul.f32 0.03125, %v1648_v18  ;;  %v1653_v20 = vmul.f32 %v1651_v10, %v1651_v10 }
0x11eb   :  { %v1652_v28 = vsub.f32 %v1642_v0, %v1650_v19  ;;  %v1655_v14 = vsel %vm313_vm8, %v1653_v20, 0.0 }
0x11ec   :  { %1656 = vadd.xlane.f32.xlu0 %v1655_v14 }
0x11ed   :  { %v1654_v31 = vmul.f32 %v1652_v28, %v1652_v28 }
0x11ef   :  { %v1658_v32 = vsel %vm313_vm8, %v1654_v31, 0.0 }
0x11f0   :  { %1659 = vadd.xlane.f32.xlu0 %v1658_v32 }
0x11f4   :  { %324 = vadd.xlane.f32.xlu0 %v323_v30 }
0x11f8   :  { %346 = vadd.xlane.f32.xlu0 %v345_v36 }
0x1279   :  { %v1657_v17 = vpop.xlane.xlu0 %1656 }
0x127a   :  { %v1661_v35 = vmul.f32 0.03125, %v1657_v17 }
0x127c   :  { %v1663_v38 = vadd.f32 1e-05, %v1661_v35 }
0x127d   :  { %v1660_v39 = vpop.xlane.xlu0 %1659 }
0x127e   :  { %5493 = vrsqrt.f32 %v1663_v38  ;;  %v1662_v40 = vmul.f32 0.03125, %v1660_v39  ;;  %v5386_v38 = vld [vmem:[%s6748_s2 + $0xa8] sm:$0xff]  }
0x1280   :  { %v1664_v41 = vadd.f32 1e-05, %v1662_v40  ;;  %v1760_v40 = vrot.slane %v6033_v60, %v5998_v37 }
0x1281   :  { %v325_v42 = vpop.xlane.xlu0 %324 }
0x1282   :  { %5495 = vrsqrt.f32 %v1664_v41  ;;  %v330_v44 = vmul.f32 0.03125, %v325_v42 }
0x1284   :  { %v334_v45 = vsub.f32 %v5829_v15, %v330_v44 }
0x1285   :  { %v347_v3 = vpop.xlane.xlu0 %346 }
0x1286   :  { %v338_v48 = vmul.f32 %v334_v45, %v334_v45  ;;  %v353_v58 = vmul.f32 0.03125, %v347_v3 }
0x1288   :  { %v5494_v47 = vpop.eup %5493  ;;  %v348_v49 = vsel %vm313_vm8, %v338_v48, 0.0  ;;  %v357_v59 = vadd.f32 1e-05, %v353_v58 }
0x1289   :  { %v1667_v43 = vmul.f32 %v5494_v47, %v1651_v10  ;;  %349 = vadd.xlane.f32.xlu0 %v348_v49  ;;  %v1689_v10 = vrot.slane %v6033_v60, %v5990_v27 }
0x128b   :  { %v1673_v51 = vmul.f32 %v1672_v50, %v1667_v43 }
0x128c   :  { %v5496_v11 = vpop.eup %5495 }
0x128d   :  { %v1668_v52 = vmul.f32 %v5496_v11, %v1652_v28  ;;  %v1679_v12 = vadd.f32 %v1678_v53, %v1673_v51 }
0x128f   :  { %v1674_v54 = vmul.f32 %v1672_v50, %v1668_v52 }
0x1291   :  { %v6147_v55 = vadd.f32 %v1678_v53, %v1674_v54 }
0x1293   :  { %v1685_v15 = vpack.c.bf16 %v6147_v55, %v1679_v12 }
0x1295   :  { %5055 = vmatmul.mubr.msk.bf16.vlgmr.msra.gmra.mrb[40].mxu1 %vm313_vm8, %v1685_v15 }
0x1296   :  { %5074 = vmatprep.mubr.msk.bf16.mxu1 %vm5695_vm9, %v5693_v8 }
0x1316   :  { %v350_v5 = vpop.xlane.xlu0 %349 }
0x1317   :  { %v354_v0 = vmul.f32 0.03125, %v350_v5 }
0x1319   :  { %v358_v9 = vadd.f32 1e-05, %v354_v0 }
0x131b   :  { %5497 = vrsqrt.f32 %v358_v9 }
0x131c   :  { %5499 = vrsqrt.f32 %v357_v59 }
0x1325   :  { %v5498_v7 = vpop.eup %5497 }
0x1326   :  { %v5500_v26 = vpop.eup %5499  ;;  %v366_v14 = vmul.f32 %v5498_v7, %v334_v45 }
0x1327   :  { %v365_v30 = vmul.f32 %v5500_v26, %v6125_v29 }
0x1328   :  { %v374_v16 = vmul.f32 %v5811_v2, %v366_v14 }
0x1329   :  { %v373_v35 = vmul.f32 %v5811_v2, %v365_v30 }
0x132a   :  { %v6185_v29 = vadd.f32 %v5814_v6, %v374_v16  ;;  %v5388_v16 = vld [vmem:[%s6748_s2 + $0x188] sm:$0xff]  }
0x132b   :  { %v6188_v39 = vadd.f32 %v5814_v6, %v373_v35  ;;  %v6198_v6 = vld [vmem:[#allocation2 + $0x68] sm:$0xff] }
0x132c   :  { %v1944_v43 = vrot.slane %v6198_v6, %v5802_v63 }
0x132d   :  { %v1940_v2 = vpack.c.bf16 %v6185_v29, %v6188_v39 }
0x1368   :  { %v1739_v18 = vpop.f32.mrb[40].mxu1 }
0x1369   :  { %v1740_v19 = vadd.f32 %v1739_v18, %v1689_v10  ;;  %v5056_v20 = vpop.f32.mrb[41].mxu1 }
0x136a   :  { %v1742_v28 = vpop.f32.mrb[42].mxu1 }
0x136b   :  { %v1743_v31 = vadd.f32 %v1742_v28, %v1689_v10  ;;  %v5057_v32 = vpop.f32.mrb[43].mxu1  ;;  %v1746_v33 = vmax.f32 %v1740_v19, 0.0 }
0x136d   :  { %v1747_v36 = vmax.f32 %v1743_v31, 0.0 }
0x136f   :  { %v1756_v17 = vpack.c.bf16 %v1747_v36, %v1746_v33 }
0x1371   :  { %5067 = vmatmul.mubr.msk.bf16.vlgmr.msra.gmra.mrb[36].mxu0 %vm215_vm5, %v1756_v17 }
0x1372   :  { %5079 = vmatpush3.bf16.msra.mxu0 %v5385_v34  ;;  %5082 = vmatprep.mubr.msk.bf16.mxu0 %vm5695_vm9, %v5693_v8  ;;  %v5387_v34 = vld [vmem:[%s6748_s2 + $0x180] sm:$0xff]  }
0x1373   :  { %5080 = vmatprep.subr.bf16.mxu0 %v5693_v8  ;;  %5071 = vmatpush3.bf16.msra.mxu1 %v5387_v34 }
0x1374   :  { %5072 = vmatprep.subr.bf16.mxu1 %v5693_v8 }
0x1376   :  { %5081 = vmatpush3.bf16.msra.mxu0 %v5386_v38 }
0x1377   :  { %5092 = vmatprep.subr.bf16.mxu0 %v5693_v8  ;;  %5073 = vmatpush3.bf16.msra.mxu1 %v5388_v16 }
0x1378   :  { %5086 = vmatprep.subr.bf16.mxu1 %v5693_v8 }
0x1379   :  { %5083 = vmatmul.mubr.msk.bf16.vlgmr.msra.gmra.mrb[40].mxu0 %vm313_vm8, %v1940_v2 }
0x137a   :  { %5094 = vmatprep.mubr.msk.bf16.mxu0 %vm5695_vm9, %v5693_v8 }
0x1444   :  { %v1822_v41 = vpop.f32.mrb[36].mxu0 }
0x1445   :  { %v1823_v42 = vadd.f32 %v1822_v41, %v1760_v40  ;;  %v5068_v44 = vpop.f32.mrb[37].mxu0 }
0x1446   :  { %v1825_v45 = vpop.f32.mrb[38].mxu0 }
0x1447   :  { %v1826_v48 = vadd.f32 %v1825_v45, %v1760_v40  ;;  %v5069_v47 = vpop.f32.mrb[39].mxu0  ;;  %v1829_v49 = vadd.f32 %v1823_v42, %v1679_v12 }
0x1449   :  { %v1831_v50 = vsel %vm313_vm8, %v1829_v49, 0.0  ;;  %v1830_v11 = vadd.f32 %v1826_v48, %v6147_v55  ;;  %v1860_v48 = vrot.slane %v6033_v60, %v6015_v13 }
0x144a   :  { %1832 = vadd.xlane.f32.xlu0 %v1831_v50 }
0x144b   :  { %v1834_v54 = vsel %vm313_vm8, %v1830_v11, 0.0 }
0x144c   :  { %v1994_v51 = vpop.f32.mrb[40].mxu0 }
0x144d   :  { %v1995_v52 = vadd.f32 %v1994_v51, %v1944_v43  ;;  %v5084_v53 = vpop.f32.mrb[41].mxu0 }
0x144e   :  { %1835 = vadd.xlane.f32.xlu0 %v1834_v54  ;;  %v1997_v15 = vpop.f32.mrb[42].mxu0 }
0x144f   :  { %v5085_v46 = vpop.f32.mrb[43].mxu0  ;;  %v1998_v56 = vadd.f32 %v1997_v15, %v1944_v43  ;;  %v6206_v57 = vmul.f32 %v5845_v22, %v1995_v52  ;;  %v2055_v12 = vmul.f32 %v5848_v23, %v1995_v52  ;;  %v6210_v62 = vmul.f32 %v5851_v24, %v1995_v52 }
0x1450   :  { %v2149_v55 = vmul.f32 %v5854_v25, %v1995_v52  ;;  %v386_v46 = vld [vmem:[%s6747_s1 + $0x18] sm:$0xff] }
0x1451   :  { %v2003_v3 = vmul.f32 %v5845_v22, %v1998_v56  ;;  %v2056_v5 = vmul.f32 %v5848_v23, %v1998_v56  ;;  %v6216_v0 = vmul.f32 %v5851_v24, %v1998_v56  ;;  %v2150_v58 = vmul.f32 %v5854_v25, %v1998_v56 }
0x1452   :  { %v6219_v9 = vpack.c.bf16 %v1998_v56, %v1995_v52 }
0x1453   :  { %v2057_v59 = vpack.c.bf16 %v2056_v5, %v2055_v12  ;;  %v2151_v10 = vpack.c.bf16 %v2150_v58, %v2149_v55  ;;  %v2004_v7 = vpack.c.bf16 %v2003_v3, %v6206_v57  ;;  %v2104_v18 = vpack.c.bf16 %v6216_v0, %v6210_v62 }
0x14d7   :  { %v1833_v19 = vpop.xlane.xlu0 %1832 }
0x14d8   :  { %v1837_v20 = vmul.f32 0.03125, %v1833_v19 }
0x14da   :  { %v1839_v26 = vsub.f32 %v1829_v49, %v1837_v20 }
0x14db   :  { %v1836_v28 = vpop.xlane.xlu0 %1835 }
0x14dc   :  { %v1838_v14 = vmul.f32 0.03125, %v1836_v28  ;;  %v1841_v31 = vmul.f32 %v1839_v26, %v1839_v26 }
0x14de   :  { %v1840_v32 = vsub.f32 %v1830_v11, %v1838_v14  ;;  %v1843_v30 = vsel %vm313_vm8, %v1841_v31, 0.0  ;;  %v1866_v11 = vrot.slane %v6033_v60, %v6020_v21  ;;  %v385_v60 = vld [vmem:[%s6747_s1 + $0x10] sm:$0xff] }
0x14df   :  { %1844 = vadd.xlane.f32.xlu0 %v1843_v30 }
0x14e0   :  { %v1842_v33 = vmul.f32 %v1840_v32, %v1840_v32 }
0x14e2   :  { %v1846_v36 = vsel %vm313_vm8, %v1842_v33, 0.0 }
0x14e3   :  { %1847 = vadd.xlane.f32.xlu0 %v1846_v36 }
0x14f9   :  { %2006 = vrot.lane.b32.xlu0 %v6219_v9, %s5696_s13 }
0x156c   :  { %v1845_v17 = vpop.xlane.xlu0 %1844 }
0x156d   :  { %v1849_v35 = vmul.f32 0.03125, %v1845_v17 }
0x156f   :  { %v1851_v38 = vadd.f32 1e-05, %v1849_v35 }
0x1570   :  { %v1848_v2 = vpop.xlane.xlu0 %1847 }
0x1571   :  { %5501 = vrsqrt.f32 %v1851_v38  ;;  %v1850_v40 = vmul.f32 0.03125, %v1848_v2 }
0x1573   :  { %v1852_v41 = vadd.f32 1e-05, %v1850_v40 }
0x1574   :  { %v2007_v42 = vpop.permute.xlu0 %2006 }
0x1575   :  { %5503 = vrsqrt.f32 %v1852_v41  ;;  %v2012_v44 = vsel %vm313_vm8, %v2007_v42, 0 }
0x1576   :  { %5093 = vmatpush3.bf16.xpose.msra.mxu0 %v2012_v44 }
0x1577   :  { %5104 = vmatprep.subr.bf16.mxu0 %v5693_v8 }
0x157b   :  { %v5502_v45 = vpop.eup %5501 }
0x157c   :  { %v1855_v47 = vmul.f32 %v5502_v45, %v1839_v26 }
0x157d   :  { %5095 = vmatmul.mubr.msk.bf16.vlgmr.msra.gmra.mrb[44].mxu0 %vm313_vm8, %v2057_v59 }
0x157e   :  { %5105 = vmatpush3.bf16.xpose.msra.mxu0 %v2012_v44  ;;  %5106 = vmatprep.mubr.msk.bf16.mxu0 %vm5695_vm9, %v5693_v8  ;;  %v1861_v50 = vmul.f32 %v1860_v48, %v1855_v47 }
0x157f   :  { %v5504_v49 = vpop.eup %5503  ;;  %5120 = vmatprep.subr.bf16.mxu0 %v5693_v8 }
0x1580   :  { %v1856_v43 = vmul.f32 %v5504_v49, %v1840_v32  ;;  %v1867_v52 = vadd.f32 %v1866_v11, %v1861_v50 }
0x1582   :  { %v1862_v51 = vmul.f32 %v1860_v48, %v1856_v43 }
0x1584   :  { %v1868_v53 = vadd.f32 %v1866_v11, %v1862_v51 }
0x1585   :  { %5107 = vmatmul.mubr.msk.bf16.vlgmr.msra.gmra.mrb[48].mxu0 %vm313_vm8, %v2151_v10  ;;  %v5657_v10 = vld [vmem:[#allocation2 + $0x50] sm:$0xff] }
0x1586   :  { %v1873_v54 = vpack.c.bf16 %v1868_v53, %v1867_v52  ;;  %5124 = vmatprep.mubr.msk.bf16.mxu0 %vm5695_vm9, %v5693_v8 }
0x1588   :  { %5075 = vmatmul.mubr.msk.bf16.vlgmr.msra.gmra.mrb[44].mxu1 %vm313_vm8, %v1873_v54 }
0x1589   :  { %5087 = vmatpush3.bf16.xpose.msra.mxu1 %v2012_v44  ;;  %5088 = vmatprep.mubr.msk.bf16.mxu1 %vm5695_vm9, %v5693_v8 }
0x158a   :  { %5098 = vmatprep.subr.bf16.mxu1 %v5693_v8 }
0x1590   :  { %5089 = vmatmul.mubr.msk.bf16.vlgmr.msra.gmra.mrb[48].mxu1 %vm313_vm8, %v2004_v7  ;;  %v1877_v7 = vrot.slane %v5657_v10, %v5974_v4 }
0x1591   :  { %5099 = vmatpush3.bf16.xpose.msra.mxu1 %v2012_v44  ;;  %5100 = vmatprep.mubr.msk.bf16.mxu1 %vm5695_vm9, %v5693_v8 }
0x1598   :  { %5101 = vmatmul.mubr.msk.bf16.vlgmr.msra.gmra.mrb[52].mxu1 %vm313_vm8, %v2104_v18 }
0x1650   :  { %v2095_v15 = vpop.f32.mrb[44].mxu0 }
0x1651   :  { %v2096_v56 = vadd.f32 %v2095_v15, %v385_v60  ;;  %v5096_v57 = vpop.f32.mrb[45].mxu0 }
0x1652   :  { %v2098_v12 = vpop.f32.mrb[46].mxu0 }
0x1653   :  { %v2099_v62 = vadd.f32 %v2098_v12, %v386_v46  ;;  %v5097_v55 = vpop.f32.mrb[47].mxu0  ;;  %v2202_v3 = vsel %vm117_vm0, %v2096_v56, -inf }
0x1654   :  { %2203 = vmax.xlane.f32.xlu1 %v2202_v3 }
0x1655   :  { %v2205_v5 = vsel %vm117_vm0, %v2099_v62, -inf }
0x1658   :  { %2206 = vmax.xlane.f32.xlu1 %v2205_v5  ;;  %v2189_v0 = vpop.f32.mrb[48].mxu0 }
0x1659   :  { %v5108_v58 = vpop.f32.mrb[49].mxu0  ;;  %v2190_v38 = vadd.f32 %v2189_v0, %v385_v60 }
0x165a   :  { %v2192_v59 = vpop.f32.mrb[50].mxu0 }
0x165b   :  { %v1927_v18 = vpop.f32.mrb[44].mxu1  ;;  %v5109_v19 = vpop.f32.mrb[51].mxu0  ;;  %v2214_v47 = vsel %vm117_vm0, %v2190_v38, -inf  ;;  %v2193_v50 = vadd.f32 %v2192_v59, %v386_v46 }
0x165c   :  { %v5076_v20 = vpop.f32.mrb[45].mxu1  ;;  %v1928_v28 = vadd.f32 %v1927_v18, %v1877_v7 }
0x165d   :  { %v1930_v26 = vpop.f32.mrb[46].mxu1  ;;  %v2217_v11 = vsel %vm117_vm0, %v2193_v50, -inf }
0x165e   :  { %v1931_v14 = vadd.f32 %v1930_v26, %v1877_v7  ;;  %v5077_v31 = vpop.f32.mrb[47].mxu1 }
0x1660   :  { %v6266_v32 = vpack.c.bf16 %v1931_v14, %v1928_v28 }
0x1663   :  { %v2048_v30 = vpop.f32.mrb[48].mxu1 }
0x1664   :  { %v2049_v33 = vadd.f32 %v2048_v30, %v385_v60  ;;  %v5090_v36 = vpop.f32.mrb[49].mxu1 }
0x1665   :  { %v2051_v34 = vpop.f32.mrb[50].mxu1 }
0x1666   :  { %v2052_v16 = vadd.f32 %v2051_v34, %v386_v46  ;;  %v5091_v17 = vpop.f32.mrb[51].mxu1  ;;  %v2196_v35 = vsel %vm117_vm0, %v2049_v33, -inf }
0x1667   :  { %2197 = vmax.xlane.f32.xlu1 %v2196_v35 }
0x1668   :  { %v2199_v2 = vsel %vm117_vm0, %v2052_v16, -inf }
0x166b   :  { %2200 = vmax.xlane.f32.xlu1 %v2199_v2  ;;  %v2142_v40 = vpop.f32.mrb[52].mxu1 }
0x166c   :  { %v2143_v41 = vadd.f32 %v2142_v40, %v385_v60  ;;  %v5102_v42 = vpop.f32.mrb[53].mxu1 }
0x166d   :  { %v2145_v44 = vpop.f32.mrb[54].mxu1 }
0x166e   :  { %v2146_v45 = vadd.f32 %v2145_v44, %v386_v46  ;;  %v5103_v48 = vpop.f32.mrb[55].mxu1  ;;  %v2208_v49 = vsel %vm117_vm0, %v2143_v41, -inf }
0x166f   :  { %2215 = vmax.xlane.f32.xlu1 %v2214_v47  ;;  %2209 = vmax.xlane.f32.xlu0 %v2208_v49 }
0x1670   :  { %v2211_v43 = vsel %vm117_vm0, %v2146_v45, -inf }
0x1673   :  { %2212 = vmax.xlane.f32.xlu1 %v2211_v43 }
0x1677   :  { %2218 = vmax.xlane.f32.xlu1 %v2217_v11 }
0x16e1   :  { %v2204_v51 = vpop.xlane.xlu1 %2203 }
0x16e2   :  { %v2222_v52 = vsub.f32 %v2096_v56, %v2204_v51 }
0x16e4   :  { %v2232_v53 = vmul.f32 1.442695, %v2222_v52 }
0x16e5   :  { %v2207_v54 = vpop.xlane.xlu1 %2206 }
0x16e6   :  { %5505 = vpow2.f32 %v2232_v53  ;;  %v2223_v60 = vsub.f32 %v2099_v62, %v2207_v54 }
0x16e8   :  { %v2234_v15 = vmul.f32 1.442695, %v2223_v60 }
0x16ea   :  { %5507 = vpow2.f32 %v2234_v15 }
0x16f0   :  { %v6274_v57 = vpop.eup %5505 }
0x16f1   :  { %v2250_v12 = vsel %vm117_vm0, %v6274_v57, 0.0 }
0x16f2   :  { %2251 = vadd.xlane.f32.xlu1 %v2250_v12 }
0x16f4   :  { %v6278_v46 = vpop.eup %5507  ;;  %v2198_v55 = vpop.xlane.xlu1 %2197 }
0x16f5   :  { %v2253_v3 = vsel %vm117_vm0, %v6278_v46, 0.0  ;;  %v2220_v5 = vsub.f32 %v2049_v33, %v2198_v55 }
0x16f6   :  { %2254 = vadd.xlane.f32.xlu1 %v2253_v3 }
0x16f7   :  { %v2228_v62 = vmul.f32 1.442695, %v2220_v5 }
0x16f8   :  { %v2201_v56 = vpop.xlane.xlu1 %2200 }
0x16f9   :  { %v2221_v59 = vsub.f32 %v2052_v16, %v2201_v56 }
0x16fb   :  { %v2230_v20 = vmul.f32 1.442695, %v2221_v59 }
0x16fc   :  { %v2216_v0 = vpop.xlane.xlu1 %2215  ;;  %v2210_v7 = vpop.xlane.xlu0 %2209 }
0x16fd   :  { %v2226_v58 = vsub.f32 %v2190_v38, %v2216_v0  ;;  %v2224_v26 = vsub.f32 %v2143_v41, %v2210_v7 }
0x16ff   :  { %v2240_v10 = vmul.f32 1.442695, %v2226_v58  ;;  %v2236_v30 = vmul.f32 1.442695, %v2224_v26 }
0x1700   :  { %v2213_v18 = vpop.xlane.xlu1 %2212 }
0x1701   :  { %5509 = vpow2.f32 %v2240_v10  ;;  %v2225_v19 = vsub.f32 %v2146_v45, %v2213_v18  ;;  %v6300_v18 = vsel %vm313_vm8, %v6266_v32, 0 }
0x1702   :  { %5511 = vpow2.f32 %v2228_v62 }
0x1703   :  { %v2238_v28 = vmul.f32 1.442695, %v2225_v19 }
0x1704   :  { %v2219_v14 = vpop.xlane.xlu1 %2218 }
0x1705   :  { %5513 = vpow2.f32 %v2238_v28  ;;  %v2227_v31 = vsub.f32 %v2193_v50, %v2219_v14  ;;  %v5389_v28 = vld [vmem:[%s6748_s2 + $0xb0] sm:$0xff]   ;;  %v5390_v14 = vld [vmem:[%s6748_s2 + $0xb8] sm:$0xff]  }
0x1706   :  { %5515 = vpow2.f32 %v2230_v20  ;;  %5121 = vmatpush3.bf16.msra.mxu0 %v5389_v28 }
0x1707   :  { %v2242_v36 = vmul.f32 1.442695, %v2227_v31  ;;  %5122 = vmatprep.subr.bf16.mxu0 %v5693_v8 }
0x1709   :  { %5517 = vpow2.f32 %v2242_v36 }
0x170a   :  { %5519 = vpow2.f32 %v2236_v30  ;;  %5123 = vmatpush3.bf16.msra.mxu0 %v5390_v14 }
0x170b   :  { %v6282_v33 = vpop.eup %5509  ;;  %5128 = vmatprep.subr.bf16.mxu0 %v5693_v8 }
0x170c   :  { %v2262_v34 = vsel %vm117_vm0, %v6282_v33, 0.0  ;;  %v5512_v16 = vpop.eup %5511 }
0x170d   :  { %2263 = vadd.xlane.f32.xlu1 %v2262_v34  ;;  %v2244_v35 = vsel %vm117_vm0, %v5512_v16, 0.0 }
0x170f   :  { %v5514_v17 = vpop.eup %5513 }
0x1710   :  { %v2259_v38 = vsel %vm117_vm0, %v5514_v17, 0.0  ;;  %v5516_v2 = vpop.eup %5515 }
0x1711   :  { %2245 = vadd.xlane.f32.xlu1 %v2244_v35  ;;  %2260 = vadd.xlane.f32.xlu0 %v2259_v38  ;;  %v2247_v41 = vsel %vm117_vm0, %v5516_v2, 0.0 }
0x1713   :  { %v5518_v40 = vpop.eup %5517 }
0x1714   :  { %v2265_v42 = vsel %vm117_vm0, %v5518_v40, 0.0  ;;  %v5520_v44 = vpop.eup %5519 }
0x1715   :  { %2248 = vadd.xlane.f32.xlu1 %v2247_v41  ;;  %2266 = vadd.xlane.f32.xlu0 %v2265_v42  ;;  %v2256_v45 = vsel %vm117_vm0, %v5520_v44, 0.0 }
0x1719   :  { %2257 = vadd.xlane.f32.xlu1 %v2256_v45 }
0x172a   :  { %2288 = vrot.lane.b32.xlu1 %v6219_v9, %s5697_s18 }
0x177f   :  { %v2252_v48 = vpop.xlane.xlu1 %2251 }
0x1783   :  { %v2255_v47 = vpop.xlane.xlu1 %2254 }
0x1784   :  { %5521 = vrcp.f32 %v2255_v47 }
0x178e   :  { %v5522_v54 = vpop.eup %5521 }
0x178f   :  { %v2279_v12 = vmul.f32 %v5522_v54, %v6278_v46 }
0x179a   :  { %v2264_v49 = vpop.xlane.xlu1 %2263 }
0x179e   :  { %v2246_v50 = vpop.xlane.xlu1 %2245  ;;  %v2261_v43 = vpop.xlane.xlu0 %2260 }
0x179f   :  { %5523 = vrcp.f32 %v2246_v50 }
0x17a0   :  { %5525 = vrcp.f32 %v2252_v48 }
0x17a2   :  { %v2249_v11 = vpop.xlane.xlu1 %2248  ;;  %v2267_v51 = vpop.xlane.xlu0 %2266 }
0x17a3   :  { %5527 = vrcp.f32 %v2249_v11 }
0x17a4   :  { %5529 = vrcp.f32 %v2261_v43 }
0x17a6   :  { %v2258_v52 = vpop.xlane.xlu1 %2257 }
0x17a7   :  { %5531 = vrcp.f32 %v2258_v52 }
0x17a8   :  { %5533 = vrcp.f32 %v2267_v51 }
0x17a9   :  { %5535 = vrcp.f32 %v2264_v49  ;;  %v5524_v9 = vpop.eup %5523 }
0x17aa   :  { %v2289_v53 = vpop.permute.xlu1 %2288  ;;  %v5526_v60 = vpop.eup %5525  ;;  %v2276_v3 = vmul.f32 %v5524_v9, %v5512_v16 }
0x17ab   :  { %5110 = vmatprep.subr.bf16.mxu1 %v2289_v53  ;;  %v2278_v5 = vmul.f32 %v5526_v60, %v6274_v57 }
0x17ac   :  { %5111 = vmatpush3.bf16.msra.mxu1 %v2289_v53  ;;  %v2390_v53 = vrot.slane %v6198_v6, %v5806_v1 }
0x17ad   :  { %5136 = vmatprep.subr.bf16.mxu1 %v5693_v8  ;;  %v5528_v15 = vpop.eup %5527  ;;  %v2285_v62 = vpack.c.bf16 %v2279_v12, %v2278_v5 }
0x17ae   :  { %v5530_v55 = vpop.eup %5529  ;;  %v2277_v56 = vmul.f32 %v5528_v15, %v5516_v2 }
0x17af   :  { %v2281_v10 = vmul.f32 %v5530_v55, %v5514_v17 }
0x17b0   :  { %v2284_v58 = vpack.c.bf16 %v2277_v56, %v2276_v3 }
0x17b1   :  { %v5532_v0 = vpop.eup %5531 }
0x17b2   :  { %v2280_v59 = vmul.f32 %v5532_v0, %v5520_v44  ;;  %v5534_v7 = vpop.eup %5533  ;;  %5112 = vmatprep.mubr.msk.bf16.mxu1 %vm117_vm0, %v2284_v58 }
0x17b3   :  { %5113 = vmatmul.mubr.msk.bf16.vlgmr.msra.gmra.mrb[56].mxu1 %vm117_vm0, %v2285_v62  ;;  %v5536_v19 = vpop.eup %5535  ;;  %v2283_v57 = vmul.f32 %v5534_v7, %v5518_v40 }
0x17b4   :  { %v2286_v46 = vpack.c.bf16 %v2281_v10, %v2280_v59  ;;  %v2282_v20 = vmul.f32 %v5536_v19, %v6282_v33 }
0x17b5   :  { %5137 = vmatpush3.bf16.xpose.msra.mxu1 %v6300_v18 }
0x17b6   :  { %5116 = vmatprep.mubr.msk.bf16.mxu1 %vm117_vm0, %v2286_v46  ;;  %5148 = vmatprep.subr.bf16.mxu1 %v5693_v8  ;;  %v2287_v26 = vpack.c.bf16 %v2283_v57, %v2282_v20 }
0x17bb   :  { %5117 = vmatmul.mubr.msk.bf16.gmra.mrb[60].mxu1 %vm117_vm0, %v2287_v26  ;;  %v5392_v26 = vld [vmem:[%s6748_s2 + $0xc8] sm:$0xff]  }
0x17bc   :  { %5138 = vmatprep.mubr.msk.bf16.mxu1 %vm5695_vm9, %v5693_v8 }
0x1886   :  { %v5114_v31 = vpop.f32.mrb[56].mxu1 }
0x1887   :  { %v2370_v30 = vmul.f32 %v5114_v31, %v5848_v23  ;;  %v2337_v36 = vpop.f32.mrb[57].mxu1 }
0x1888   :  { %v2368_v33 = vmul.f32 %v5845_v22, %v2337_v36  ;;  %v5115_v34 = vpop.f32.mrb[58].mxu1 }
0x1889   :  { %v2371_v16 = vmul.f32 %v5115_v34, %v5848_v23  ;;  %v2340_v17 = vpop.f32.mrb[59].mxu1 }
0x188a   :  { %v2372_v35 = vadd.f32 %v2370_v30, %v2368_v33  ;;  %v2369_v38 = vmul.f32 %v5845_v22, %v2340_v17 }
0x188c   :  { %v2373_v2 = vadd.f32 %v2371_v16, %v2369_v38  ;;  %v2478_v16 = vrot.slane %v6198_v6, %v5969_v61 }
0x188e   :  { %v5118_v40 = vpop.f32.mrb[60].mxu1 }
0x188f   :  { %v2353_v41 = vpop.f32.mrb[61].mxu1  ;;  %v2378_v48 = vmul.f32 %v5118_v40, %v5854_v25  ;;  %v2484_v40 = vrot.slane %v6198_v6, %v5974_v4 }
0x1890   :  { %v2374_v42 = vmul.f32 %v5851_v24, %v2353_v41  ;;  %v5119_v44 = vpop.f32.mrb[62].mxu1 }
0x1891   :  { %v2356_v45 = vpop.f32.mrb[63].mxu1  ;;  %v2379_v43 = vmul.f32 %v5119_v44, %v5854_v25 }
0x1892   :  { %v2376_v47 = vadd.f32 %v2374_v42, %v2372_v35  ;;  %v2375_v49 = vmul.f32 %v5851_v24, %v2356_v45 }
0x1894   :  { %v2380_v50 = vadd.f32 %v2378_v48, %v2376_v47  ;;  %v2377_v11 = vadd.f32 %v2375_v49, %v2373_v2  ;;  %v2495_v48 = vrot.slane %v6198_v6, %v5990_v27 }
0x1896   :  { %v2381_v51 = vadd.f32 %v2379_v43, %v2377_v11 }
0x1898   :  { %v2386_v52 = vpack.c.bf16 %v2381_v51, %v2380_v50 }
0x189a   :  { %5125 = vmatmul.mubr.msk.bf16.vlgmr.msra.gmra.mrb[52].mxu0 %vm313_vm8, %v2386_v52 }
0x189b   :  { %5132 = vmatprep.mubr.msk.bf16.mxu0 %vm5695_vm9, %v5693_v8 }
0x196d   :  { %v2440_v54 = vpop.f32.mrb[52].mxu0 }
0x196e   :  { %v2441_v9 = vadd.f32 %v2440_v54, %v2390_v53  ;;  %v5126_v60 = vpop.f32.mrb[53].mxu0 }
0x196f   :  { %v2443_v15 = vpop.f32.mrb[54].mxu0 }
0x1970   :  { %v2444_v12 = vadd.f32 %v2443_v15, %v2390_v53  ;;  %v5127_v55 = vpop.f32.mrb[55].mxu0  ;;  %v2447_v3 = vadd.f32 %v2441_v9, %v6188_v39 }
0x1972   :  { %v2449_v56 = vsel %vm313_vm8, %v2447_v3, 0.0  ;;  %v2448_v5 = vadd.f32 %v2444_v12, %v6185_v29  ;;  %v5391_v29 = vld [vmem:[%s6748_s2 + $0xc0] sm:$0xff]  }
0x1973   :  { %2450 = vadd.xlane.f32.xlu0 %v2449_v56  ;;  %5129 = vmatpush3.bf16.msra.mxu0 %v5391_v29 }
0x1974   :  { %v2452_v0 = vsel %vm313_vm8, %v2448_v5, 0.0  ;;  %5130 = vmatprep.subr.bf16.mxu0 %v5693_v8 }
0x1977   :  { %2453 = vadd.xlane.f32.xlu0 %v2452_v0  ;;  %5131 = vmatpush3.bf16.msra.mxu0 %v5392_v26  ;;  %v387_v0 = vld [vmem:[%s6747_s1 + $0x20] sm:$0xff] }
0x1978   :  { %5142 = vmatprep.subr.bf16.mxu0 %v5693_v8 }
0x1a00   :  { %v2451_v58 = vpop.xlane.xlu0 %2450 }
0x1a01   :  { %v2455_v62 = vmul.f32 0.03125, %v2451_v58 }
0x1a03   :  { %v2457_v59 = vsub.f32 %v2447_v3, %v2455_v62  ;;  %v388_v62 = vld [vmem:[%s6747_s1 + $0x28] sm:$0xff] }
0x1a04   :  { %v2454_v10 = vpop.xlane.xlu0 %2453 }
0x1a05   :  { %v2456_v7 = vmul.f32 0.03125, %v2454_v10  ;;  %v2459_v46 = vmul.f32 %v2457_v59, %v2457_v59 }
0x1a07   :  { %v2458_v19 = vsub.f32 %v2448_v5, %v2456_v7  ;;  %v2461_v57 = vsel %vm313_vm8, %v2459_v46, 0.0 }
0x1a08   :  { %2462 = vadd.xlane.f32.xlu0 %v2461_v57 }
0x1a09   :  { %v2460_v20 = vmul.f32 %v2458_v19, %v2458_v19 }
0x1a0b   :  { %v2464_v39 = vsel %vm313_vm8, %v2460_v20, 0.0 }
0x1a0c   :  { %2465 = vadd.xlane.f32.xlu0 %v2464_v39 }
0x1a95   :  { %v2463_v28 = vpop.xlane.xlu0 %2462 }
0x1a96   :  { %v2467_v14 = vmul.f32 0.03125, %v2463_v28 }
0x1a98   :  { %v2469_v31 = vadd.f32 1e-05, %v2467_v14 }
0x1a99   :  { %v2466_v30 = vpop.xlane.xlu0 %2465 }
0x1a9a   :  { %5537 = vrsqrt.f32 %v2469_v31  ;;  %v2468_v36 = vmul.f32 0.03125, %v2466_v30 }
0x1a9c   :  { %v2470_v33 = vadd.f32 1e-05, %v2468_v36 }
0x1a9e   :  { %5539 = vrsqrt.f32 %v2470_v33 }
0x1aa4   :  { %v5538_v34 = vpop.eup %5537 }
0x1aa5   :  { %v2473_v17 = vmul.f32 %v5538_v34, %v2457_v59 }
0x1aa7   :  { %v2479_v38 = vmul.f32 %v2478_v16, %v2473_v17 }
0x1aa8   :  { %v5540_v35 = vpop.eup %5539 }
0x1aa9   :  { %v2474_v2 = vmul.f32 %v5540_v35, %v2458_v19  ;;  %v6348_v42 = vadd.f32 %v2484_v40, %v2479_v38 }
0x1aab   :  { %v2480_v41 = vmul.f32 %v2478_v16, %v2474_v2 }
0x1aad   :  { %v6350_v44 = vadd.f32 %v2484_v40, %v2480_v41 }
0x1aaf   :  { %v2491_v45 = vpack.c.bf16 %v6350_v44, %v6348_v42 }
0x1ab1   :  { %5133 = vmatmul.mubr.msk.bf16.vlgmr.msra.gmra.mrb[56].mxu0 %vm313_vm8, %v2491_v45 }
0x1ab2   :  { %5143 = vmatpush3.bf16.xpose.msra.mxu0 %v6300_v18  ;;  %5144 = vmatprep.mubr.msk.bf16.mxu0 %vm5695_vm9, %v5693_v8 }
0x1ab3   :  { %5154 = vmatprep.subr.bf16.mxu0 %v5693_v8 }
0x1b84   :  { %v2545_v47 = vpop.f32.mrb[56].mxu0 }
0x1b85   :  { %v2546_v49 = vadd.f32 %v2545_v47, %v2495_v48  ;;  %v5134_v50 = vpop.f32.mrb[57].mxu0 }
0x1b86   :  { %v2548_v43 = vpop.f32.mrb[58].mxu0 }
0x1b87   :  { %v5135_v11 = vpop.f32.mrb[59].mxu0  ;;  %v2549_v51 = vadd.f32 %v2548_v43, %v2495_v48  ;;  %v2553_v52 = vmul.f32 %v5845_v22, %v2546_v49  ;;  %v2603_v53 = vmul.f32 %v5848_v23, %v2546_v49  ;;  %v2650_v54 = vmul.f32 %v5851_v24, %v2546_v49 }
0x1b88   :  { %v2697_v9 = vmul.f32 %v5854_v25, %v2546_v49 }
0x1b89   :  { %v2554_v60 = vmul.f32 %v5845_v22, %v2549_v51  ;;  %v2604_v15 = vmul.f32 %v5848_v23, %v2549_v51  ;;  %v2651_v6 = vmul.f32 %v5851_v24, %v2549_v51  ;;  %v2698_v12 = vmul.f32 %v5854_v25, %v2549_v51 }
0x1b8b   :  { %v2555_v55 = vpack.c.bf16 %v2554_v60, %v2553_v52  ;;  %v2605_v3 = vpack.c.bf16 %v2604_v15, %v2603_v53  ;;  %v2652_v56 = vpack.c.bf16 %v2651_v6, %v2650_v54  ;;  %v2699_v5 = vpack.c.bf16 %v2698_v12, %v2697_v9 }
0x1b8d   :  { %5139 = vmatmul.mubr.msk.bf16.vlgmr.msra.gmra.mrb[64].mxu1 %vm313_vm8, %v2555_v55  ;;  %5145 = vmatmul.mubr.msk.bf16.vlgmr.msra.gmra.mrb[60].mxu0 %vm313_vm8, %v2605_v3 }
0x1b8e   :  { %5149 = vmatpush3.bf16.xpose.msra.mxu1 %v6300_v18  ;;  %5155 = vmatpush3.bf16.xpose.msra.mxu0 %v6300_v18 }
0x1b8f   :  { %5150 = vmatprep.mubr.msk.bf16.mxu1 %vm5695_vm9, %v5693_v8  ;;  %5156 = vmatprep.mubr.msk.bf16.mxu0 %vm5695_vm9, %v5693_v8 }
0x1b90   :  { %5170 = vmatprep.subr.bf16.mxu0 %v5693_v8 }
0x1b95   :  { %5151 = vmatmul.mubr.msk.bf16.vlgmr.msra.gmra.mrb[68].mxu1 %vm313_vm8, %v2652_v56  ;;  %5157 = vmatmul.mubr.msk.bf16.vlgmr.msra.gmra.mrb[64].mxu0 %vm313_vm8, %v2699_v5 }
0x1b96   :  { %5174 = vmatprep.mubr.msk.bf16.mxu0 %vm5695_vm9, %v5693_v8 }
0x1c60   :  { %v2596_v18 = vpop.f32.mrb[64].mxu1  ;;  %v2643_v58 = vpop.f32.mrb[60].mxu0 }
0x1c61   :  { %v2597_v59 = vadd.f32 %v2596_v18, %v387_v0  ;;  %v2644_v10 = vadd.f32 %v2643_v58, %v387_v0  ;;  %v5140_v7 = vpop.f32.mrb[65].mxu1  ;;  %v5146_v46 = vpop.f32.mrb[61].mxu0 }
0x1c62   :  { %v2599_v19 = vpop.f32.mrb[66].mxu1  ;;  %v2646_v57 = vpop.f32.mrb[62].mxu0 }
0x1c63   :  { %v2600_v20 = vadd.f32 %v2599_v19, %v388_v62  ;;  %v5141_v39 = vpop.f32.mrb[67].mxu1  ;;  %v5147_v29 = vpop.f32.mrb[63].mxu0  ;;  %v2744_v26 = vsel %vm117_vm0, %v2597_v59, -inf  ;;  %v2750_v28 = vsel %vm117_vm0, %v2644_v10, -inf  ;;  %v2647_v14 = vadd.f32 %v2646_v57, %v388_v62 }
0x1c64   :  { %2745 = vmax.xlane.f32.xlu1 %v2744_v26  ;;  %2751 = vmax.xlane.f32.xlu0 %v2750_v28 }
0x1c65   :  { %v2747_v31 = vsel %vm117_vm0, %v2600_v20, -inf  ;;  %v2753_v40 = vsel %vm117_vm0, %v2647_v14, -inf }
0x1c68   :  { %v2690_v30 = vpop.f32.mrb[68].mxu1  ;;  %2748 = vmax.xlane.f32.xlu0 %v2747_v31  ;;  %v2737_v36 = vpop.f32.mrb[64].mxu0 }
0x1c69   :  { %v5152_v33 = vpop.f32.mrb[69].mxu1  ;;  %v5158_v34 = vpop.f32.mrb[65].mxu0  ;;  %v2691_v35 = vadd.f32 %v2690_v30, %v387_v0  ;;  %v2738_v41 = vadd.f32 %v2737_v36, %v387_v0 }
0x1c6a   :  { %v2693_v16 = vpop.f32.mrb[70].mxu1  ;;  %v2740_v17 = vpop.f32.mrb[66].mxu0 }
0x1c6b   :  { %v5153_v38 = vpop.f32.mrb[71].mxu1  ;;  %v5159_v2 = vpop.f32.mrb[67].mxu0  ;;  %v2756_v45 = vsel %vm117_vm0, %v2691_v35, -inf  ;;  %v2694_v48 = vadd.f32 %v2693_v16, %v388_v62  ;;  %v2762_v47 = vsel %vm117_vm0, %v2738_v41, -inf  ;;  %v2741_v49 = vadd.f32 %v2740_v17, %v388_v62 }
0x1c6c   :  { %2754 = vmax.xlane.f32.xlu0 %v2753_v40 }
0x1c6d   :  { %v2759_v50 = vsel %vm117_vm0, %v2694_v48, -inf  ;;  %v2765_v43 = vsel %vm117_vm0, %v2741_v49, -inf }
0x1c70   :  { %2757 = vmax.xlane.f32.xlu0 %v2756_v45 }
0x1c74   :  { %2763 = vmax.xlane.f32.xlu0 %v2762_v47 }
0x1c78   :  { %2760 = vmax.xlane.f32.xlu0 %v2759_v50 }
0x1c7c   :  { %2766 = vmax.xlane.f32.xlu0 %v2765_v43 }
0x1cf1   :  { %v2746_v11 = vpop.xlane.xlu1 %2745  ;;  %v2752_v51 = vpop.xlane.xlu0 %2751 }
0x1cf2   :  { %v2768_v52 = vsub.f32 %v2597_v59, %v2746_v11  ;;  %v2770_v53 = vsub.f32 %v2644_v10, %v2752_v51 }
0x1cf4   :  { %v2776_v54 = vmul.f32 1.442695, %v2768_v52  ;;  %v2780_v9 = vmul.f32 1.442695, %v2770_v53 }
0x1cf5   :  { %v2749_v60 = vpop.xlane.xlu0 %2748 }
0x1cf6   :  { %5541 = vpow2.f32 %v2776_v54  ;;  %v2769_v15 = vsub.f32 %v2600_v20, %v2749_v60 }
0x1cf7   :  { %5543 = vpow2.f32 %v2780_v9 }
0x1cf8   :  { %v2778_v6 = vmul.f32 1.442695, %v2769_v15 }
0x1cf9   :  { %v2755_v12 = vpop.xlane.xlu0 %2754 }
0x1cfa   :  { %5545 = vpow2.f32 %v2778_v6  ;;  %v2771_v55 = vsub.f32 %v2647_v14, %v2755_v12 }
0x1cfc   :  { %v2782_v3 = vmul.f32 1.442695, %v2771_v55 }
0x1cfd   :  { %v2758_v56 = vpop.xlane.xlu0 %2757 }
0x1cfe   :  { %5547 = vpow2.f32 %v2782_v3  ;;  %v2772_v5 = vsub.f32 %v2691_v35, %v2758_v56 }
0x1d00   :  { %v5542_v0 = vpop.eup %5541  ;;  %v2784_v18 = vmul.f32 1.442695, %v2772_v5 }
0x1d01   :  { %v5544_v58 = vpop.eup %5543  ;;  %v2764_v62 = vpop.xlane.xlu0 %2763  ;;  %v2792_v59 = vsel %vm117_vm0, %v5542_v0, 0.0 }
0x1d02   :  { %5549 = vpow2.f32 %v2784_v18  ;;  %v2774_v10 = vsub.f32 %v2738_v41, %v2764_v62  ;;  %v2798_v7 = vsel %vm117_vm0, %v5544_v58, 0.0  ;;  %2793 = vadd.xlane.f32.xlu0 %v2792_v59 }
0x1d03   :  { %2799 = vadd.xlane.f32.xlu1 %v2798_v7 }
0x1d04   :  { %v5546_v46 = vpop.eup %5545  ;;  %v2788_v19 = vmul.f32 1.442695, %v2774_v10 }
0x1d05   :  { %v2761_v57 = vpop.xlane.xlu0 %2760  ;;  %v2795_v20 = vsel %vm117_vm0, %v5546_v46, 0.0 }
0x1d06   :  { %5551 = vpow2.f32 %v2788_v19  ;;  %v2773_v39 = vsub.f32 %v2694_v48, %v2761_v57  ;;  %2796 = vadd.xlane.f32.xlu0 %v2795_v20  ;;  %v5394_v19 = vld [vmem:[%s6748_s2 + $0xd8] sm:$0xff]  }
0x1d08   :  { %v5548_v29 = vpop.eup %5547  ;;  %v2786_v26 = vmul.f32 1.442695, %v2773_v39 }
0x1d09   :  { %v2767_v28 = vpop.xlane.xlu0 %2766  ;;  %v2801_v14 = vsel %vm117_vm0, %v5548_v29, 0.0 }
0x1d0a   :  { %5553 = vpow2.f32 %v2786_v26  ;;  %v2775_v31 = vsub.f32 %v2741_v49, %v2767_v28  ;;  %2802 = vadd.xlane.f32.xlu0 %v2801_v14 }
0x1d0c   :  { %v5550_v30 = vpop.eup %5549  ;;  %v2790_v36 = vmul.f32 1.442695, %v2775_v31 }
0x1d0d   :  { %v2804_v33 = vsel %vm117_vm0, %v5550_v30, 0.0 }
0x1d0e   :  { %5555 = vpow2.f32 %v2790_v36  ;;  %2805 = vadd.xlane.f32.xlu1 %v2804_v33 }
0x1d10   :  { %v5552_v34 = vpop.eup %5551 }
0x1d11   :  { %v2810_v16 = vsel %vm117_vm0, %v5552_v34, 0.0 }
0x1d12   :  { %2811 = vadd.xlane.f32.xlu1 %v2810_v16 }
0x1d14   :  { %v5554_v17 = vpop.eup %5553 }
0x1d15   :  { %v2807_v35 = vsel %vm117_vm0, %v5554_v17, 0.0 }
0x1d16   :  { %2808 = vadd.xlane.f32.xlu0 %v2807_v35 }
0x1d18   :  { %v5556_v38 = vpop.eup %5555 }
0x1d19   :  { %v2813_v2 = vsel %vm117_vm0, %v5556_v38, 0.0 }
0x1d1a   :  { %2814 = vadd.xlane.f32.xlu0 %v2813_v2 }
0x1d23   :  { %2837 = vrot.lane.b32.xlu1 %v6266_v32, %s5696_s13 }
0x1d8f   :  { %v2794_v40 = vpop.xlane.xlu0 %2793 }
0x1d90   :  { %5557 = vrcp.f32 %v2794_v40  ;;  %v2800_v41 = vpop.xlane.xlu1 %2799 }
0x1d93   :  { %v2797_v45 = vpop.xlane.xlu0 %2796 }
0x1d94   :  { %5559 = vrcp.f32 %v2797_v45 }
0x1d95   :  { %5561 = vrcp.f32 %v2800_v41 }
0x1d97   :  { %v2803_v48 = vpop.xlane.xlu0 %2802 }
0x1d98   :  { %5563 = vrcp.f32 %v2803_v48 }
0x1d9a   :  { %v5558_v49 = vpop.eup %5557 }
0x1d9b   :  { %v2806_v47 = vpop.xlane.xlu1 %2805  ;;  %v2824_v11 = vmul.f32 %v5558_v49, %v5542_v0 }
0x1d9c   :  { %5565 = vrcp.f32 %v2806_v47 }
0x1d9e   :  { %v5560_v50 = vpop.eup %5559 }
0x1d9f   :  { %v2812_v43 = vpop.xlane.xlu1 %2811  ;;  %v2825_v51 = vmul.f32 %v5560_v50, %v5546_v46  ;;  %v5562_v52 = vpop.eup %5561  ;;  %v5393_v46 = vld [vmem:[%s6748_s2 + $0xd0] sm:$0xff]   ;;  %v5658_v50 = vld [vmem:[#allocation2 + $0x68] sm:$0xff] }
0x1da0   :  { %v2826_v9 = vmul.f32 %v5562_v52, %v5544_v58  ;;  %5171 = vmatpush3.bf16.msra.mxu0 %v5393_v46  ;;  %v5398_v46 = vld [vmem:[%s6748_s2 + $0xf8] sm:$0xff]  }
0x1da1   :  { %v2832_v53 = vpack.c.bf16 %v2825_v51, %v2824_v11  ;;  %5172 = vmatprep.subr.bf16.mxu0 %v5693_v8 }
0x1da2   :  { %v5564_v54 = vpop.eup %5563 }
0x1da3   :  { %v2827_v60 = vmul.f32 %v5564_v54, %v5548_v29  ;;  %v2838_v15 = vpop.permute.xlu1 %2837  ;;  %5162 = vmatprep.mubr.msk.bf16.mxu1 %vm117_vm0, %v2832_v53  ;;  %v2809_v6 = vpop.xlane.xlu0 %2808 }
0x1da4   :  { %5567 = vrcp.f32 %v2809_v6  ;;  %5160 = vmatprep.subr.bf16.mxu1 %v2838_v15  ;;  %5173 = vmatpush3.bf16.msra.mxu0 %v5394_v19 }
0x1da5   :  { %5161 = vmatpush3.bf16.msra.mxu1 %v2838_v15  ;;  %v2833_v12 = vpack.c.bf16 %v2827_v60, %v2826_v9  ;;  %5569 = vrcp.f32 %v2812_v43  ;;  %5178 = vmatprep.subr.bf16.mxu0 %v5693_v8  ;;  %v2939_v43 = vrot.slane %v5658_v50, %v5998_v37 }
0x1da6   :  { %5186 = vmatprep.subr.bf16.mxu1 %v5693_v8  ;;  %v5566_v3 = vpop.eup %5565 }
0x1da7   :  { %v2815_v55 = vpop.xlane.xlu0 %2814  ;;  %v2828_v5 = vmul.f32 %v5566_v3, %v5550_v30 }
0x1da8   :  { %5571 = vrcp.f32 %v2815_v55  ;;  %5163 = vmatmul.mubr.msk.bf16.vlgmr.msra.gmra.mrb[72].mxu1 %vm117_vm0, %v2833_v12 }
0x1dae   :  { %v5568_v56 = vpop.eup %5567 }
0x1daf   :  { %v2829_v0 = vmul.f32 %v5568_v56, %v5554_v17  ;;  %v5570_v18 = vpop.eup %5569 }
0x1db0   :  { %v2830_v59 = vmul.f32 %v5570_v18, %v5552_v34 }
0x1db1   :  { %v2834_v58 = vpack.c.bf16 %v2829_v0, %v2828_v5 }
0x1db2   :  { %v5572_v62 = vpop.eup %5571 }
0x1db3   :  { %5166 = vmatprep.mubr.msk.bf16.mxu1 %vm117_vm0, %v2834_v58  ;;  %v2831_v10 = vmul.f32 %v5572_v62, %v5556_v38 }
0x1db5   :  { %v2835_v7 = vpack.c.bf16 %v2831_v10, %v2830_v59  ;;  %v5396_v10 = vld [vmem:[%s6748_s2 + $0xe8] sm:$0xff]  }
0x1db7   :  { %5167 = vmatmul.mubr.msk.bf16.gmra.mrb[76].mxu1 %vm117_vm0, %v2835_v7  ;;  %v5397_v7 = vld [vmem:[%s6748_s2 + $0xf0] sm:$0xff]  }
0x1db8   :  { %5194 = vmatprep.mubr.msk.bf16.mxu1 %vm5695_vm9, %v5693_v8  ;;  %5187 = vmatpush3.bf16.msra.mxu1 %v5397_v7 }
0x1db9   :  { %5188 = vmatprep.subr.bf16.mxu1 %v5693_v8 }
0x1dbc   :  { %5189 = vmatpush3.bf16.msra.mxu1 %v5398_v46 }
0x1dbd   :  { %5190 = vmatprep.subr.bf16.mxu1 %v5693_v8 }
0x1e7b   :  { %v5164_v57 = vpop.f32.mrb[72].mxu1 }
0x1e7c   :  { %v2919_v20 = vmul.f32 %v5164_v57, %v5848_v23  ;;  %v2886_v39 = vpop.f32.mrb[73].mxu1 }
0x1e7d   :  { %v2917_v29 = vmul.f32 %v5845_v22, %v2886_v39  ;;  %v5165_v26 = vpop.f32.mrb[74].mxu1 }
0x1e7e   :  { %v2920_v28 = vmul.f32 %v5165_v26, %v5848_v23  ;;  %v2889_v14 = vpop.f32.mrb[75].mxu1 }
0x1e7f   :  { %v2921_v31 = vadd.f32 %v2919_v20, %v2917_v29  ;;  %v2918_v30 = vmul.f32 %v5845_v22, %v2889_v14  ;;  %v3027_v14 = vrot.slane %v5658_v50, %v6015_v13 }
0x1e81   :  { %v2922_v36 = vadd.f32 %v2920_v28, %v2918_v30 }
0x1e8a   :  { %v5168_v33 = vpop.f32.mrb[76].mxu1 }
0x1e8b   :  { %v2902_v34 = vpop.f32.mrb[77].mxu1  ;;  %v2927_v38 = vmul.f32 %v5168_v33, %v5854_v25 }
0x1e8c   :  { %v2923_v16 = vmul.f32 %v5851_v24, %v2902_v34  ;;  %v5169_v17 = vpop.f32.mrb[78].mxu1  ;;  %v3033_v34 = vrot.slane %v5658_v50, %v6020_v21 }
0x1e8d   :  { %v2905_v35 = vpop.f32.mrb[79].mxu1  ;;  %v2928_v45 = vmul.f32 %v5169_v17, %v5854_v25 }
0x1e8e   :  { %v2925_v2 = vadd.f32 %v2923_v16, %v2921_v31  ;;  %v2924_v40 = vmul.f32 %v5851_v24, %v2905_v35 }
0x1e90   :  { %v2929_v41 = vadd.f32 %v2927_v38, %v2925_v2  ;;  %v2926_v48 = vadd.f32 %v2924_v40, %v2922_v36  ;;  %v5399_v2 = vld [vmem:[%s6748_s2 + $0x100] sm:$0xff]   ;;  %v5400_v40 = vld [vmem:[%s6748_s2 + $0x108] sm:$0xff]  }
0x1e91   :  { %5191 = vmatpush3.bf16.msra.mxu1 %v5399_v2 }
0x1e92   :  { %v2930_v47 = vadd.f32 %v2928_v45, %v2926_v48  ;;  %5192 = vmatprep.subr.bf16.mxu1 %v5693_v8 }
0x1e94   :  { %v2935_v49 = vpack.c.bf16 %v2930_v47, %v2929_v41  ;;  %v1935_v41 = vld [vmem:[#allocation2 + $0x70] sm:$0xff] }
0x1e95   :  { %5193 = vmatpush3.bf16.msra.mxu1 %v5400_v40  ;;  %v3044_v45 = vrot.slane %v1935_v41, %v5802_v63 }
0x1e96   :  { %5175 = vmatmul.mubr.msk.bf16.vlgmr.msra.gmra.mrb[68].mxu0 %vm313_vm8, %v2935_v49  ;;  %5206 = vmatprep.subr.bf16.mxu1 %v5693_v8 }
0x1e97   :  { %5182 = vmatprep.mubr.msk.bf16.mxu0 %vm5695_vm9, %v5693_v8 }
0x1f69   :  { %v2989_v11 = vpop.f32.mrb[68].mxu0 }
0x1f6a   :  { %v2990_v51 = vadd.f32 %v2989_v11, %v2939_v43  ;;  %v5176_v52 = vpop.f32.mrb[69].mxu0 }
0x1f6b   :  { %v2992_v53 = vpop.f32.mrb[70].mxu0 }
0x1f6c   :  { %v2996_v54 = vadd.f32 %v2990_v51, %v6348_v42  ;;  %v2993_v9 = vadd.f32 %v2992_v53, %v2939_v43  ;;  %v5177_v60 = vpop.f32.mrb[71].mxu0 }
0x1f6e   :  { %v2997_v15 = vadd.f32 %v2993_v9, %v6350_v44  ;;  %v2998_v6 = vsel %vm313_vm8, %v2996_v54, 0.0  ;;  %v5395_v44 = vld [vmem:[%s6748_s2 + $0xe0] sm:$0xff]  }
0x1f6f   :  { %2999 = vadd.xlane.f32.xlu0 %v2998_v6  ;;  %5179 = vmatpush3.bf16.msra.mxu0 %v5395_v44 }
0x1f70   :  { %v3001_v12 = vsel %vm313_vm8, %v2997_v15, 0.0  ;;  %5180 = vmatprep.subr.bf16.mxu0 %v5693_v8 }
0x1f73   :  { %3002 = vadd.xlane.f32.xlu0 %v3001_v12  ;;  %5181 = vmatpush3.bf16.msra.mxu0 %v5396_v10 }
0x1f74   :  { %5198 = vmatprep.subr.bf16.mxu0 %v5693_v8 }
0x1ffc   :  { %v3000_v55 = vpop.xlane.xlu0 %2999 }
0x1ffd   :  { %v3004_v3 = vmul.f32 0.03125, %v3000_v55 }
0x1fff   :  { %v3006_v56 = vsub.f32 %v2996_v54, %v3004_v3  ;;  %v3115_v54 = vrot.slane %v1935_v41, %v5806_v1 }
0x2000   :  { %v3003_v5 = vpop.xlane.xlu0 %3002 }
0x2001   :  { %v3005_v0 = vmul.f32 0.03125, %v3003_v5  ;;  %v3008_v18 = vmul.f32 %v3006_v56, %v3006_v56 }
0x2003   :  { %v3007_v58 = vsub.f32 %v2997_v15, %v3005_v0  ;;  %v3010_v62 = vsel %vm313_vm8, %v3008_v18, 0.0 }
0x2004   :  { %3011 = vadd.xlane.f32.xlu0 %v3010_v62 }
0x2005   :  { %v3009_v42 = vmul.f32 %v3007_v58, %v3007_v58 }
0x2007   :  { %v3013_v59 = vsel %vm313_vm8, %v3009_v42, 0.0 }
0x2008   :  { %3014 = vadd.xlane.f32.xlu0 %v3013_v59 }
0x2091   :  { %v3012_v19 = vpop.xlane.xlu0 %3011 }
0x2092   :  { %v3016_v57 = vmul.f32 0.03125, %v3012_v19 }
0x2094   :  { %v3018_v20 = vadd.f32 1e-05, %v3016_v57  ;;  %v5401_v57 = vld [vmem:[%s6748_s2 + $0x110] sm:$0xff]  }
0x2095   :  { %v3015_v39 = vpop.xlane.xlu0 %3014 }
0x2096   :  { %5573 = vrsqrt.f32 %v3018_v20  ;;  %v3017_v29 = vmul.f32 0.03125, %v3015_v39  ;;  %v5402_v20 = vld [vmem:[%s6748_s2 + $0x118] sm:$0xff]  }
0x2098   :  { %v3019_v26 = vadd.f32 1e-05, %v3017_v29 }
0x209a   :  { %5575 = vrsqrt.f32 %v3019_v26 }
0x20a0   :  { %v5574_v28 = vpop.eup %5573 }
0x20a1   :  { %v3022_v31 = vmul.f32 %v5574_v28, %v3006_v56 }
0x20a3   :  { %v3028_v36 = vmul.f32 %v3027_v14, %v3022_v31 }
0x20a4   :  { %v5576_v30 = vpop.eup %5575 }
0x20a5   :  { %v3023_v33 = vmul.f32 %v5576_v30, %v3007_v58  ;;  %v3034_v17 = vadd.f32 %v3033_v34, %v3028_v36  ;;  %v3215_v36 = vrot.slane %v1935_v41, %v5969_v61 }
0x20a7   :  { %v3029_v16 = vmul.f32 %v3027_v14, %v3023_v33 }
0x20a9   :  { %v3035_v35 = vadd.f32 %v3033_v34, %v3029_v16  ;;  %v3221_v16 = vrot.slane %v1935_v41, %v5974_v4 }
0x20ab   :  { %v3040_v38 = vpack.c.bf16 %v3035_v35, %v3034_v17 }
0x20ad   :  { %5183 = vmatmul.mubr.msk.bf16.vlgmr.msra.gmra.mrb[72].mxu0 %vm313_vm8, %v3040_v38 }
0x20ae   :  { %5202 = vmatprep.mubr.msk.bf16.mxu0 %vm5695_vm9, %v5693_v8  ;;  %5199 = vmatpush3.bf16.msra.mxu0 %v5401_v57 }
0x20af   :  { %5200 = vmatprep.subr.bf16.mxu0 %v5693_v8 }
0x20b2   :  { %5201 = vmatpush3.bf16.msra.mxu0 %v5402_v20  ;;  %v5660_v20 = vld [vmem:[%s6747_s1 + $0x18] sm:$0xff] }
0x20b3   :  { %5212 = vmatprep.subr.bf16.mxu0 %v5693_v8 }
0x2180   :  { %v3094_v48 = vpop.f32.mrb[72].mxu0 }
0x2181   :  { %v3095_v47 = vadd.f32 %v3094_v48, %v3044_v45  ;;  %v5184_v49 = vpop.f32.mrb[73].mxu0  ;;  %v6496_v48 = vld [vmem:[#allocation2 + $0x78] sm:$0xff] }
0x2182   :  { %v3097_v50 = vpop.f32.mrb[74].mxu0  ;;  %v3234_v41 = vrot.slane %v6496_v48, %v5802_v63 }
0x2183   :  { %v3098_v43 = vadd.f32 %v3097_v50, %v3044_v45  ;;  %v5185_v11 = vpop.f32.mrb[75].mxu0  ;;  %v3101_v51 = vmax.f32 %v3095_v47, 0.0 }
0x2185   :  { %v3102_v52 = vmax.f32 %v3098_v43, 0.0 }
0x2187   :  { %v3111_v53 = vpack.c.bf16 %v3102_v52, %v3101_v51 }
0x2189   :  { %5195 = vmatmul.mubr.msk.bf16.vlgmr.msra.gmra.mrb[80].mxu1 %vm215_vm5, %v3111_v53 }
0x218a   :  { %5208 = vmatprep.mubr.msk.bf16.mxu1 %vm5695_vm9, %v5693_v8 }
0x225c   :  { %v3177_v9 = vpop.f32.mrb[80].mxu1 }
0x225d   :  { %v3178_v60 = vadd.f32 %v3177_v9, %v3115_v54  ;;  %v5196_v15 = vpop.f32.mrb[81].mxu1 }
0x225e   :  { %v3180_v6 = vpop.f32.mrb[82].mxu1 }
0x225f   :  { %v3181_v12 = vadd.f32 %v3180_v6, %v3115_v54  ;;  %v5197_v55 = vpop.f32.mrb[83].mxu1  ;;  %v3184_v3 = vadd.f32 %v3178_v60, %v3034_v17 }
0x2261   :  { %v3185_v56 = vadd.f32 %v3181_v12, %v3035_v35  ;;  %v3186_v5 = vsel %vm313_vm8, %v3184_v3, 0.0 }
0x2262   :  { %3187 = vadd.xlane.f32.xlu1 %v3186_v5 }
0x2263   :  { %v3189_v0 = vsel %vm313_vm8, %v3185_v56, 0.0 }
0x2264   :  { %3190 = vadd.xlane.f32.xlu0 %v3189_v0 }
0x22ef   :  { %v3188_v18 = vpop.xlane.xlu1 %3187 }
0x22f0   :  { %v3192_v58 = vmul.f32 0.03125, %v3188_v18 }
0x22f1   :  { %v3191_v62 = vpop.xlane.xlu0 %3190 }
0x22f2   :  { %v3194_v42 = vsub.f32 %v3184_v3, %v3192_v58  ;;  %v3193_v59 = vmul.f32 0.03125, %v3191_v62 }
0x22f4   :  { %v3195_v44 = vsub.f32 %v3185_v56, %v3193_v59  ;;  %v3196_v10 = vmul.f32 %v3194_v42, %v3194_v42  ;;  %v5659_v59 = vld [vmem:[%s6747_s1 + $0x10] sm:$0xff] }
0x22f6   :  { %v3198_v7 = vsel %vm313_vm8, %v3196_v10, 0.0  ;;  %v3197_v46 = vmul.f32 %v3195_v44, %v3195_v44 }
0x22f7   :  { %3199 = vadd.xlane.f32.xlu0 %v3198_v7 }
0x22f8   :  { %v3201_v19 = vsel %vm313_vm8, %v3197_v46, 0.0 }
0x22fb   :  { %3202 = vadd.xlane.f32.xlu0 %v3201_v19 }
0x2384   :  { %v3200_v39 = vpop.xlane.xlu0 %3199 }
0x2385   :  { %v3204_v29 = vmul.f32 0.03125, %v3200_v39 }
0x2387   :  { %v3206_v26 = vadd.f32 1e-05, %v3204_v29 }
0x2388   :  { %v3203_v28 = vpop.xlane.xlu0 %3202 }
0x2389   :  { %5577 = vrsqrt.f32 %v3206_v26  ;;  %v3205_v14 = vmul.f32 0.03125, %v3203_v28 }
0x238b   :  { %v3207_v31 = vadd.f32 1e-05, %v3205_v14 }
0x238d   :  { %5579 = vrsqrt.f32 %v3207_v31 }
0x2393   :  { %v5578_v30 = vpop.eup %5577 }
0x2394   :  { %v3210_v33 = vmul.f32 %v5578_v30, %v3194_v42 }
0x2396   :  { %v3216_v17 = vmul.f32 %v3215_v36, %v3210_v33 }
0x2397   :  { %v5580_v34 = vpop.eup %5579 }
0x2398   :  { %v3211_v35 = vmul.f32 %v5580_v34, %v3195_v44  ;;  %v6487_v2 = vadd.f32 %v3221_v16, %v3216_v17 }
0x239a   :  { %v3217_v38 = vmul.f32 %v3215_v36, %v3211_v35 }
0x239c   :  { %v6489_v40 = vadd.f32 %v3221_v16, %v3217_v38 }
0x239e   :  { %v3230_v45 = vpack.c.bf16 %v6489_v40, %v6487_v2 }
0x23a0   :  { %5203 = vmatmul.mubr.msk.bf16.vlgmr.msra.gmra.mrb[76].mxu0 %vm313_vm8, %v3230_v45 }
0x23a1   :  { %5214 = vmatprep.mubr.msk.bf16.mxu0 %vm5695_vm9, %v5693_v8 }
0x2473   :  { %v3284_v47 = vpop.f32.mrb[76].mxu0 }
0x2474   :  { %v3285_v49 = vadd.f32 %v3284_v47, %v3234_v41  ;;  %v5204_v50 = vpop.f32.mrb[77].mxu0 }
0x2475   :  { %v3287_v43 = vpop.f32.mrb[78].mxu0 }
0x2476   :  { %v5205_v11 = vpop.f32.mrb[79].mxu0  ;;  %v3288_v51 = vadd.f32 %v3287_v43, %v3234_v41  ;;  %v3292_v52 = vmul.f32 %v5845_v22, %v3285_v49  ;;  %v3345_v53 = vmul.f32 %v5848_v23, %v3285_v49  ;;  %v3392_v54 = vmul.f32 %v5851_v24, %v3285_v49 }
0x2477   :  { %v3439_v9 = vmul.f32 %v5854_v25, %v3285_v49 }
0x2478   :  { %v3293_v60 = vmul.f32 %v5845_v22, %v3288_v51  ;;  %v3346_v15 = vmul.f32 %v5848_v23, %v3288_v51  ;;  %v3393_v6 = vmul.f32 %v5851_v24, %v3288_v51  ;;  %v3440_v12 = vmul.f32 %v5854_v25, %v3288_v51 }
0x2479   :  { %v6508_v55 = vpack.c.bf16 %v3288_v51, %v3285_v49 }
0x247a   :  { %v3294_v3 = vpack.c.bf16 %v3293_v60, %v3292_v52  ;;  %v3347_v56 = vpack.c.bf16 %v3346_v15, %v3345_v53  ;;  %v3394_v5 = vpack.c.bf16 %v3393_v6, %v3392_v54  ;;  %v3441_v0 = vpack.c.bf16 %v3440_v12, %v3439_v9 }
0x247b   :  { %3296 = vrot.lane.b32.xlu0 %v6508_v55, %s5696_s13 }
0x24ed   :  { %v3297_v18 = vpop.permute.xlu0 %3296 }
0x24ee   :  { %v3302_v58 = vsel %vm313_vm8, %v3297_v18, 0 }
0x24ef   :  { %5207 = vmatpush3.bf16.xpose.msra.mxu1 %v3302_v58  ;;  %5213 = vmatpush3.bf16.xpose.msra.mxu0 %v3302_v58 }
0x24f0   :  { %5218 = vmatprep.subr.bf16.mxu1 %v5693_v8  ;;  %5224 = vmatprep.subr.bf16.mxu0 %v5693_v8 }
0x24f6   :  { %5209 = vmatmul.mubr.msk.bf16.vlgmr.msra.gmra.mrb[84].mxu1 %vm313_vm8, %v3294_v3  ;;  %5215 = vmatmul.mubr.msk.bf16.vlgmr.msra.gmra.mrb[80].mxu0 %vm313_vm8, %v3347_v56 }
0x24f7   :  { %5219 = vmatpush3.bf16.xpose.msra.mxu1 %v3302_v58  ;;  %5225 = vmatpush3.bf16.xpose.msra.mxu0 %v3302_v58 }
0x24f8   :  { %5220 = vmatprep.mubr.msk.bf16.mxu1 %vm5695_vm9, %v5693_v8  ;;  %5226 = vmatprep.mubr.msk.bf16.mxu0 %vm5695_vm9, %v5693_v8 }
0x24f9   :  { %5240 = vmatprep.subr.bf16.mxu0 %v5693_v8 }
0x24fe   :  { %5221 = vmatmul.mubr.msk.bf16.vlgmr.msra.gmra.mrb[88].mxu1 %vm313_vm8, %v3394_v5  ;;  %5227 = vmatmul.mubr.msk.bf16.vlgmr.msra.gmra.mrb[84].mxu0 %vm313_vm8, %v3441_v0 }
0x24ff   :  { %5244 = vmatprep.mubr.msk.bf16.mxu0 %vm5695_vm9, %v5693_v8 }
0x25c9   :  { %v3338_v62 = vpop.f32.mrb[84].mxu1  ;;  %v3385_v42 = vpop.f32.mrb[80].mxu0 }
0x25ca   :  { %v3339_v44 = vadd.f32 %v5659_v59, %v3338_v62  ;;  %v3386_v10 = vadd.f32 %v5659_v59, %v3385_v42  ;;  %v5210_v7 = vpop.f32.mrb[85].mxu1  ;;  %v5216_v46 = vpop.f32.mrb[81].mxu0 }
0x25cb   :  { %v3341_v19 = vpop.f32.mrb[86].mxu1  ;;  %v3388_v57 = vpop.f32.mrb[82].mxu0 }
0x25cc   :  { %v3342_v39 = vadd.f32 %v5660_v20, %v3341_v19  ;;  %v5211_v29 = vpop.f32.mrb[87].mxu1  ;;  %v5217_v26 = vpop.f32.mrb[83].mxu0  ;;  %v3486_v28 = vsel %vm117_vm0, %v3339_v44, -inf  ;;  %v3492_v14 = vsel %vm117_vm0, %v3386_v10, -inf  ;;  %v3389_v31 = vadd.f32 %v5660_v20, %v3388_v57 }
0x25cd   :  { %3487 = vmax.xlane.f32.xlu0 %v3486_v28  ;;  %3493 = vmax.xlane.f32.xlu1 %v3492_v14 }
0x25ce   :  { %v3489_v30 = vsel %vm117_vm0, %v3342_v39, -inf  ;;  %v3495_v47 = vsel %vm117_vm0, %v3389_v31, -inf }
0x25d1   :  { %v3432_v36 = vpop.f32.mrb[88].mxu1  ;;  %3490 = vmax.xlane.f32.xlu1 %v3489_v30  ;;  %v3479_v33 = vpop.f32.mrb[84].mxu0 }
0x25d2   :  { %v5222_v34 = vpop.f32.mrb[89].mxu1  ;;  %v5228_v16 = vpop.f32.mrb[85].mxu0  ;;  %v3433_v38 = vadd.f32 %v5659_v59, %v3432_v36  ;;  %v3480_v49 = vadd.f32 %v5659_v59, %v3479_v33 }
0x25d3   :  { %v3435_v17 = vpop.f32.mrb[90].mxu1  ;;  %v3482_v35 = vpop.f32.mrb[86].mxu0 }
0x25d4   :  { %v5223_v45 = vpop.f32.mrb[91].mxu1  ;;  %v5229_v41 = vpop.f32.mrb[87].mxu0  ;;  %v3498_v50 = vsel %vm117_vm0, %v3433_v38, -inf  ;;  %v3436_v43 = vadd.f32 %v5660_v20, %v3435_v17  ;;  %v3504_v11 = vsel %vm117_vm0, %v3480_v49, -inf  ;;  %v3483_v51 = vadd.f32 %v5660_v20, %v3482_v35 }
0x25d5   :  { %3496 = vmax.xlane.f32.xlu1 %v3495_v47 }
0x25d6   :  { %v3501_v52 = vsel %vm117_vm0, %v3436_v43, -inf  ;;  %v3507_v53 = vsel %vm117_vm0, %v3483_v51, -inf }
0x25d9   :  { %3499 = vmax.xlane.f32.xlu1 %v3498_v50 }
0x25dd   :  { %3505 = vmax.xlane.f32.xlu1 %v3504_v11 }
0x25e1   :  { %3502 = vmax.xlane.f32.xlu1 %v3501_v52 }
0x25e5   :  { %3508 = vmax.xlane.f32.xlu1 %v3507_v53 }
0x265a   :  { %v3488_v54 = vpop.xlane.xlu0 %3487  ;;  %v3494_v9 = vpop.xlane.xlu1 %3493 }
0x265b   :  { %v3510_v60 = vsub.f32 %v3339_v44, %v3488_v54  ;;  %v3512_v15 = vsub.f32 %v3386_v10, %v3494_v9 }
0x265d   :  { %v3518_v6 = vmul.f32 1.442695, %v3510_v60  ;;  %v3522_v12 = vmul.f32 1.442695, %v3512_v15 }
0x265e   :  { %v3491_v3 = vpop.xlane.xlu1 %3490 }
0x265f   :  { %5581 = vpow2.f32 %v3518_v6  ;;  %v3511_v56 = vsub.f32 %v3342_v39, %v3491_v3 }
0x2660   :  { %5583 = vpow2.f32 %v3522_v12 }
0x2661   :  { %v3520_v5 = vmul.f32 1.442695, %v3511_v56 }
0x2662   :  { %v3497_v0 = vpop.xlane.xlu1 %3496 }
0x2663   :  { %5585 = vpow2.f32 %v3520_v5  ;;  %v3513_v18 = vsub.f32 %v3389_v31, %v3497_v0 }
0x2665   :  { %v3524_v58 = vmul.f32 1.442695, %v3513_v18 }
0x2666   :  { %v3500_v62 = vpop.xlane.xlu1 %3499 }
0x2667   :  { %5587 = vpow2.f32 %v3524_v58  ;;  %v3514_v42 = vsub.f32 %v3433_v38, %v3500_v62 }
0x2669   :  { %v5582_v59 = vpop.eup %5581  ;;  %v3526_v7 = vmul.f32 1.442695, %v3514_v42 }
0x266a   :  { %v3506_v46 = vpop.xlane.xlu1 %3505  ;;  %v3534_v44 = vsel %vm117_vm0, %v5582_v59, 0.0  ;;  %v5584_v10 = vpop.eup %5583 }
0x266b   :  { %5589 = vpow2.f32 %v3526_v7  ;;  %v3516_v19 = vsub.f32 %v3480_v49, %v3506_v46  ;;  %3535 = vadd.xlane.f32.xlu1 %v3534_v44  ;;  %v3540_v26 = vsel %vm117_vm0, %v5584_v10, 0.0 }
0x266d   :  { %v5586_v57 = vpop.eup %5585  ;;  %v3530_v20 = vmul.f32 1.442695, %v3516_v19 }
0x266e   :  { %v3503_v39 = vpop.xlane.xlu1 %3502  ;;  %v3537_v29 = vsel %vm117_vm0, %v5586_v57, 0.0 }
0x266f   :  { %5591 = vpow2.f32 %v3530_v20  ;;  %v3515_v28 = vsub.f32 %v3436_v43, %v3503_v39  ;;  %3538 = vadd.xlane.f32.xlu0 %v3537_v29  ;;  %3541 = vadd.xlane.f32.xlu1 %v3540_v26  ;;  %v5403_v26 = vld [vmem:[%s6748_s2 + $0x120] sm:$0xff]  }
0x2670   :  { %5241 = vmatpush3.bf16.msra.mxu0 %v5403_v26 }
0x2671   :  { %v5588_v14 = vpop.eup %5587  ;;  %v3528_v31 = vmul.f32 1.442695, %v3515_v28  ;;  %5242 = vmatprep.subr.bf16.mxu0 %v5693_v8  ;;  %v5404_v28 = vld [vmem:[%s6748_s2 + $0x128] sm:$0xff]  }
0x2672   :  { %v3509_v30 = vpop.xlane.xlu1 %3508  ;;  %v3543_v36 = vsel %vm117_vm0, %v5588_v14, 0.0 }
0x2673   :  { %5593 = vpow2.f32 %v3528_v31  ;;  %v3517_v33 = vsub.f32 %v3483_v51, %v3509_v30  ;;  %3544 = vadd.xlane.f32.xlu0 %v3543_v36 }
0x2674   :  { %5243 = vmatpush3.bf16.msra.mxu0 %v5404_v28 }
0x2675   :  { %v5590_v34 = vpop.eup %5589  ;;  %v3532_v16 = vmul.f32 1.442695, %v3517_v33  ;;  %5248 = vmatprep.subr.bf16.mxu0 %v5693_v8 }
0x2676   :  { %v3546_v17 = vsel %vm117_vm0, %v5590_v34, 0.0 }
0x2677   :  { %5595 = vpow2.f32 %v3532_v16  ;;  %3547 = vadd.xlane.f32.xlu1 %v3546_v17 }
0x2679   :  { %v5592_v35 = vpop.eup %5591 }
0x267a   :  { %v3552_v38 = vsel %vm117_vm0, %v5592_v35, 0.0 }
0x267b   :  { %3553 = vadd.xlane.f32.xlu1 %v3552_v38 }
0x267d   :  { %v5594_v45 = vpop.eup %5593 }
0x267e   :  { %v3549_v41 = vsel %vm117_vm0, %v5594_v45, 0.0 }
0x267f   :  { %3550 = vadd.xlane.f32.xlu0 %v3549_v41 }
0x2681   :  { %v5596_v47 = vpop.eup %5595 }
0x2682   :  { %v3555_v49 = vsel %vm117_vm0, %v5596_v47, 0.0 }
0x2683   :  { %3556 = vadd.xlane.f32.xlu0 %v3555_v49 }
0x268c   :  { %3578 = vrot.lane.b32.xlu1 %v6508_v55, %s5697_s18 }
0x2690   :  { %3845 = vrot.lane.b32.xlu1 %v6266_v32, %s5697_s18 }
0x26f8   :  { %v3536_v50 = vpop.xlane.xlu1 %3535 }
0x26f9   :  { %5597 = vrcp.f32 %v3536_v50 }
0x26fc   :  { %v3539_v43 = vpop.xlane.xlu0 %3538  ;;  %v3542_v11 = vpop.xlane.xlu1 %3541 }
0x26fd   :  { %5599 = vrcp.f32 %v3539_v43 }
0x26fe   :  { %5601 = vrcp.f32 %v3542_v11 }
0x2700   :  { %v3545_v51 = vpop.xlane.xlu0 %3544 }
0x2701   :  { %5603 = vrcp.f32 %v3545_v51 }
0x2703   :  { %v5598_v53 = vpop.eup %5597 }
0x2704   :  { %v3548_v52 = vpop.xlane.xlu1 %3547  ;;  %v3566_v60 = vmul.f32 %v5598_v53, %v5582_v59 }
0x2705   :  { %5605 = vrcp.f32 %v3548_v52 }
0x2707   :  { %v5600_v54 = vpop.eup %5599 }
0x2708   :  { %v3554_v9 = vpop.xlane.xlu1 %3553  ;;  %v3567_v15 = vmul.f32 %v5600_v54, %v5586_v57  ;;  %v5602_v6 = vpop.eup %5601 }
0x2709   :  { %v3568_v3 = vmul.f32 %v5602_v6, %v5584_v10 }
0x270a   :  { %v3574_v12 = vpack.c.bf16 %v3567_v15, %v3566_v60  ;;  %v3680_v15 = vrot.slane %v6496_v48, %v5806_v1 }
0x270b   :  { %v5604_v55 = vpop.eup %5603 }
0x270c   :  { %v3569_v56 = vmul.f32 %v5604_v55, %v5588_v14  ;;  %v3551_v5 = vpop.xlane.xlu0 %3550  ;;  %5232 = vmatprep.mubr.msk.bf16.mxu1 %vm117_vm0, %v3574_v12  ;;  %v3579_v0 = vpop.permute.xlu1 %3578 }
0x270d   :  { %5607 = vrcp.f32 %v3551_v5  ;;  %5230 = vmatprep.subr.bf16.mxu1 %v3579_v0 }
0x270e   :  { %5231 = vmatpush3.bf16.msra.mxu1 %v3579_v0  ;;  %v3575_v18 = vpack.c.bf16 %v3569_v56, %v3568_v3  ;;  %5609 = vrcp.f32 %v3554_v9 }
0x270f   :  { %5256 = vmatprep.subr.bf16.mxu1 %v5693_v8  ;;  %v5606_v42 = vpop.eup %5605 }
0x2710   :  { %v3557_v58 = vpop.xlane.xlu0 %3556  ;;  %v3846_v62 = vpop.permute.xlu1 %3845  ;;  %v3570_v46 = vmul.f32 %v5606_v42, %v5590_v34 }
0x2711   :  { %5611 = vrcp.f32 %v3557_v58  ;;  %5233 = vmatmul.mubr.msk.bf16.vlgmr.msra.gmra.mrb[92].mxu1 %vm117_vm0, %v3575_v18  ;;  %v6556_v59 = vsel %vm313_vm8, %v3846_v62, 0 }
0x2717   :  { %v5608_v7 = vpop.eup %5607  ;;  %5257 = vmatpush3.bf16.xpose.msra.mxu1 %v6556_v59 }
0x2718   :  { %v3571_v44 = vmul.f32 %v5608_v7, %v5594_v45  ;;  %5268 = vmatprep.subr.bf16.mxu1 %v5693_v8  ;;  %v5610_v10 = vpop.eup %5609 }
0x2719   :  { %v3572_v20 = vmul.f32 %v5610_v10, %v5592_v35 }
0x271a   :  { %v3576_v19 = vpack.c.bf16 %v3571_v44, %v3570_v46 }
0x271b   :  { %v5612_v57 = vpop.eup %5611 }
0x271c   :  { %5236 = vmatprep.mubr.msk.bf16.mxu1 %vm117_vm0, %v3576_v19  ;;  %v3573_v39 = vmul.f32 %v5612_v57, %v5596_v47 }
0x271e   :  { %v3577_v29 = vpack.c.bf16 %v3573_v39, %v3572_v20 }
0x2720   :  { %5237 = vmatmul.mubr.msk.bf16.gmra.mrb[96].mxu1 %vm117_vm0, %v3577_v29  ;;  %v5406_v29 = vld [vmem:[%s6748_s2 + $0x138] sm:$0xff]  }
0x2721   :  { %5258 = vmatprep.mubr.msk.bf16.mxu1 %vm5695_vm9, %v5693_v8 }
0x27e4   :  { %v5234_v14 = vpop.f32.mrb[92].mxu1 }
0x27e5   :  { %v3660_v31 = vmul.f32 %v5234_v14, %v5848_v23  ;;  %v3627_v30 = vpop.f32.mrb[93].mxu1 }
0x27e6   :  { %v3658_v36 = vmul.f32 %v5845_v22, %v3627_v30  ;;  %v5235_v33 = vpop.f32.mrb[94].mxu1 }
0x27e7   :  { %v3661_v34 = vmul.f32 %v5235_v33, %v5848_v23  ;;  %v3630_v16 = vpop.f32.mrb[95].mxu1 }
0x27e8   :  { %v3662_v17 = vadd.f32 %v3660_v31, %v3658_v36  ;;  %v3659_v35 = vmul.f32 %v5845_v22, %v3630_v16 }
0x27ea   :  { %v3663_v38 = vadd.f32 %v3661_v34, %v3659_v35  ;;  %v3768_v34 = vrot.slane %v6496_v48, %v5969_v61 }
0x27f3   :  { %v5238_v45 = vpop.f32.mrb[96].mxu1 }
0x27f4   :  { %v3643_v41 = vpop.f32.mrb[97].mxu1  ;;  %v3668_v43 = vmul.f32 %v5238_v45, %v5854_v25  ;;  %v3774_v45 = vrot.slane %v6496_v48, %v5974_v4 }
0x27f5   :  { %v3664_v47 = vmul.f32 %v5851_v24, %v3643_v41  ;;  %v5239_v49 = vpop.f32.mrb[98].mxu1 }
0x27f6   :  { %v3646_v50 = vpop.f32.mrb[99].mxu1  ;;  %v3669_v53 = vmul.f32 %v5239_v49, %v5854_v25 }
0x27f7   :  { %v3666_v11 = vadd.f32 %v3664_v47, %v3662_v17  ;;  %v3665_v51 = vmul.f32 %v5851_v24, %v3646_v50 }
0x27f9   :  { %v3670_v52 = vadd.f32 %v3668_v43, %v3666_v11  ;;  %v3667_v54 = vadd.f32 %v3665_v51, %v3663_v38  ;;  %v3785_v43 = vrot.slane %v6496_v48, %v5990_v27 }
0x27fb   :  { %v3671_v9 = vadd.f32 %v3669_v53, %v3667_v54 }
0x27fd   :  { %v3676_v60 = vpack.c.bf16 %v3671_v9, %v3670_v52 }
0x27ff   :  { %5245 = vmatmul.mubr.msk.bf16.vlgmr.msra.gmra.mrb[88].mxu0 %vm313_vm8, %v3676_v60 }
0x2800   :  { %5252 = vmatprep.mubr.msk.bf16.mxu0 %vm5695_vm9, %v5693_v8 }
0x28d2   :  { %v3730_v6 = vpop.f32.mrb[88].mxu0 }
0x28d3   :  { %v3731_v12 = vadd.f32 %v3730_v6, %v3680_v15  ;;  %v5246_v55 = vpop.f32.mrb[89].mxu0 }
0x28d4   :  { %v3733_v3 = vpop.f32.mrb[90].mxu0 }
0x28d5   :  { %v3737_v56 = vadd.f32 %v3731_v12, %v6487_v2  ;;  %v3734_v5 = vadd.f32 %v3733_v3, %v3680_v15  ;;  %v5247_v0 = vpop.f32.mrb[91].mxu0 }
0x28d7   :  { %v3738_v18 = vadd.f32 %v3734_v5, %v6489_v40  ;;  %v3739_v58 = vsel %vm313_vm8, %v3737_v56, 0.0  ;;  %v5405_v40 = vld [vmem:[%s6748_s2 + $0x130] sm:$0xff]  }
0x28d8   :  { %3740 = vadd.xlane.f32.xlu0 %v3739_v58  ;;  %5249 = vmatpush3.bf16.msra.mxu0 %v5405_v40 }
0x28d9   :  { %v3742_v62 = vsel %vm313_vm8, %v3738_v18, 0.0  ;;  %5250 = vmatprep.subr.bf16.mxu0 %v5693_v8 }
0x28dc   :  { %3743 = vadd.xlane.f32.xlu0 %v3742_v62  ;;  %5251 = vmatpush3.bf16.msra.mxu0 %v5406_v29 }
0x28dd   :  { %5262 = vmatprep.subr.bf16.mxu0 %v5693_v8 }
0x2965   :  { %v3741_v42 = vpop.xlane.xlu0 %3740 }
0x2966   :  { %v3745_v7 = vmul.f32 0.03125, %v3741_v42 }
0x2968   :  { %v3747_v46 = vsub.f32 %v3737_v56, %v3745_v7 }
0x2969   :  { %v3744_v44 = vpop.xlane.xlu0 %3743 }
0x296a   :  { %v3746_v10 = vmul.f32 0.03125, %v3744_v44  ;;  %v3749_v19 = vmul.f32 %v3747_v46, %v3747_v46 }
0x296c   :  { %v3748_v57 = vsub.f32 %v3738_v18, %v3746_v10  ;;  %v3751_v20 = vsel %vm313_vm8, %v3749_v19, 0.0 }
0x296d   :  { %3752 = vadd.xlane.f32.xlu0 %v3751_v20  ;;  %v5662_v20 = vld [vmem:[%s6747_s1 + $0x28] sm:$0xff] }
0x296e   :  { %v3750_v2 = vmul.f32 %v3748_v57, %v3748_v57 }
0x2970   :  { %v3754_v39 = vsel %vm313_vm8, %v3750_v2, 0.0 }
0x2971   :  { %3755 = vadd.xlane.f32.xlu0 %v3754_v39 }
0x29fa   :  { %v3753_v26 = vpop.xlane.xlu0 %3752 }
0x29fb   :  { %v3757_v28 = vmul.f32 0.03125, %v3753_v26 }
0x29fd   :  { %v3759_v14 = vadd.f32 1e-05, %v3757_v28 }
0x29fe   :  { %v3756_v31 = vpop.xlane.xlu0 %3755 }
0x29ff   :  { %5613 = vrsqrt.f32 %v3759_v14  ;;  %v3758_v30 = vmul.f32 0.03125, %v3756_v31 }
0x2a01   :  { %v3760_v36 = vadd.f32 1e-05, %v3758_v30 }
0x2a03   :  { %5615 = vrsqrt.f32 %v3760_v36 }
0x2a09   :  { %v5614_v33 = vpop.eup %5613 }
0x2a0a   :  { %v3763_v16 = vmul.f32 %v5614_v33, %v3747_v46 }
0x2a0c   :  { %v3769_v35 = vmul.f32 %v3768_v34, %v3763_v16 }
0x2a0d   :  { %v5616_v17 = vpop.eup %5615 }
0x2a0e   :  { %v3764_v38 = vmul.f32 %v5616_v17, %v3748_v57  ;;  %v6603_v47 = vadd.f32 %v3774_v45, %v3769_v35 }
0x2a10   :  { %v3770_v41 = vmul.f32 %v3768_v34, %v3764_v38 }
0x2a12   :  { %v6605_v49 = vadd.f32 %v3774_v45, %v3770_v41 }
0x2a14   :  { %v3781_v50 = vpack.c.bf16 %v6605_v49, %v6603_v47 }
0x2a16   :  { %5253 = vmatmul.mubr.msk.bf16.vlgmr.msra.gmra.mrb[92].mxu0 %vm313_vm8, %v3781_v50 }
0x2a17   :  { %5263 = vmatpush3.bf16.xpose.msra.mxu0 %v6556_v59  ;;  %5264 = vmatprep.mubr.msk.bf16.mxu0 %vm5695_vm9, %v5693_v8 }
0x2a18   :  { %5274 = vmatprep.subr.bf16.mxu0 %v5693_v8 }
0x2ae9   :  { %v3835_v11 = vpop.f32.mrb[92].mxu0 }
0x2aea   :  { %v3836_v51 = vadd.f32 %v3835_v11, %v3785_v43  ;;  %v5254_v52 = vpop.f32.mrb[93].mxu0 }
0x2aeb   :  { %v3838_v53 = vpop.f32.mrb[94].mxu0 }
0x2aec   :  { %v5255_v54 = vpop.f32.mrb[95].mxu0  ;;  %v3839_v9 = vadd.f32 %v3838_v53, %v3785_v43  ;;  %v3842_v60 = vmul.f32 %v5845_v22, %v3836_v51  ;;  %v3894_v15 = vmul.f32 %v5848_v23, %v3836_v51  ;;  %v3941_v6 = vmul.f32 %v5851_v24, %v3836_v51 }
0x2aed   :  { %v3988_v12 = vmul.f32 %v5854_v25, %v3836_v51 }
0x2aee   :  { %v3843_v55 = vmul.f32 %v5845_v22, %v3839_v9  ;;  %v3895_v3 = vmul.f32 %v5848_v23, %v3839_v9  ;;  %v3942_v27 = vmul.f32 %v5851_v24, %v3839_v9  ;;  %v3989_v56 = vmul.f32 %v5854_v25, %v3839_v9 }
0x2af0   :  { %v3844_v5 = vpack.c.bf16 %v3843_v55, %v3842_v60  ;;  %v3896_v0 = vpack.c.bf16 %v3895_v3, %v3894_v15  ;;  %v3943_v18 = vpack.c.bf16 %v3942_v27, %v3941_v6  ;;  %v3990_v58 = vpack.c.bf16 %v3989_v56, %v3988_v12 }
0x2af2   :  { %5259 = vmatmul.mubr.msk.bf16.vlgmr.msra.gmra.mrb[100].mxu1 %vm313_vm8, %v3844_v5  ;;  %5265 = vmatmul.mubr.msk.bf16.vlgmr.msra.gmra.mrb[96].mxu0 %vm313_vm8, %v3896_v0 }
0x2af3   :  { %5269 = vmatpush3.bf16.xpose.msra.mxu1 %v6556_v59  ;;  %5275 = vmatpush3.bf16.xpose.msra.mxu0 %v6556_v59  ;;  %v5661_v59 = vld [vmem:[%s6747_s1 + $0x20] sm:$0xff]  ;;  %s5698_s1 = smov 32  }
0x2af4   :  { %5270 = vmatprep.mubr.msk.bf16.mxu1 %vm5695_vm9, %v5693_v8  ;;  %5276 = vmatprep.mubr.msk.bf16.mxu0 %vm5695_vm9, %v5693_v8 }
0x2af5   :  { %5290 = vmatprep.subr.bf16.mxu0 %v5693_v8 }
0x2afa   :  { %5271 = vmatmul.mubr.msk.bf16.vlgmr.msra.gmra.mrb[104].mxu1 %vm313_vm8, %v3943_v18  ;;  %5277 = vmatmul.mubr.msk.bf16.vlgmr.msra.gmra.mrb[100].mxu0 %vm313_vm8, %v3990_v58 }
0x2afb   :  { %5294 = vmatprep.mubr.msk.bf16.mxu0 %vm5695_vm9, %v5693_v8 }
0x2bc5   :  { %v3887_v62 = vpop.f32.mrb[100].mxu1  ;;  %v3934_v42 = vpop.f32.mrb[96].mxu0 }
0x2bc6   :  { %v3888_v7 = vadd.f32 %v5661_v59, %v3887_v62  ;;  %v5260_v46 = vpop.f32.mrb[101].mxu1  ;;  %v5266_v44 = vpop.f32.mrb[97].mxu0  ;;  %v3935_v57 = vadd.f32 %v5661_v59, %v3934_v42 }
0x2bc7   :  { %v3890_v10 = vpop.f32.mrb[102].mxu1  ;;  %v3937_v19 = vpop.f32.mrb[98].mxu0 }
0x2bc8   :  { %v3891_v2 = vadd.f32 %v5662_v20, %v3890_v10  ;;  %v5261_v39 = vpop.f32.mrb[103].mxu1  ;;  %v5267_v40 = vpop.f32.mrb[99].mxu0  ;;  %v4035_v29 = vsel %vm117_vm0, %v3888_v7, -inf  ;;  %v3938_v28 = vadd.f32 %v5662_v20, %v3937_v19  ;;  %v4041_v14 = vsel %vm117_vm0, %v3935_v57, -inf }
0x2bc9   :  { %4036 = vmax.xlane.f32.xlu0 %v4035_v29 }
0x2bca   :  { %v4038_v26 = vsel %vm117_vm0, %v3891_v2, -inf  ;;  %v4044_v45 = vsel %vm117_vm0, %v3938_v28, -inf }
0x2bcb   :  { %4039 = vmax.xlane.f32.xlu1 %v4038_v26 }
0x2bcd   :  { %v3981_v31 = vpop.f32.mrb[104].mxu1  ;;  %4042 = vmax.xlane.f32.xlu0 %v4041_v14  ;;  %v4028_v30 = vpop.f32.mrb[100].mxu0 }
0x2bce   :  { %v5272_v36 = vpop.f32.mrb[105].mxu1  ;;  %v5278_v33 = vpop.f32.mrb[101].mxu0  ;;  %v3982_v17 = vadd.f32 %v5661_v59, %v3981_v31  ;;  %v4029_v41 = vadd.f32 %v5661_v59, %v4028_v30 }
0x2bcf   :  { %v3984_v34 = vpop.f32.mrb[106].mxu1  ;;  %v4031_v16 = vpop.f32.mrb[102].mxu0 }
0x2bd0   :  { %v5273_v35 = vpop.f32.mrb[107].mxu1  ;;  %v5279_v38 = vpop.f32.mrb[103].mxu0  ;;  %v4047_v50 = vsel %vm117_vm0, %v3982_v17, -inf  ;;  %v3985_v43 = vadd.f32 %v5662_v20, %v3984_v34  ;;  %v4053_v11 = vsel %vm117_vm0, %v4029_v41, -inf  ;;  %v4032_v51 = vadd.f32 %v5662_v20, %v4031_v16 }
0x2bd1   :  { %4045 = vmax.xlane.f32.xlu0 %v4044_v45 }
0x2bd2   :  { %v4050_v52 = vsel %vm117_vm0, %v3985_v43, -inf  ;;  %v4056_v53 = vsel %vm117_vm0, %v4032_v51, -inf }
0x2bd5   :  { %4048 = vmax.xlane.f32.xlu0 %v4047_v50 }
0x2bd9   :  { %4054 = vmax.xlane.f32.xlu0 %v4053_v11 }
0x2bdd   :  { %4051 = vmax.xlane.f32.xlu0 %v4050_v52 }
0x2be1   :  { %4057 = vmax.xlane.f32.xlu0 %v4056_v53 }
0x2c56   :  { %v4037_v54 = vpop.xlane.xlu0 %4036 }
0x2c57   :  { %v4059_v9 = vsub.f32 %v3888_v7, %v4037_v54 }
0x2c58   :  { %v4040_v60 = vpop.xlane.xlu1 %4039 }
0x2c59   :  { %v4067_v15 = vmul.f32 1.442695, %v4059_v9  ;;  %v4060_v6 = vsub.f32 %v3891_v2, %v4040_v60 }
0x2c5a   :  { %v4043_v12 = vpop.xlane.xlu0 %4042 }
0x2c5b   :  { %5617 = vpow2.f32 %v4067_v15  ;;  %v4061_v55 = vsub.f32 %v3935_v57, %v4043_v12  ;;  %v4069_v3 = vmul.f32 1.442695, %v4060_v6 }
0x2c5d   :  { %v4071_v27 = vmul.f32 1.442695, %v4061_v55 }
0x2c5e   :  { %v4046_v56 = vpop.xlane.xlu0 %4045 }
0x2c5f   :  { %5619 = vpow2.f32 %v4071_v27  ;;  %v4062_v5 = vsub.f32 %v3938_v28, %v4046_v56 }
0x2c60   :  { %5621 = vpow2.f32 %v4069_v3 }
0x2c61   :  { %v4073_v0 = vmul.f32 1.442695, %v4062_v5 }
0x2c62   :  { %v4049_v18 = vpop.xlane.xlu0 %4048 }
0x2c63   :  { %5623 = vpow2.f32 %v4073_v0  ;;  %v4063_v58 = vsub.f32 %v3982_v17, %v4049_v18 }
0x2c65   :  { %v5618_v62 = vpop.eup %5617  ;;  %v4075_v42 = vmul.f32 1.442695, %v4063_v58 }
0x2c66   :  { %v4055_v59 = vpop.xlane.xlu0 %4054  ;;  %v4083_v7 = vsel %vm117_vm0, %v5618_v62, 0.0 }
0x2c67   :  { %5625 = vpow2.f32 %v4075_v42  ;;  %v4065_v46 = vsub.f32 %v4029_v41, %v4055_v59  ;;  %4084 = vadd.xlane.f32.xlu0 %v4083_v7 }
0x2c69   :  { %v5620_v44 = vpop.eup %5619  ;;  %v4079_v10 = vmul.f32 1.442695, %v4065_v46 }
0x2c6a   :  { %v4052_v19 = vpop.xlane.xlu0 %4051  ;;  %v4089_v57 = vsel %vm117_vm0, %v5620_v44, 0.0  ;;  %v5622_v20 = vpop.eup %5621 }
0x2c6b   :  { %5627 = vpow2.f32 %v4079_v10  ;;  %v4064_v2 = vsub.f32 %v3985_v43, %v4052_v19  ;;  %4090 = vadd.xlane.f32.xlu0 %v4089_v57  ;;  %v4086_v28 = vsel %vm117_vm0, %v5622_v20, 0.0  ;;  %v5407_v10 = vld [vmem:[%s6748_s2 + $0x140] sm:$0xff]   ;;  %v5408_v19 = vld [vmem:[%s6748_s2 + $0x148] sm:$0xff]  }
0x2c6c   :  { %5291 = vmatpush3.bf16.msra.mxu0 %v5407_v10  ;;  %v5663_v10 = vld [vmem:[#allocation2 + $0x78] sm:$0xff] }
0x2c6d   :  { %v5624_v39 = vpop.eup %5623  ;;  %v4077_v40 = vmul.f32 1.442695, %v4064_v2  ;;  %5292 = vmatprep.subr.bf16.mxu0 %v5693_v8 }
0x2c6e   :  { %v4058_v29 = vpop.xlane.xlu0 %4057  ;;  %v4092_v26 = vsel %vm117_vm0, %v5624_v39, 0.0 }
0x2c6f   :  { %5629 = vpow2.f32 %v4077_v40  ;;  %v4066_v14 = vsub.f32 %v4032_v51, %v4058_v29  ;;  %4093 = vadd.xlane.f32.xlu1 %v4092_v26  ;;  %4087 = vadd.xlane.f32.xlu0 %v4086_v28 }
0x2c70   :  { %5293 = vmatpush3.bf16.msra.mxu0 %v5408_v19  ;;  %v4317_v19 = vrot.slane %v5663_v10, %v6015_v13  ;;  %v5414_v13 = vld [vmem:[%s6748_s2 + $0x178] sm:$0xff]  }
0x2c71   :  { %v5626_v31 = vpop.eup %5625  ;;  %v4081_v30 = vmul.f32 1.442695, %v4066_v14  ;;  %5298 = vmatprep.subr.bf16.mxu0 %v5693_v8 }
0x2c72   :  { %v4095_v36 = vsel %vm117_vm0, %v5626_v31, 0.0 }
0x2c73   :  { %5631 = vpow2.f32 %v4081_v30  ;;  %4096 = vadd.xlane.f32.xlu0 %v4095_v36 }
0x2c75   :  { %v5628_v33 = vpop.eup %5627 }
0x2c76   :  { %v4101_v34 = vsel %vm117_vm0, %v5628_v33, 0.0 }
0x2c77   :  { %4102 = vadd.xlane.f32.xlu0 %v4101_v34 }
0x2c79   :  { %v5630_v16 = vpop.eup %5629 }
0x2c7a   :  { %v4098_v17 = vsel %vm117_vm0, %v5630_v16, 0.0 }
0x2c7b   :  { %4099 = vadd.xlane.f32.xlu1 %v4098_v17 }
0x2c7d   :  { %v5632_v35 = vpop.eup %5631 }
0x2c7e   :  { %v4104_v38 = vsel %vm117_vm0, %v5632_v35, 0.0 }
0x2c7f   :  { %4105 = vadd.xlane.f32.xlu1 %v4104_v38 }
0x2c8d   :  { %4127 = vrot.lane.b32.xlu0 %v6266_v32, %s5698_s1 }
0x2cf4   :  { %v4085_v45 = vpop.xlane.xlu0 %4084 }
0x2cf8   :  { %v4091_v41 = vpop.xlane.xlu0 %4090 }
0x2cf9   :  { %5633 = vrcp.f32 %v4091_v41 }
0x2cfa   :  { %5635 = vrcp.f32 %v4085_v45 }
0x2cfc   :  { %v4094_v50 = vpop.xlane.xlu1 %4093  ;;  %v4088_v43 = vpop.xlane.xlu0 %4087 }
0x2cfd   :  { %5637 = vrcp.f32 %v4094_v50 }
0x2cfe   :  { %5639 = vrcp.f32 %v4088_v43 }
0x2d00   :  { %v4097_v11 = vpop.xlane.xlu0 %4096 }
0x2d01   :  { %5641 = vrcp.f32 %v4097_v11 }
0x2d03   :  { %v5634_v52 = vpop.eup %5633 }
0x2d04   :  { %v4103_v51 = vpop.xlane.xlu0 %4102  ;;  %v5636_v53 = vpop.eup %5635  ;;  %v4117_v60 = vmul.f32 %v5634_v52, %v5620_v44 }
0x2d05   :  { %v4115_v32 = vmul.f32 %v5636_v53, %v5618_v62 }
0x2d07   :  { %v5638_v54 = vpop.eup %5637 }
0x2d08   :  { %v5640_v9 = vpop.eup %5639  ;;  %v4118_v15 = vmul.f32 %v5638_v54, %v5624_v39  ;;  %v4100_v6 = vpop.xlane.xlu1 %4099 }
0x2d09   :  { %v4128_v12 = vpop.permute.xlu0 %4127  ;;  %5643 = vrcp.f32 %v4100_v6  ;;  %v4116_v55 = vmul.f32 %v5640_v9, %v5622_v20 }
0x2d0a   :  { %5280 = vmatprep.subr.bf16.mxu1 %v4128_v12  ;;  %v4124_v3 = vpack.c.bf16 %v4118_v15, %v4117_v60  ;;  %5645 = vrcp.f32 %v4103_v51 }
0x2d0b   :  { %5281 = vmatpush3.bf16.msra.mxu1 %v4128_v12  ;;  %v4123_v27 = vpack.c.bf16 %v4116_v55, %v4115_v32  ;;  %v5642_v5 = vpop.eup %5641 }
0x2d0c   :  { %5306 = vmatprep.subr.bf16.mxu1 %v5693_v8  ;;  %v4106_v56 = vpop.xlane.xlu1 %4105  ;;  %v4119_v18 = vmul.f32 %v5642_v5, %v5626_v31  ;;  %v5410_v5 = vld [vmem:[%s6748_s2 + $0x158] sm:$0xff]  }
0x2d0d   :  { %5647 = vrcp.f32 %v4106_v56  ;;  %5282 = vmatprep.mubr.msk.bf16.mxu1 %vm117_vm0, %v4123_v27 }
0x2d0e   :  { %5283 = vmatmul.mubr.msk.bf16.vlgmr.msra.gmra.mrb[108].mxu1 %vm117_vm0, %v4124_v3 }
0x2d13   :  { %v5644_v0 = vpop.eup %5643 }
0x2d14   :  { %v4120_v58 = vmul.f32 %v5644_v0, %v5630_v16  ;;  %v5646_v42 = vpop.eup %5645  ;;  %v5411_v0 = vld [vmem:[%s6748_s2 + $0x160] sm:$0xff]  }
0x2d15   :  { %v4121_v7 = vmul.f32 %v5646_v42, %v5628_v33  ;;  %5307 = vmatpush3.bf16.msra.mxu1 %v5411_v0 }
0x2d16   :  { %v4125_v59 = vpack.c.bf16 %v4120_v58, %v4119_v18  ;;  %v5412_v18 = vld [vmem:[%s6748_s2 + $0x168] sm:$0xff]   ;;  %5308 = vmatprep.subr.bf16.mxu1 %v5693_v8 }
0x2d17   :  { %v5648_v62 = vpop.eup %5647 }
0x2d18   :  { %5286 = vmatprep.mubr.msk.bf16.mxu1 %vm117_vm0, %v4125_v59  ;;  %v4122_v46 = vmul.f32 %v5648_v62, %v5632_v35 }
0x2d19   :  { %5309 = vmatpush3.bf16.msra.mxu1 %v5412_v18 }
0x2d1a   :  { %v4126_v44 = vpack.c.bf16 %v4122_v46, %v4121_v7  ;;  %5310 = vmatprep.subr.bf16.mxu1 %v5693_v8 }
0x2d1c   :  { %5287 = vmatmul.mubr.msk.bf16.gmra.mrb[112].mxu1 %vm117_vm0, %v4126_v44 }
0x2d1d   :  { %5314 = vmatprep.mubr.msk.bf16.mxu1 %vm5695_vm9, %v5693_v8 }
0x2de1   :  { %v5284_v57 = vpop.f32.mrb[108].mxu1 }
0x2de2   :  { %v4209_v20 = vmul.f32 %v5284_v57, %v5848_v23  ;;  %v4176_v2 = vpop.f32.mrb[109].mxu1 }
0x2de3   :  { %v4207_v39 = vmul.f32 %v5845_v22, %v4176_v2  ;;  %v5285_v40 = vpop.f32.mrb[110].mxu1 }
0x2de4   :  { %v4210_v29 = vmul.f32 %v5285_v40, %v5848_v23  ;;  %v4179_v26 = vpop.f32.mrb[111].mxu1  ;;  %v4323_v40 = vrot.slane %v5663_v10, %v6020_v21  ;;  %v3225_v21 = vld [vmem:[#allocation2 + $0x80] sm:$0xff] }
0x2de5   :  { %v4211_v28 = vadd.f32 %v4209_v20, %v4207_v39  ;;  %v4208_v14 = vmul.f32 %v5845_v22, %v4179_v26  ;;  %v4229_v22 = vrot.slane %v6496_v48, %v5998_v37 }
0x2de7   :  { %v4212_v31 = vadd.f32 %v4210_v29, %v4208_v14 }
0x2def   :  { %v5288_v30 = vpop.f32.mrb[112].mxu1 }
0x2df0   :  { %v4192_v36 = vpop.f32.mrb[113].mxu1  ;;  %v4217_v17 = vmul.f32 %v5288_v30, %v5854_v25  ;;  %v4334_v30 = vrot.slane %v3225_v21, %v5802_v63 }
0x2df1   :  { %v4213_v33 = vmul.f32 %v5851_v24, %v4192_v36  ;;  %v5289_v34 = vpop.f32.mrb[114].mxu1 }
0x2df2   :  { %v4195_v16 = vpop.f32.mrb[115].mxu1  ;;  %v4218_v41 = vmul.f32 %v5289_v34, %v5854_v25 }
0x2df3   :  { %v4215_v35 = vadd.f32 %v4213_v33, %v4211_v28  ;;  %v4214_v38 = vmul.f32 %v5851_v24, %v4195_v16 }
0x2df5   :  { %v4219_v45 = vadd.f32 %v4217_v17, %v4215_v35  ;;  %v4216_v23 = vadd.f32 %v4214_v38, %v4212_v31  ;;  %v5413_v31 = vld [vmem:[%s6748_s2 + $0x170] sm:$0xff]  }
0x2df6   :  { %5311 = vmatpush3.bf16.msra.mxu1 %v5413_v31 }
0x2df7   :  { %v4220_v50 = vadd.f32 %v4218_v41, %v4216_v23  ;;  %5312 = vmatprep.subr.bf16.mxu1 %v5693_v8  ;;  %v4405_v23 = vrot.slane %v3225_v21, %v5806_v1 }
0x2df9   :  { %v4225_v43 = vpack.c.bf16 %v4220_v50, %v4219_v45 }
0x2dfa   :  { %5313 = vmatpush3.bf16.msra.mxu1 %v5414_v13 }
0x2dfb   :  { %5295 = vmatmul.mubr.msk.bf16.vlgmr.msra.gmra.mrb[104].mxu0 %vm313_vm8, %v4225_v43 }
0x2dfc   :  { %5302 = vmatprep.mubr.msk.bf16.mxu0 %vm5695_vm9, %v5693_v8 }
0x2ece   :  { %v4279_v11 = vpop.f32.mrb[104].mxu0 }
0x2ecf   :  { %v4280_v51 = vadd.f32 %v4279_v11, %v4229_v22  ;;  %v5296_v52 = vpop.f32.mrb[105].mxu0 }
0x2ed0   :  { %v4282_v53 = vpop.f32.mrb[106].mxu0 }
0x2ed1   :  { %v4286_v24 = vadd.f32 %v4280_v51, %v6603_v47  ;;  %v4283_v54 = vadd.f32 %v4282_v53, %v4229_v22  ;;  %v5297_v9 = vpop.f32.mrb[107].mxu0 }
0x2ed3   :  { %v4287_v25 = vadd.f32 %v4283_v54, %v6605_v49  ;;  %v4288_v60 = vsel %vm313_vm8, %v4286_v24, 0.0  ;;  %v5409_v49 = vld [vmem:[%s6748_s2 + $0x150] sm:$0xff]  }
0x2ed4   :  { %4289 = vadd.xlane.f32.xlu1 %v4288_v60  ;;  %5299 = vmatpush3.bf16.msra.mxu0 %v5409_v49 }
0x2ed5   :  { %v4291_v15 = vsel %vm313_vm8, %v4287_v25, 0.0  ;;  %5300 = vmatprep.subr.bf16.mxu0 %v5693_v8 }
0x2ed8   :  { %4292 = vadd.xlane.f32.xlu1 %v4291_v15  ;;  %5301 = vmatpush3.bf16.msra.mxu0 %v5410_v5 }
0x2ed9   :  { %5318 = vmatprep.subr.bf16.mxu0 %v5693_v8 }
0x2f61   :  { %v4290_v6 = vpop.xlane.xlu1 %4289 }
0x2f62   :  { %v4294_v12 = vmul.f32 0.03125, %v4290_v6 }
0x2f64   :  { %v4296_v32 = vsub.f32 %v4286_v24, %v4294_v12 }
0x2f65   :  { %v4293_v37 = vpop.xlane.xlu1 %4292 }
0x2f66   :  { %v4295_v48 = vmul.f32 0.03125, %v4293_v37  ;;  %v4298_v55 = vmul.f32 %v4296_v32, %v4296_v32 }
0x2f68   :  { %v4297_v3 = vsub.f32 %v4287_v25, %v4295_v48  ;;  %v4300_v27 = vsel %vm313_vm8, %v4298_v55, 0.0  ;;  %v5415_v55 = vld [vmem:[%s6748_s2 + $0x190] sm:$0xff]  }
0x2f69   :  { %4301 = vadd.xlane.f32.xlu1 %v4300_v27 }
0x2f6a   :  { %v4299_v47 = vmul.f32 %v4297_v3, %v4297_v3 }
0x2f6c   :  { %v4303_v56 = vsel %vm313_vm8, %v4299_v47, 0.0 }
0x2f6d   :  { %4304 = vadd.xlane.f32.xlu1 %v4303_v56 }
0x2ff6   :  { %v4302_v58 = vpop.xlane.xlu1 %4301 }
0x2ff7   :  { %v4306_v42 = vmul.f32 0.03125, %v4302_v58  ;;  %v4505_v58 = vrot.slane %v3225_v21, %v5969_v61 }
0x2ff9   :  { %v4308_v59 = vadd.f32 1e-05, %v4306_v42 }
0x2ffa   :  { %v4305_v62 = vpop.xlane.xlu1 %4304 }
0x2ffb   :  { %5649 = vrsqrt.f32 %v4308_v59  ;;  %v4307_v7 = vmul.f32 0.03125, %v4305_v62  ;;  %v4511_v62 = vrot.slane %v3225_v21, %v5974_v4 }
0x2ffd   :  { %v4309_v46 = vadd.f32 1e-05, %v4307_v7 }
0x2fff   :  { %5651 = vrsqrt.f32 %v4309_v46 }
0x3005   :  { %v5650_v44 = vpop.eup %5649 }
0x3006   :  { %v4312_v57 = vmul.f32 %v5650_v44, %v4296_v32 }
0x3008   :  { %v4318_v2 = vmul.f32 %v4317_v19, %v4312_v57  ;;  %v5664_v57 = vld [vmem:[#allocation2 + $0x50] sm:$0xff] }
0x3009   :  { %v5652_v20 = vpop.eup %5651 }
0x300a   :  { %v4313_v39 = vmul.f32 %v5652_v20, %v4297_v3  ;;  %v4324_v26 = vadd.f32 %v4323_v40, %v4318_v2  ;;  %v5416_v3 = vld [vmem:[%s6748_s2 + $0x198] sm:$0xff]   ;;  %v4522_v20 = vrot.slane %v5664_v57, %v5969_v61 }
0x300c   :  { %v4319_v29 = vmul.f32 %v4317_v19, %v4313_v39 }
0x300e   :  { %v4325_v28 = vadd.f32 %v4323_v40, %v4319_v29 }
0x3010   :  { %v4330_v14 = vpack.c.bf16 %v4325_v28, %v4324_v26 }
0x3012   :  { %5303 = vmatmul.mubr.msk.bf16.vlgmr.msra.gmra.mrb[108].mxu0 %vm313_vm8, %v4330_v14 }
0x3013   :  { %5322 = vmatprep.mubr.msk.bf16.mxu0 %vm5695_vm9, %v5693_v8  ;;  %5319 = vmatpush3.bf16.msra.mxu0 %v5415_v55 }
0x3014   :  { %5320 = vmatprep.subr.bf16.mxu0 %v5693_v8 }
0x3017   :  { %5321 = vmatpush3.bf16.msra.mxu0 %v5416_v3 }
0x30e5   :  { %v4384_v36 = vpop.f32.mrb[108].mxu0 }
0x30e6   :  { %v4385_v33 = vadd.f32 %v4384_v36, %v4334_v30  ;;  %v5304_v34 = vpop.f32.mrb[109].mxu0 }
0x30e7   :  { %v4387_v16 = vpop.f32.mrb[110].mxu0 }
0x30e8   :  { %v4388_v17 = vadd.f32 %v4387_v16, %v4334_v30  ;;  %v5305_v35 = vpop.f32.mrb[111].mxu0  ;;  %v4391_v38 = vmax.f32 %v4385_v33, 0.0 }
0x30ea   :  { %v4392_v45 = vmax.f32 %v4388_v17, 0.0 }
0x30ec   :  { %v4401_v41 = vpack.c.bf16 %v4392_v45, %v4391_v38 }
0x30ee   :  { %5315 = vmatmul.mubr.msk.bf16.vlgmr.msra.gmra.mrb[116].mxu1 %vm215_vm5, %v4401_v41 }
0x31c1   :  { %v4467_v50 = vpop.f32.mrb[116].mxu1 }
0x31c2   :  { %v4468_v43 = vadd.f32 %v4467_v50, %v4405_v23  ;;  %v5316_v22 = vpop.f32.mrb[117].mxu1 }
0x31c3   :  { %v4470_v11 = vpop.f32.mrb[118].mxu1 }
0x31c4   :  { %v4474_v51 = vadd.f32 %v4468_v43, %v4324_v26  ;;  %v4471_v52 = vadd.f32 %v4470_v11, %v4405_v23  ;;  %v5317_v63 = vpop.f32.mrb[119].mxu1 }
0x31c6   :  { %v4475_v53 = vadd.f32 %v4471_v52, %v4325_v28  ;;  %v4476_v24 = vsel %vm313_vm8, %v4474_v51, 0.0 }
0x31c7   :  { %4477 = vadd.xlane.f32.xlu1 %v4476_v24 }
0x31c8   :  { %v4479_v54 = vsel %vm313_vm8, %v4475_v53, 0.0 }
0x31c9   :  { %4480 = vadd.xlane.f32.xlu0 %v4479_v54 }
0x3254   :  { %v4478_v9 = vpop.xlane.xlu1 %4477 }
0x3255   :  { %v4482_v25 = vmul.f32 0.03125, %v4478_v9 }
0x3256   :  { %v4481_v60 = vpop.xlane.xlu0 %4480 }
0x3257   :  { %v4484_v15 = vsub.f32 %v4474_v51, %v4482_v25  ;;  %v4483_v6 = vmul.f32 0.03125, %v4481_v60 }
0x3259   :  { %v4485_v1 = vsub.f32 %v4475_v53, %v4483_v6  ;;  %v4486_v12 = vmul.f32 %v4484_v15, %v4484_v15 }
0x325b   :  { %v4488_v32 = vsel %vm313_vm8, %v4486_v12, 0.0  ;;  %v4487_v37 = vmul.f32 %v4485_v1, %v4485_v1 }
0x325c   :  { %4489 = vadd.xlane.f32.xlu1 %v4488_v32 }
0x325d   :  { %v4491_v48 = vsel %vm313_vm8, %v4487_v37, 0.0 }
0x3260   :  { %4492 = vadd.xlane.f32.xlu1 %v4491_v48 }
0x32e9   :  { %v4490_v27 = vpop.xlane.xlu1 %4489 }
0x32ea   :  { %v4494_v47 = vmul.f32 0.03125, %v4490_v27 }
0x32ec   :  { %v4496_v56 = vadd.f32 1e-05, %v4494_v47 }
0x32ed   :  { %v4493_v49 = vpop.xlane.xlu1 %4492 }
0x32ee   :  { %5653 = vrsqrt.f32 %v4496_v56  ;;  %v4495_v5 = vmul.f32 0.03125, %v4493_v49 }
0x32f0   :  { %v4497_v0 = vadd.f32 1e-05, %v4495_v5 }
0x32f2   :  { %5655 = vrsqrt.f32 %v4497_v0 }
0x32f8   :  { %v5654_v18 = vpop.eup %5653 }
0x32f9   :  { %v4500_v42 = vmul.f32 %v5654_v18, %v4484_v15 }
0x32fb   :  { %v4506_v7 = vmul.f32 %v4505_v58, %v4500_v42 }
0x32fc   :  { %v5656_v59 = vpop.eup %5655 }
0x32fd   :  { %v4501_v46 = vmul.f32 %v5656_v59, %v4485_v1  ;;  %v4512_v8 = vadd.f32 %v4511_v62, %v4506_v7 }
0x32ff   :  { %v4507_v44 = vmul.f32 %v4505_v58, %v4501_v46 }
0x3301   :  { %v4513_v10 = vadd.f32 %v4511_v62, %v4507_v44 }
0x3303   :  { %v4518_v19 = vpack.c.bf16 %v4513_v10, %v4512_v8 }
0x3305   :  { %5323 = vmatmul.mubr.msk.bf16.vlgmr.msra.gmra.mrb[112].mxu0 %vm313_vm8, %v4518_v19 }
0x33d8   :  { %v4572_v2 = vpop.f32.mrb[112].mxu0 }
0x33d9   :  { %v4573_v39 = vadd.f32 %v4572_v2, %v4522_v20  ;;  %v5324_v40 = vpop.f32.mrb[113].mxu0 }
0x33da   :  { %v4575_v29 = vpop.f32.mrb[114].mxu0 }
0x33db   :  { %4579 = vst [vmem:[%s6750_s4] sm:$0xff] %v4573_v39  ;;  %v4576_v4 = vadd.f32 %v4575_v29, %v4522_v20  ;;  %v5325_v26 = vpop.f32.mrb[115].mxu0 }
0x33dd   :  { %4580 = vst [vmem:[%s6750_s4 + $0x8] sm:$0xff] %v4576_v4 }
0x33de   :  { %4585 = vsyncpa [#allocation3], 1 }

</bundles_post_ra>
